<compile_context>
chip_gen: v7x
topology: tpu7x:2x2x1
jax: 0.10.0
libtpu: 0.0.40
codegen_flags: <defaults>
</compile_context>

<pallas_src>
import functools

import jax
import jax.numpy as jnp
from jax.experimental import pallas as pl
from jax.experimental.pallas import tpu as pltpu


def _sigmoid(z):
    return 1.0 / (1.0 + jnp.exp(-z))


def _pick_hw_tile(hw):
    """Largest lane-dense tile (multiple of 128) that evenly divides hw."""
    for t in (2048, 1024, 512, 256, 128):
        if t <= hw and hw % t == 0:
            return t
    return hw


# --------------------- kernel 1: 1x1 conv (pointwise matmul) ---------------------
def _conv1x1_kernel(x_ref, w_ref, b_ref, o_ref):
    # x_ref: (1, C, T) lane-dense input slice; w_ref: (C, F); b_ref: (1, F)
    # o_ref: (1, T, F) channels-last output
    x = x_ref[0].astype(jnp.float32)
    w = w_ref[...].astype(jnp.float32)
    b = b_ref[...].astype(jnp.float32)
    y = jax.lax.dot_general(x, w, (((0,), (0,)), ((), ())),
                            preferred_element_type=jnp.float32)      # (T, F)
    o_ref[0] = (y + b).astype(o_ref.dtype)


# --------------------- kernel 2: SoftPooling2D(7, stride=3) ----------------------
def _softpool_kernel(x_ref, o_ref, *, ksize, stride, out_h, out_w):
    # softpool = avgpool(exp(x)*x) / avgpool(exp(x)); the 1/count factors cancel.
    x = x_ref[0].astype(jnp.float32)                                  # (H, W, F)
    e = jnp.exp(x)
    ex = e * x
    for oy in range(out_h):
        for ox in range(out_w):
            y0 = oy * stride
            x0 = ox * stride
            num = jnp.sum(ex[y0:y0 + ksize, x0:x0 + ksize, :], axis=(0, 1), keepdims=True)
            den = jnp.sum(e[y0:y0 + ksize, x0:x0 + ksize, :], axis=(0, 1), keepdims=True)
            o_ref[0, oy:oy + 1, ox:ox + 1, :] = (num / den).astype(o_ref.dtype)


# --------------------- kernels 3 & 4: 3x3 conv, zero pad 1 -----------------------
def _conv3x3_kernel(x_ref, w_ref, b_ref, o_ref, *, stride, out_h, out_w):
    # x_ref: (1, IH, IW, CIN); w_ref: (3, 3, CIN, COUT); b_ref: (1, COUT)
    # o_ref: (1, OH*OW, COUT) flattened-spatial, channels-last
    in_h = x_ref.shape[1]
    in_w = x_ref.shape[2]
    for oy in range(out_h):
        for ox in range(out_w):
            acc = b_ref[...].astype(jnp.float32)                      # (1, COUT)
            for ky in range(3):
                for kx in range(3):
                    iy = oy * stride + ky - 1
                    ix = ox * stride + kx - 1
                    if 0 <= iy < in_h and 0 <= ix < in_w:             # zero-pad taps skipped
                        v = x_ref[0, iy, ix:ix + 1, :].astype(jnp.float32)   # (1, CIN)
                        wk = w_ref[ky, kx].astype(jnp.float32)               # (CIN, COUT)
                        acc = acc + jnp.dot(v, wk, preferred_element_type=jnp.float32)
            p = oy * out_w + ox
            o_ref[0, p:p + 1, :] = acc.astype(o_ref.dtype)


# -------- kernel 5: fused sigmoid + bilinear upsample + gate + apply -------------
def _apply_kernel(x_ref, s_ref, m_ref, o_ref):
    # x_ref: (1, C, T) lane-dense slice of the original input
    # s_ref: (1, S2, C) small attention logits (pre-sigmoid), channels-last
    # m_ref: (S2, T)    bilinear interpolation weights for this HW tile
    # o_ref: (1, C, T)  lane-dense output slice
    x = x_ref[0].astype(jnp.float32)                                  # (C, T)
    s = _sigmoid(s_ref[0].astype(jnp.float32))                        # (S2, C)
    m = m_ref[...].astype(jnp.float32)                                # (S2, T)
    # w_up[c, p] = sum_k s[k, c] * m[k, p]
    w_up = jax.lax.dot_general(s, m, (((0,), (0,)), ((), ())),
                               preferred_element_type=jnp.float32)    # (C, T)
    g = _sigmoid(x[0:1, :])                                           # gate from channel 0
    o_ref[0] = (x * w_up * g).astype(o_ref.dtype)


# ------------------------------ bilinear weights ---------------------------------
def _bilinear_axis_weights(out_size, in_size):
    """PyTorch bilinear (align_corners=False) interpolation matrix (out, in)."""
    d = jnp.arange(out_size, dtype=jnp.float32)
    src = (d + 0.5) * (float(in_size) / float(out_size)) - 0.5
    src = jnp.maximum(src, 0.0)
    i0 = jnp.clip(jnp.floor(src).astype(jnp.int32), 0, in_size - 1)
    i1 = jnp.minimum(i0 + 1, in_size - 1)
    lam = src - i0.astype(jnp.float32)
    rows = jnp.arange(out_size)
    a = jnp.zeros((out_size, in_size), jnp.float32)
    a = a.at[rows, i0].add(1.0 - lam)
    a = a.at[rows, i1].add(lam)
    return a


def _bilinear_matrix(out_h, out_w, in_h, in_w):
    ah = _bilinear_axis_weights(out_h, in_h)                # (out_h, in_h)
    aw = _bilinear_axis_weights(out_w, in_w)                # (out_w, in_w)
    m4 = jnp.einsum("yi,xj->ijyx", ah, aw)                  # (in_h, in_w, out_h, out_w)
    return m4.reshape(in_h * in_w, out_h * out_w)           # (S2, H*W)


# --------------------------------- wrappers --------------------------------------
def _conv3x3(x_nhwc, w, b, *, stride, out_h, out_w):
    n, ih, iw, cin = x_nhwc.shape
    cout = w.shape[-1]
    return pl.pallas_call(
        functools.partial(_conv3x3_kernel, stride=stride, out_h=out_h, out_w=out_w),
        out_shape=jax.ShapeDtypeStruct((n, out_h * out_w, cout), jnp.float32),
        grid_spec=pltpu.PrefetchScalarGridSpec(
            num_scalar_prefetch=0,
            grid=(n,),
            in_specs=[
                pl.BlockSpec((1, ih, iw, cin), lambda i: (i, 0, 0, 0)),
                pl.BlockSpec((3, 3, cin, cout), lambda i: (0, 0, 0, 0)),
                pl.BlockSpec((1, cout), lambda i: (0, 0)),
            ],
            out_specs=pl.BlockSpec((1, out_h * out_w, cout), lambda i: (i, 0, 0)),
        ),
        compiler_params=pltpu.CompilerParams(dimension_semantics=("parallel",)),
    )(x_nhwc, w, b)


def local_attention_forward(x, params):
    n, c, h, w = x.shape
    f = params["w1"].shape[-1]
    hw = h * w
    x_flat = x.reshape(n, c, hw)                  # free contiguous reshape (lane-dense)

    # ---- stage 1: 1x1 conv ----
    t1 = _pick_hw_tile(hw)
    y1 = pl.pallas_call(
        _conv1x1_kernel,
        out_shape=jax.ShapeDtypeStruct((n, hw, f), jnp.float32),
        grid_spec=pltpu.PrefetchScalarGridSpec(
            num_scalar_prefetch=0,
            grid=(n, hw // t1),
            in_specs=[
                pl.BlockSpec((1, c, t1), lambda i, j: (i, 0, j)),
                pl.BlockSpec((c, f), lambda i, j: (0, 0)),
                pl.BlockSpec((1, f), lambda i, j: (0, 0)),
            ],
            out_specs=pl.BlockSpec((1, t1, f), lambda i, j: (i, j, 0)),
        ),
        compiler_params=pltpu.CompilerParams(
            dimension_semantics=("parallel", "parallel")),
    )(x_flat, params["w1"], params["b1"])

    # ---- stage 2: SoftPooling2D(7, stride=3, padding=0) ----
    ph = (h - 7) // 3 + 1
    pw = (w - 7) // 3 + 1
    y2 = pl.pallas_call(
        functools.partial(_softpool_kernel, ksize=7, stride=3, out_h=ph, out_w=pw),
        out_shape=jax.ShapeDtypeStruct((n, ph, pw, f), jnp.float32),
        grid_spec=pltpu.PrefetchScalarGridSpec(
            num_scalar_prefetch=0,
            grid=(n,),
            in_specs=[pl.BlockSpec((1, h, w, f), lambda i: (i, 0, 0, 0))],
            out_specs=pl.BlockSpec((1, ph, pw, f), lambda i: (i, 0, 0, 0)),
        ),
        compiler_params=pltpu.CompilerParams(dimension_semantics=("parallel",)),
    )(y1.reshape(n, h, w, f))

    # ---- stage 3: 3x3 conv, stride 2, pad 1 ----
    h3 = (ph + 2 - 3) // 2 + 1
    w3 = (pw + 2 - 3) // 2 + 1
    y3 = _conv3x3(y2, params["w2"], params["b2"], stride=2, out_h=h3, out_w=w3)

    # ---- stage 4: 3x3 conv, stride 1, pad 1 (attention logits, pre-sigmoid) ----
    y4 = _conv3x3(y3.reshape(n, h3, w3, f), params["w3"], params["b3"],
                  stride=1, out_h=h3, out_w=w3)                    # (n, h3*w3, c)

    # ---- stage 5: fused sigmoid + bilinear upsample + gate + apply ----
    s2 = h3 * w3
    m = _bilinear_matrix(h, w, h3, w3)                             # (s2, hw)
    t5 = _pick_hw_tile(hw)
    cost = pl.CostEstimate(
        flops=int(n * (2 * c * hw * s2 + 3 * c * hw)),
        transcendentals=int(n * (hw + s2 * c)),
        bytes_accessed=int(4 * (2 * n * c * hw + n * s2 * c + s2 * hw)),
    )
    out = pl.pallas_call(
        _apply_kernel,
        out_shape=jax.ShapeDtypeStruct((n, c, hw), x.dtype),
        grid_spec=pltpu.PrefetchScalarGridSpec(
            num_scalar_prefetch=0,
            grid=(n, hw // t5),
            in_specs=[
                pl.BlockSpec((1, c, t5), lambda i, j: (i, 0, j)),
                pl.BlockSpec((1, s2, c), lambda i, j: (i, 0, 0)),
                pl.BlockSpec((s2, t5), lambda i, j: (0, j)),
            ],
            out_specs=pl.BlockSpec((1, c, t5), lambda i, j: (i, 0, j)),
        ),
        compiler_params=pltpu.CompilerParams(
            dimension_semantics=("parallel", "parallel")),
        cost_estimate=cost,
    )(x_flat, y4, m)
    return out.reshape(n, c, h, w)


# --------------------------- pure-JAX reference ----------------------------------
def local_attention_reference(x, params):
    hp = jax.lax.Precision.HIGHEST
    n, c, h, w = x.shape
    f = params["w1"].shape[-1]
    y = jnp.einsum("nchw,cf->nfhw", x, params["w1"], precision=hp)
    y = y + params["b1"].reshape(1, f, 1, 1)
    e = jnp.exp(y)

    def pool_sum(t):
        return jax.lax.reduce_window(t, 0.0, jax.lax.add,
                                     window_dimensions=(1, 1, 7, 7),
                                     window_strides=(1, 1, 3, 3),
                                     padding="VALID")

    y = pool_sum(e * y) / pool_sum(e)          # avg-pool counts cancel exactly

    def conv3x3(t, wgt, b, stride):
        wt = jnp.transpose(wgt, (3, 2, 0, 1))  # (cout, cin, kh, kw)
        out = jax.lax.conv_general_dilated(
            t, wt, window_strides=(stride, stride), padding=((1, 1), (1, 1)),
            dimension_numbers=("NCHW", "OIHW", "NCHW"), precision=hp)
        return out + b.reshape(1, -1, 1, 1)

    y = conv3x3(y, params["w2"], params["b2"], 2)
    y = conv3x3(y, params["w3"], params["b3"], 1)
    y = jax.nn.sigmoid(y)
    m = _bilinear_matrix(h, w, y.shape[2], y.shape[3])
    w_up = jnp.einsum("ncs,sp->ncp", y.reshape(n, c, -1), m,
                      precision=hp).reshape(n, c, h, w)
    g = jax.nn.sigmoid(x[:, :1])
    return x * w_up * g


if __name__ == "__main__":
    key = jax.random.PRNGKey(0)
    ks = jax.random.split(key, 7)

    N, C, H, W = 2, 4, 16, 16        # NCHW input, LocalAttention(channels=4)
    F = 16                           # default f=16

    params = {
        "w1": 0.3 * jax.random.normal(ks[0], (C, F), jnp.float32),        # Conv2d(C, F, 1)
        "b1": 0.1 * jax.random.normal(ks[1], (1, F), jnp.float32),
        "w2": 0.1 * jax.random.normal(ks[2], (3, 3, F, F), jnp.float32),  # Conv2d(F, F, 3, s=2, p=1)
        "b2": 0.1 * jax.random.normal(ks[3], (1, F), jnp.float32),
        "w3": 0.1 * jax.random.normal(ks[4], (3, 3, F, C), jnp.float32),  # Conv2d(F, C, 3, p=1)
        "b3": 0.1 * jax.random.normal(ks[5], (1, C), jnp.float32),
    }
    x = jax.random.normal(ks[6], (N, C, H, W), jnp.float32)

    out = jax.block_until_ready(jax.jit(local_attention_forward)(x, params))
    ref = jax.block_until_ready(local_attention_reference(x, params))

    assert out.shape == x.shape, out.shape
    assert out.dtype == x.dtype, out.dtype
    max_err = float(jnp.max(jnp.abs(out - ref)))
    assert max_err < 5e-3, f"max abs error vs JAX reference: {max_err}"
    print("KERNEL_OK")
</pallas_src>

<mosaic_0001>
module attributes {stable_mosaic.version = 11 : i64} {
  func.func private @main(%arg0: i32) attributes {dimension_semantics = [#tpu.dimension_semantics<core_parallel>], iteration_bounds = array<i64: 2>, tpu.core_type = #tpu.core_type<sc_scalar_subcore>, window_params = []} {
    return
  }
}

module attributes {stable_mosaic.version = 11 : i64} {
  func.func private @main(%arg0: i32) attributes {dimension_semantics = [#tpu.dimension_semantics<core_parallel>], iteration_bounds = array<i64: 2>, tpu.core_type = #tpu.core_type<sc_scalar_subcore>, window_params = []} {
    return
  }
}

module attributes {stable_mosaic.version = 11 : i64} {
  func.func @_conv1x1_kernel(%arg0: i32, %arg1: i32, %arg2: memref<1x4x256xf32, #tpu.memory_space<vmem>>, %arg3: memref<4x16xf32, #tpu.memory_space<vmem>>, %arg4: memref<1x16xf32, #tpu.memory_space<vmem>>, %arg5: memref<1x256x16xf32, #tpu.memory_space<vmem>>) attributes {dimension_semantics = [#tpu.dimension_semantics<parallel>, #tpu.dimension_semantics<parallel>], iteration_bounds = array<i64: 2, 1>, scalar_prefetch = 0 : i64, scratch_operands = 0 : i64, tpu.core_type = #tpu.core_type<tc>, window_params = [{transform_indices = @transform_0, window_bounds = array<i64: 1, 4, 256>}, {pipeline_mode = #tpu.pipeline_mode<synchronous>, transform_indices = @transform_1, window_bounds = array<i64: 4, 16>}, {pipeline_mode = #tpu.pipeline_mode<synchronous>, transform_indices = @transform_2, window_bounds = array<i64: 1, 16>}, {transform_indices = @transform_3, window_bounds = array<i64: 1, 256, 16>}]} {
    %c0 = arith.constant 0 : index
    %c0_0 = arith.constant 0 : index
    %c0_1 = arith.constant 0 : index
    %0 = vector.load %arg2[%c0, %c0_0, %c0_1] : memref<1x4x256xf32, #tpu.memory_space<vmem>>, vector<1x4x256xf32>
    %1 = vector.shape_cast %0 : vector<1x4x256xf32> to vector<4x256xf32>
    %c0_2 = arith.constant 0 : index
    %c0_3 = arith.constant 0 : index
    %2 = vector.load %arg3[%c0_2, %c0_3] : memref<4x16xf32, #tpu.memory_space<vmem>>, vector<4x16xf32>
    %c0_4 = arith.constant 0 : index
    %c0_5 = arith.constant 0 : index
    %3 = vector.load %arg4[%c0_4, %c0_5] : memref<1x16xf32, #tpu.memory_space<vmem>>, vector<1x16xf32>
    %cst = arith.constant dense<0.000000e+00> : vector<256x16xf32>
    %4 = tpu.matmul %1, %2, %cst {dimension_numbers = #tpu.dot_dimension_numbers<[0], [0], [1], [1], [0, 1, 1, 1], [], []>} : vector<4x256xf32>, vector<4x16xf32>, vector<256x16xf32> -> vector<256x16xf32>
    %5 = vector.broadcast %3 : vector<1x16xf32> to vector<256x16xf32>
    %6 = arith.addf %4, %5 : vector<256x16xf32>
    %c0_6 = arith.constant 0 : index
    %c0_7 = arith.constant 0 : index
    %c0_8 = arith.constant 0 : index
    %7 = vector.load %arg5[%c0_6, %c0_7, %c0_8] : memref<1x256x16xf32, #tpu.memory_space<vmem>>, vector<1x256x16xf32>
    %8 = vector.shape_cast %7 : vector<1x256x16xf32> to vector<256x16xf32>
    %9 = vector.shape_cast %6 : vector<256x16xf32> to vector<1x256x16xf32>
    tpu.vector_store %arg5[%c0_6, %c0_7, %c0_8], %9 {strides = array<i32>} : memref<1x256x16xf32, #tpu.memory_space<vmem>>, vector<1x256x16xf32>,
    return
  }
  func.func @transform_0(%arg0: i32, %arg1: i32) -> (i32, i32, i32) {
    %c0_i32 = arith.constant 0 : i32
    %c0_i32_0 = arith.constant 0 : i32
    return %arg0, %c0_i32, %arg1 : i32, i32, i32
  }
  func.func @transform_1(%arg0: i32, %arg1: i32) -> (i32, i32) {
    %c0_i32 = arith.constant 0 : i32
    %c0_i32_0 = arith.constant 0 : i32
    %c0_i32_1 = arith.constant 0 : i32
    return %c0_i32, %c0_i32_0 : i32, i32
  }
  func.func @transform_2(%arg0: i32, %arg1: i32) -> (i32, i32) {
    %c0_i32 = arith.constant 0 : i32
    %c0_i32_0 = arith.constant 0 : i32
    %c0_i32_1 = arith.constant 0 : i32
    return %c0_i32, %c0_i32_0 : i32, i32
  }
  func.func @transform_3(%arg0: i32, %arg1: i32) -> (i32, i32, i32) {
    %c0_i32 = arith.constant 0 : i32
    %c0_i32_0 = arith.constant 0 : i32
    return %arg0, %arg1, %c0_i32 : i32, i32, i32
  }
}

module attributes {stable_mosaic.version = 11 : i64} {
  func.func @_softpool_kernel(%arg0: i32, %arg1: memref<1x16x16x16xf32, #tpu.memory_space<vmem>>, %arg2: memref<1x4x4x16xf32, #tpu.memory_space<vmem>>) attributes {dimension_semantics = [#tpu.dimension_semantics<parallel>], iteration_bounds = array<i64: 2>, scalar_prefetch = 0 : i64, scratch_operands = 0 : i64, tpu.core_type = #tpu.core_type<tc>, window_params = [{transform_indices = @transform_0, window_bounds = array<i64: 1, 16, 16, 16>}, {transform_indices = @transform_1, window_bounds = array<i64: 1, 4, 4, 16>}]} {
    %c0 = arith.constant 0 : index
    %c0_0 = arith.constant 0 : index
    %c0_1 = arith.constant 0 : index
    %c0_2 = arith.constant 0 : index
    %0 = vector.load %arg1[%c0, %c0_0, %c0_1, %c0_2] : memref<1x16x16x16xf32, #tpu.memory_space<vmem>>, vector<1x16x16x16xf32>
    %1 = vector.shape_cast %0 : vector<1x16x16x16xf32> to vector<16x16x16xf32>
    %2 = math.exp %1 : vector<16x16x16xf32>
    %3 = arith.mulf %2, %1 : vector<16x16x16xf32>
    %4 = vector.extract_strided_slice %3 {offsets = [0, 0, 0], sizes = [7, 7, 16], strides = [1, 1, 1]} : vector<16x16x16xf32> to vector<7x7x16xf32>
    %cst = arith.constant dense<0.000000e+00> : vector<16xf32>
    %5 = vector.multi_reduction <add>, %4, %cst [0, 1] : vector<7x7x16xf32> to vector<16xf32>
    %6 = vector.shape_cast %5 : vector<16xf32> to vector<1x1x16xf32>
    %7 = vector.extract_strided_slice %2 {offsets = [0, 0, 0], sizes = [7, 7, 16], strides = [1, 1, 1]} : vector<16x16x16xf32> to vector<7x7x16xf32>
    %cst_3 = arith.constant dense<0.000000e+00> : vector<16xf32>
    %8 = vector.multi_reduction <add>, %7, %cst_3 [0, 1] : vector<7x7x16xf32> to vector<16xf32>
    %9 = vector.shape_cast %8 : vector<16xf32> to vector<1x1x16xf32>
    %10 = arith.divf %6, %9 : vector<1x1x16xf32>
    %c0_4 = arith.constant 0 : index
    %c0_5 = arith.constant 0 : index
    %c0_6 = arith.constant 0 : index
    %c0_7 = arith.constant 0 : index
    %11 = vector.load %arg2[%c0_4, %c0_5, %c0_6, %c0_7] : memref<1x4x4x16xf32, #tpu.memory_space<vmem>>, vector<1x1x1x16xf32>
    %12 = vector.shape_cast %11 : vector<1x1x1x16xf32> to vector<1x1x16xf32>
    %13 = vector.shape_cast %10 : vector<1x1x16xf32> to vector<1x1x1x16xf32>
    tpu.vector_store %arg2[%c0_4, %c0_5, %c0_6, %c0_7], %13 {strides = array<i32>} : memref<1x4x4x16xf32, #tpu.memory_space<vmem>>, vector<1x1x1x16xf32>,
    %14 = vector.extract_strided_slice %3 {offsets = [0, 3, 0], sizes = [7, 7, 16], strides = [1, 1, 1]} : vector<16x16x16xf32> to vector<7x7x16xf32>
    %cst_8 = arith.constant dense<0.000000e+00> : vector<16xf32>
    %15 = vector.multi_reduction <add>, %14, %cst_8 [0, 1] : vector<7x7x16xf32> to vector<16xf32>
    %16 = vector.shape_cast %15 : vector<16xf32> to vector<1x1x16xf32>
    %17 = vector.extract_strided_slice %2 {offsets = [0, 3, 0], sizes = [7, 7, 16], strides = [1, 1, 1]} : vector<16x16x16xf32> to vector<7x7x16xf32>
    %cst_9 = arith.constant dense<0.000000e+00> : vector<16xf32>
    %18 = vector.multi_reduction <add>, %17, %cst_9 [0, 1] : vector<7x7x16xf32> to vector<16xf32>
    %19 = vector.shape_cast %18 : vector<16xf32> to vector<1x1x16xf32>
    %20 = arith.divf %16, %19 : vector<1x1x16xf32>
    %c0_10 = arith.constant 0 : index
    %c0_11 = arith.constant 0 : index
    %c1 = arith.constant 1 : index
    %c0_12 = arith.constant 0 : index
    %21 = vector.load %arg2[%c0_10, %c0_11, %c1, %c0_12] : memref<1x4x4x16xf32, #tpu.memory_space<vmem>>, vector<1x1x1x16xf32>
    %22 = vector.shape_cast %21 : vector<1x1x1x16xf32> to vector<1x1x16xf32>
    %23 = vector.shape_cast %20 : vector<1x1x16xf32> to vector<1x1x1x16xf32>
    tpu.vector_store %arg2[%c0_10, %c0_11, %c1, %c0_12], %23 {strides = array<i32>} : memref<1x4x4x16xf32, #tpu.memory_space<vmem>>, vector<1x1x1x16xf32>,
    %24 = vector.extract_strided_slice %3 {offsets = [0, 6, 0], sizes = [7, 7, 16], strides = [1, 1, 1]} : vector<16x16x16xf32> to vector<7x7x16xf32>
    %cst_13 = arith.constant dense<0.000000e+00> : vector<16xf32>
    %25 = vector.multi_reduction <add>, %24, %cst_13 [0, 1] : vector<7x7x16xf32> to vector<16xf32>
    %26 = vector.shape_cast %25 : vector<16xf32> to vector<1x1x16xf32>
    %27 = vector.extract_strided_slice %2 {offsets = [0, 6, 0], sizes = [7, 7, 16], strides = [1, 1, 1]} : vector<16x16x16xf32> to vector<7x7x16xf32>
    %cst_14 = arith.constant dense<0.000000e+00> : vector<16xf32>
    %28 = vector.multi_reduction <add>, %27, %cst_14 [0, 1] : vector<7x7x16xf32> to vector<16xf32>
    %29 = vector.shape_cast %28 : vector<16xf32> to vector<1x1x16xf32>
    %30 = arith.divf %26, %29 : vector<1x1x16xf32>
    %c0_15 = arith.constant 0 : index
    %c0_16 = arith.constant 0 : index
    %c2 = arith.constant 2 : index
    %c0_17 = arith.constant 0 : index
    %31 = vector.load %arg2[%c0_15, %c0_16, %c2, %c0_17] : memref<1x4x4x16xf32, #tpu.memory_space<vmem>>, vector<1x1x1x16xf32>
    %32 = vector.shape_cast %31 : vector<1x1x1x16xf32> to vector<1x1x16xf32>
    %33 = vector.shape_cast %30 : vector<1x1x16xf32> to vector<1x1x1x16xf32>
    tpu.vector_store %arg2[%c0_15, %c0_16, %c2, %c0_17], %33 {strides = array<i32>} : memref<1x4x4x16xf32, #tpu.memory_space<vmem>>, vector<1x1x1x16xf32>,
    %34 = vector.extract_strided_slice %3 {offsets = [0, 9, 0], sizes = [7, 7, 16], strides = [1, 1, 1]} : vector<16x16x16xf32> to vector<7x7x16xf32>
    %cst_18 = arith.constant dense<0.000000e+00> : vector<16xf32>
    %35 = vector.multi_reduction <add>, %34, %cst_18 [0, 1] : vector<7x7x16xf32> to vector<16xf32>
    %36 = vector.shape_cast %35 : vector<16xf32> to vector<1x1x16xf32>
    %37 = vector.extract_strided_slice %2 {offsets = [0, 9, 0], sizes = [7, 7, 16], strides = [1, 1, 1]} : vector<16x16x16xf32> to vector<7x7x16xf32>
    %cst_19 = arith.constant dense<0.000000e+00> : vector<16xf32>
    %38 = vector.multi_reduction <add>, %37, %cst_19 [0, 1] : vector<7x7x16xf32> to vector<16xf32>
    %39 = vector.shape_cast %38 : vector<16xf32> to vector<1x1x16xf32>
    %40 = arith.divf %36, %39 : vector<1x1x16xf32>
    %c0_20 = arith.constant 0 : index
    %c0_21 = arith.constant 0 : index
    %c3 = arith.constant 3 : index
    %c0_22 = arith.constant 0 : index
    %41 = vector.load %arg2[%c0_20, %c0_21, %c3, %c0_22] : memref<1x4x4x16xf32, #tpu.memory_space<vmem>>, vector<1x1x1x16xf32>
    %42 = vector.shape_cast %41 : vector<1x1x1x16xf32> to vector<1x1x16xf32>
    %43 = vector.shape_cast %40 : vector<1x1x16xf32> to vector<1x1x1x16xf32>
    tpu.vector_store %arg2[%c0_20, %c0_21, %c3, %c0_22], %43 {strides = array<i32>} : memref<1x4x4x16xf32, #tpu.memory_space<vmem>>, vector<1x1x1x16xf32>,
    %44 = vector.extract_strided_slice %3 {offsets = [3, 0, 0], sizes = [7, 7, 16], strides = [1, 1, 1]} : vector<16x16x16xf32> to vector<7x7x16xf32>
    %cst_23 = arith.constant dense<0.000000e+00> : vector<16xf32>
    %45 = vector.multi_reduction <add>, %44, %cst_23 [0, 1] : vector<7x7x16xf32> to vector<16xf32>
    %46 = vector.shape_cast %45 : vector<16xf32> to vector<1x1x16xf32>
    %47 = vector.extract_strided_slice %2 {offsets = [3, 0, 0], sizes = [7, 7, 16], strides = [1, 1, 1]} : vector<16x16x16xf32> to vector<7x7x16xf32>
    %cst_24 = arith.constant dense<0.000000e+00> : vector<16xf32>
    %48 = vector.multi_reduction <add>, %47, %cst_24 [0, 1] : vector<7x7x16xf32> to vector<16xf32>
    %49 = vector.shape_cast %48 : vector<16xf32> to vector<1x1x16xf32>
    %50 = arith.divf %46, %49 : vector<1x1x16xf32>
    %c0_25 = arith.constant 0 : index
    %c1_26 = arith.constant 1 : index
    %c0_27 = arith.constant 0 : index
    %c0_28 = arith.constant 0 : index
    %51 = vector.load %arg2[%c0_25, %c1_26, %c0_27, %c0_28] : memref<1x4x4x16xf32, #tpu.memory_space<vmem>>, vector<1x1x1x16xf32>
    %52 = vector.shape_cast %51 : vector<1x1x1x16xf32> to vector<1x1x16xf32>
    %53 = vector.shape_cast %50 : vector<1x1x16xf32> to vector<1x1x1x16xf32>
    tpu.vector_store %arg2[%c0_25, %c1_26, %c0_27, %c0_28], %53 {strides = array<i32>} : memref<1x4x4x16xf32, #tpu.memory_space<vmem>>, vector<1x1x1x16xf32>,
    %54 = vector.extract_strided_slice %3 {offsets = [3, 3, 0], sizes = [7, 7, 16], strides = [1, 1, 1]} : vector<16x16x16xf32> to vector<7x7x16xf32>
    %cst_29 = arith.constant dense<0.000000e+00> : vector<16xf32>
    %55 = vector.multi_reduction <add>, %54, %cst_29 [0, 1] : vector<7x7x16xf32> to vector<16xf32>
    %56 = vector.shape_cast %55 : vector<16xf32> to vector<1x1x16xf32>
    %57 = vector.extract_strided_slice %2 {offsets = [3, 3, 0], sizes = [7, 7, 16], strides = [1, 1, 1]} : vector<16x16x16xf32> to vector<7x7x16xf32>
    %cst_30 = arith.constant dense<0.000000e+00> : vector<16xf32>
    %58 = vector.multi_reduction <add>, %57, %cst_30 [0, 1] : vector<7x7x16xf32> to vector<16xf32>
    %59 = vector.shape_cast %58 : vector<16xf32> to vector<1x1x16xf32>
    %60 = arith.divf %56, %59 : vector<1x1x16xf32>
    %c0_31 = arith.constant 0 : index
    %c1_32 = arith.constant 1 : index
    %c1_33 = arith.constant 1 : index
    %c0_34 = arith.constant 0 : index
    %61 = vector.load %arg2[%c0_31, %c1_32, %c1_33, %c0_34] : memref<1x4x4x16xf32, #tpu.memory_space<vmem>>, vector<1x1x1x16xf32>
    %62 = vector.shape_cast %61 : vector<1x1x1x16xf32> to vector<1x1x16xf32>
    %63 = vector.shape_cast %60 : vector<1x1x16xf32> to vector<1x1x1x16xf32>
    tpu.vector_store %arg2[%c0_31, %c1_32, %c1_33, %c0_34], %63 {strides = array<i32>} : memref<1x4x4x16xf32, #tpu.memory_space<vmem>>, vector<1x1x1x16xf32>,
    %64 = vector.extract_strided_slice %3 {offsets = [3, 6, 0], sizes = [7, 7, 16], strides = [1, 1, 1]} : vector<16x16x16xf32> to vector<7x7x16xf32>
    %cst_35 = arith.constant dense<0.000000e+00> : vector<16xf32>
    %65 = vector.multi_reduction <add>, %64, %cst_35 [0, 1] : vector<7x7x16xf32> to vector<16xf32>
    %66 = vector.shape_cast %65 : vector<16xf32> to vector<1x1x16xf32>
    %67 = vector.extract_strided_slice %2 {offsets = [3, 6, 0], sizes = [7, 7, 16], strides = [1, 1, 1]} : vector<16x16x16xf32> to vector<7x7x16xf32>
    %cst_36 = arith.constant dense<0.000000e+00> : vector<16xf32>
    %68 = vector.multi_reduction <add>, %67, %cst_36 [0, 1] : vector<7x7x16xf32> to vector<16xf32>
    %69 = vector.shape_cast %68 : vector<16xf32> to vector<1x1x16xf32>
    %70 = arith.divf %66, %69 : vector<1x1x16xf32>
    %c0_37 = arith.constant 0 : index
    %c1_38 = arith.constant 1 : index
    %c2_39 = arith.constant 2 : index
    %c0_40 = arith.constant 0 : index
    %71 = vector.load %arg2[%c0_37, %c1_38, %c2_39, %c0_40] : memref<1x4x4x16xf32, #tpu.memory_space<vmem>>, vector<1x1x1x16xf32>
    %72 = vector.shape_cast %71 : vector<1x1x1x16xf32> to vector<1x1x16xf32>
    %73 = vector.shape_cast %70 : vector<1x1x16xf32> to vector<1x1x1x16xf32>
    tpu.vector_store %arg2[%c0_37, %c1_38, %c2_39, %c0_40], %73 {strides = array<i32>} : memref<1x4x4x16xf32, #tpu.memory_space<vmem>>, vector<1x1x1x16xf32>,
    %74 = vector.extract_strided_slice %3 {offsets = [3, 9, 0], sizes = [7, 7, 16], strides = [1, 1, 1]} : vector<16x16x16xf32> to vector<7x7x16xf32>
    %cst_41 = arith.constant dense<0.000000e+00> : vector<16xf32>
    %75 = vector.multi_reduction <add>, %74, %cst_41 [0, 1] : vector<7x7x16xf32> to vector<16xf32>
    %76 = vector.shape_cast %75 : vector<16xf32> to vector<1x1x16xf32>
    %77 = vector.extract_strided_slice %2 {offsets = [3, 9, 0], sizes = [7, 7, 16], strides = [1, 1, 1]} : vector<16x16x16xf32> to vector<7x7x16xf32>
    %cst_42 = arith.constant dense<0.000000e+00> : vector<16xf32>
    %78 = vector.multi_reduction <add>, %77, %cst_42 [0, 1] : vector<7x7x16xf32> to vector<16xf32>
    %79 = vector.shape_cast %78 : vector<16xf32> to vector<1x1x16xf32>
    %80 = arith.divf %76, %79 : vector<1x1x16xf32>
    %c0_43 = arith.constant 0 : index
    %c1_44 = arith.constant 1 : index
    %c3_45 = arith.constant 3 : index
    %c0_46 = arith.constant 0 : index
    %81 = vector.load %arg2[%c0_43, %c1_44, %c3_45, %c0_46] : memref<1x4x4x16xf32, #tpu.memory_space<vmem>>, vector<1x1x1x16xf32>
    %82 = vector.shape_cast %81 : vector<1x1x1x16xf32> to vector<1x1x16xf32>
    %83 = vector.shape_cast %80 : vector<1x1x16xf32> to vector<1x1x1x16xf32>
    tpu.vector_store %arg2[%c0_43, %c1_44, %c3_45, %c0_46], %83 {strides = array<i32>} : memref<1x4x4x16xf32, #tpu.memory_space<vmem>>, vector<1x1x1x16xf32>,
    %84 = vector.extract_strided_slice %3 {offsets = [6, 0, 0], sizes = [7, 7, 16], strides = [1, 1, 1]} : vector<16x16x16xf32> to vector<7x7x16xf32>
    %cst_47 = arith.constant dense<0.000000e+00> : vector<16xf32>
    %85 = vector.multi_reduction <add>, %84, %cst_47 [0, 1] : vector<7x7x16xf32> to vector<16xf32>
    %86 = vector.shape_cast %85 : vector<16xf32> to vector<1x1x16xf32>
    %87 = vector.extract_strided_slice %2 {offsets = [6, 0, 0], sizes = [7, 7, 16], strides = [1, 1, 1]} : vector<16x16x16xf32> to vector<7x7x16xf32>
    %cst_48 = arith.constant dense<0.000000e+00> : vector<16xf32>
    %88 = vector.multi_reduction <add>, %87, %cst_48 [0, 1] : vector<7x7x16xf32> to vector<16xf32>
    %89 = vector.shape_cast %88 : vector<16xf32> to vector<1x1x16xf32>
    %90 = arith.divf %86, %89 : vector<1x1x16xf32>
    %c0_49 = arith.constant 0 : index
    %c2_50 = arith.constant 2 : index
    %c0_51 = arith.constant 0 : index
    %c0_52 = arith.constant 0 : index
    %91 = vector.load %arg2[%c0_49, %c2_50, %c0_51, %c0_52] : memref<1x4x4x16xf32, #tpu.memory_space<vmem>>, vector<1x1x1x16xf32>
    %92 = vector.shape_cast %91 : vector<1x1x1x16xf32> to vector<1x1x16xf32>
    %93 = vector.shape_cast %90 : vector<1x1x16xf32> to vector<1x1x1x16xf32>
    tpu.vector_store %arg2[%c0_49, %c2_50, %c0_51, %c0_52], %93 {strides = array<i32>} : memref<1x4x4x16xf32, #tpu.memory_space<vmem>>, vector<1x1x1x16xf32>,
    %94 = vector.extract_strided_slice %3 {offsets = [6, 3, 0], sizes = [7, 7, 16], strides = [1, 1, 1]} : vector<16x16x16xf32> to vector<7x7x16xf32>
    %cst_53 = arith.constant dense<0.000000e+00> : vector<16xf32>
    %95 = vector.multi_reduction <add>, %94, %cst_53 [0, 1] : vector<7x7x16xf32> to vector<16xf32>
    %96 = vector.shape_cast %95 : vector<16xf32> to vector<1x1x16xf32>
    %97 = vector.extract_strided_slice %2 {offsets = [6, 3, 0], sizes = [7, 7, 16], strides = [1, 1, 1]} : vector<16x16x16xf32> to vector<7x7x16xf32>
    %cst_54 = arith.constant dense<0.000000e+00> : vector<16xf32>
    %98 = vector.multi_reduction <add>, %97, %cst_54 [0, 1] : vector<7x7x16xf32> to vector<16xf32>
    %99 = vector.shape_cast %98 : vector<16xf32> to vector<1x1x16xf32>
    %100 = arith.divf %96, %99 : vector<1x1x16xf32>
    %c0_55 = arith.constant 0 : index
    %c2_56 = arith.constant 2 : index
    %c1_57 = arith.constant 1 : index
    %c0_58 = arith.constant 0 : index
    %101 = vector.load %arg2[%c0_55, %c2_56, %c1_57, %c0_58] : memref<1x4x4x16xf32, #tpu.memory_space<vmem>>, vector<1x1x1x16xf32>
    %102 = vector.shape_cast %101 : vector<1x1x1x16xf32> to vector<1x1x16xf32>
    %103 = vector.shape_cast %100 : vector<1x1x16xf32> to vector<1x1x1x16xf32>
    tpu.vector_store %arg2[%c0_55, %c2_56, %c1_57, %c0_58], %103 {strides = array<i32>} : memref<1x4x4x16xf32, #tpu.memory_space<vmem>>, vector<1x1x1x16xf32>,
    %104 = vector.extract_strided_slice %3 {offsets = [6, 6, 0], sizes = [7, 7, 16], strides = [1, 1, 1]} : vector<16x16x16xf32> to vector<7x7x16xf32>
    %cst_59 = arith.constant dense<0.000000e+00> : vector<16xf32>
    %105 = vector.multi_reduction <add>, %104, %cst_59 [0, 1] : vector<7x7x16xf32> to vector<16xf32>
    %106 = vector.shape_cast %105 : vector<16xf32> to vector<1x1x16xf32>
    %107 = vector.extract_strided_slice %2 {offsets = [6, 6, 0], sizes = [7, 7, 16], strides = [1, 1, 1]} : vector<16x16x16xf32> to vector<7x7x16xf32>
    %cst_60 = arith.constant dense<0.000000e+00> : vector<16xf32>
    %108 = vector.multi_reduction <add>, %107, %cst_60 [0, 1] : vector<7x7x16xf32> to vector<16xf32>
    %109 = vector.shape_cast %108 : vector<16xf32> to vector<1x1x16xf32>
    %110 = arith.divf %106, %109 : vector<1x1x16xf32>
    %c0_61 = arith.constant 0 : index
    %c2_62 = arith.constant 2 : index
    %c2_63 = arith.constant 2 : index
    %c0_64 = arith.constant 0 : index
    %111 = vector.load %arg2[%c0_61, %c2_62, %c2_63, %c0_64] : memref<1x4x4x16xf32, #tpu.memory_space<vmem>>, vector<1x1x1x16xf32>
    %112 = vector.shape_cast %111 : vector<1x1x1x16xf32> to vector<1x1x16xf32>
    %113 = vector.shape_cast %110 : vector<1x1x16xf32> to vector<1x1x1x16xf32>
    tpu.vector_store %arg2[%c0_61, %c2_62, %c2_63, %c0_64], %113 {strides = array<i32>} : memref<1x4x4x16xf32, #tpu.memory_space<vmem>>, vector<1x1x1x16xf32>,
    %114 = vector.extract_strided_slice %3 {offsets = [6, 9, 0], sizes = [7, 7, 16], strides = [1, 1, 1]} : vector<16x16x16xf32> to vector<7x7x16xf32>
    %cst_65 = arith.constant dense<0.000000e+00> : vector<16xf32>
    %115 = vector.multi_reduction <add>, %114, %cst_65 [0, 1] : vector<7x7x16xf32> to vector<16xf32>
    %116 = vector.shape_cast %115 : vector<16xf32> to vector<1x1x16xf32>
    %117 = vector.extract_strided_slice %2 {offsets = [6, 9, 0], sizes = [7, 7, 16], strides = [1, 1, 1]} : vector<16x16x16xf32> to vector<7x7x16xf32>
    %cst_66 = arith.constant dense<0.000000e+00> : vector<16xf32>
    %118 = vector.multi_reduction <add>, %117, %cst_66 [0, 1] : vector<7x7x16xf32> to vector<16xf32>
    %119 = vector.shape_cast %118 : vector<16xf32> to vector<1x1x16xf32>
    %120 = arith.divf %116, %119 : vector<1x1x16xf32>
    %c0_67 = arith.constant 0 : index
    %c2_68 = arith.constant 2 : index
    %c3_69 = arith.constant 3 : index
    %c0_70 = arith.constant 0 : index
    %121 = vector.load %arg2[%c0_67, %c2_68, %c3_69, %c0_70] : memref<1x4x4x16xf32, #tpu.memory_space<vmem>>, vector<1x1x1x16xf32>
    %122 = vector.shape_cast %121 : vector<1x1x1x16xf32> to vector<1x1x16xf32>
    %123 = vector.shape_cast %120 : vector<1x1x16xf32> to vector<1x1x1x16xf32>
    tpu.vector_store %arg2[%c0_67, %c2_68, %c3_69, %c0_70], %123 {strides = array<i32>} : memref<1x4x4x16xf32, #tpu.memory_space<vmem>>, vector<1x1x1x16xf32>,
    %124 = vector.extract_strided_slice %3 {offsets = [9, 0, 0], sizes = [7, 7, 16], strides = [1, 1, 1]} : vector<16x16x16xf32> to vector<7x7x16xf32>
    %cst_71 = arith.constant dense<0.000000e+00> : vector<16xf32>
    %125 = vector.multi_reduction <add>, %124, %cst_71 [0, 1] : vector<7x7x16xf32> to vector<16xf32>
    %126 = vector.shape_cast %125 : vector<16xf32> to vector<1x1x16xf32>
    %127 = vector.extract_strided_slice %2 {offsets = [9, 0, 0], sizes = [7, 7, 16], strides = [1, 1, 1]} : vector<16x16x16xf32> to vector<7x7x16xf32>
    %cst_72 = arith.constant dense<0.000000e+00> : vector<16xf32>
    %128 = vector.multi_reduction <add>, %127, %cst_72 [0, 1] : vector<7x7x16xf32> to vector<16xf32>
    %129 = vector.shape_cast %128 : vector<16xf32> to vector<1x1x16xf32>
    %130 = arith.divf %126, %129 : vector<1x1x16xf32>
    %c0_73 = arith.constant 0 : index
    %c3_74 = arith.constant 3 : index
    %c0_75 = arith.constant 0 : index
    %c0_76 = arith.constant 0 : index
    %131 = vector.load %arg2[%c0_73, %c3_74, %c0_75, %c0_76] : memref<1x4x4x16xf32, #tpu.memory_space<vmem>>, vector<1x1x1x16xf32>
    %132 = vector.shape_cast %131 : vector<1x1x1x16xf32> to vector<1x1x16xf32>
    %133 = vector.shape_cast %130 : vector<1x1x16xf32> to vector<1x1x1x16xf32>
    tpu.vector_store %arg2[%c0_73, %c3_74, %c0_75, %c0_76], %133 {strides = array<i32>} : memref<1x4x4x16xf32, #tpu.memory_space<vmem>>, vector<1x1x1x16xf32>,
    %134 = vector.extract_strided_slice %3 {offsets = [9, 3, 0], sizes = [7, 7, 16], strides = [1, 1, 1]} : vector<16x16x16xf32> to vector<7x7x16xf32>
    %cst_77 = arith.constant dense<0.000000e+00> : vector<16xf32>
    %135 = vector.multi_reduction <add>, %134, %cst_77 [0, 1] : vector<7x7x16xf32> to vector<16xf32>
    %136 = vector.shape_cast %135 : vector<16xf32> to vector<1x1x16xf32>
    %137 = vector.extract_strided_slice %2 {offsets = [9, 3, 0], sizes = [7, 7, 16], strides = [1, 1, 1]} : vector<16x16x16xf32> to vector<7x7x16xf32>
    %cst_78 = arith.constant dense<0.000000e+00> : vector<16xf32>
    %138 = vector.multi_reduction <add>, %137, %cst_78 [0, 1] : vector<7x7x16xf32> to vector<16xf32>
    %139 = vector.shape_cast %138 : vector<16xf32> to vector<1x1x16xf32>
    %140 = arith.divf %136, %139 : vector<1x1x16xf32>
    %c0_79 = arith.constant 0 : index
    %c3_80 = arith.constant 3 : index
    %c1_81 = arith.constant 1 : index
    %c0_82 = arith.constant 0 : index
    %141 = vector.load %arg2[%c0_79, %c3_80, %c1_81, %c0_82] : memref<1x4x4x16xf32, #tpu.memory_space<vmem>>, vector<1x1x1x16xf32>
    %142 = vector.shape_cast %141 : vector<1x1x1x16xf32> to vector<1x1x16xf32>
    %143 = vector.shape_cast %140 : vector<1x1x16xf32> to vector<1x1x1x16xf32>
    tpu.vector_store %arg2[%c0_79, %c3_80, %c1_81, %c0_82], %143 {strides = array<i32>} : memref<1x4x4x16xf32, #tpu.memory_space<vmem>>, vector<1x1x1x16xf32>,
    %144 = vector.extract_strided_slice %3 {offsets = [9, 6, 0], sizes = [7, 7, 16], strides = [1, 1, 1]} : vector<16x16x16xf32> to vector<7x7x16xf32>
    %cst_83 = arith.constant dense<0.000000e+00> : vector<16xf32>
    %145 = vector.multi_reduction <add>, %144, %cst_83 [0, 1] : vector<7x7x16xf32> to vector<16xf32>
    %146 = vector.shape_cast %145 : vector<16xf32> to vector<1x1x16xf32>
    %147 = vector.extract_strided_slice %2 {offsets = [9, 6, 0], sizes = [7, 7, 16], strides = [1, 1, 1]} : vector<16x16x16xf32> to vector<7x7x16xf32>
    %cst_84 = arith.constant dense<0.000000e+00> : vector<16xf32>
    %148 = vector.multi_reduction <add>, %147, %cst_84 [0, 1] : vector<7x7x16xf32> to vector<16xf32>
    %149 = vector.shape_cast %148 : vector<16xf32> to vector<1x1x16xf32>
    %150 = arith.divf %146, %149 : vector<1x1x16xf32>
    %c0_85 = arith.constant 0 : index
    %c3_86 = arith.constant 3 : index
    %c2_87 = arith.constant 2 : index
    %c0_88 = arith.constant 0 : index
    %151 = vector.load %arg2[%c0_85, %c3_86, %c2_87, %c0_88] : memref<1x4x4x16xf32, #tpu.memory_space<vmem>>, vector<1x1x1x16xf32>
    %152 = vector.shape_cast %151 : vector<1x1x1x16xf32> to vector<1x1x16xf32>
    %153 = vector.shape_cast %150 : vector<1x1x16xf32> to vector<1x1x1x16xf32>
    tpu.vector_store %arg2[%c0_85, %c3_86, %c2_87, %c0_88], %153 {strides = array<i32>} : memref<1x4x4x16xf32, #tpu.memory_space<vmem>>, vector<1x1x1x16xf32>,
    %154 = vector.extract_strided_slice %3 {offsets = [9, 9, 0], sizes = [7, 7, 16], strides = [1, 1, 1]} : vector<16x16x16xf32> to vector<7x7x16xf32>
    %cst_89 = arith.constant dense<0.000000e+00> : vector<16xf32>
    %155 = vector.multi_reduction <add>, %154, %cst_89 [0, 1] : vector<7x7x16xf32> to vector<16xf32>
    %156 = vector.shape_cast %155 : vector<16xf32> to vector<1x1x16xf32>
    %157 = vector.extract_strided_slice %2 {offsets = [9, 9, 0], sizes = [7, 7, 16], strides = [1, 1, 1]} : vector<16x16x16xf32> to vector<7x7x16xf32>
    %cst_90 = arith.constant dense<0.000000e+00> : vector<16xf32>
    %158 = vector.multi_reduction <add>, %157, %cst_90 [0, 1] : vector<7x7x16xf32> to vector<16xf32>
    %159 = vector.shape_cast %158 : vector<16xf32> to vector<1x1x16xf32>
    %160 = arith.divf %156, %159 : vector<1x1x16xf32>
    %c0_91 = arith.constant 0 : index
    %c3_92 = arith.constant 3 : index
    %c3_93 = arith.constant 3 : index
    %c0_94 = arith.constant 0 : index
    %161 = vector.load %arg2[%c0_91, %c3_92, %c3_93, %c0_94] : memref<1x4x4x16xf32, #tpu.memory_space<vmem>>, vector<1x1x1x16xf32>
    %162 = vector.shape_cast %161 : vector<1x1x1x16xf32> to vector<1x1x16xf32>
    %163 = vector.shape_cast %160 : vector<1x1x16xf32> to vector<1x1x1x16xf32>
    tpu.vector_store %arg2[%c0_91, %c3_92, %c3_93, %c0_94], %163 {strides = array<i32>} : memref<1x4x4x16xf32, #tpu.memory_space<vmem>>, vector<1x1x1x16xf32>,
    return
  }
  func.func @transform_0(%arg0: i32) -> (i32, i32, i32, i32) {
    %c0_i32 = arith.constant 0 : i32
    %c0_i32_0 = arith.constant 0 : i32
    %c0_i32_1 = arith.constant 0 : i32
    %c0_i32_2 = arith.constant 0 : i32
    return %arg0, %c0_i32, %c0_i32_0, %c0_i32_1 : i32, i32, i32, i32
  }
  func.func @transform_1(%arg0: i32) -> (i32, i32, i32, i32) {
    %c0_i32 = arith.constant 0 : i32
    %c0_i32_0 = arith.constant 0 : i32
    %c0_i32_1 = arith.constant 0 : i32
    %c0_i32_2 = arith.constant 0 : i32
    return %arg0, %c0_i32, %c0_i32_0, %c0_i32_1 : i32, i32, i32, i32
  }
}

module attributes {stable_mosaic.version = 11 : i64} {
  func.func @_conv3x3_kernel(%arg0: i32, %arg1: memref<1x4x4x16xf32, #tpu.memory_space<vmem>>, %arg2: memref<3x3x16x16xf32, #tpu.memory_space<vmem>>, %arg3: memref<1x16xf32, #tpu.memory_space<vmem>>, %arg4: memref<1x4x16xf32, #tpu.memory_space<vmem>>) attributes {dimension_semantics = [#tpu.dimension_semantics<parallel>], iteration_bounds = array<i64: 2>, scalar_prefetch = 0 : i64, scratch_operands = 0 : i64, tpu.core_type = #tpu.core_type<tc>, window_params = [{transform_indices = @transform_0, window_bounds = array<i64: 1, 4, 4, 16>}, {pipeline_mode = #tpu.pipeline_mode<synchronous>, transform_indices = @transform_1, window_bounds = array<i64: 3, 3, 16, 16>}, {pipeline_mode = #tpu.pipeline_mode<synchronous>, transform_indices = @transform_2, window_bounds = array<i64: 1, 16>}, {transform_indices = @transform_3, window_bounds = array<i64: 1, 4, 16>}]} {
    %c0 = arith.constant 0 : index
    %c0_0 = arith.constant 0 : index
    %0 = vector.load %arg3[%c0, %c0_0] : memref<1x16xf32, #tpu.memory_space<vmem>>, vector<1x16xf32>
    %c0_1 = arith.constant 0 : index
    %c0_2 = arith.constant 0 : index
    %c0_3 = arith.constant 0 : index
    %c0_4 = arith.constant 0 : index
    %1 = vector.load %arg1[%c0_1, %c0_2, %c0_3, %c0_4] : memref<1x4x4x16xf32, #tpu.memory_space<vmem>>, vector<1x1x1x16xf32>
    %2 = vector.shape_cast %1 : vector<1x1x1x16xf32> to vector<1x16xf32>
    %c1 = arith.constant 1 : index
    %c1_5 = arith.constant 1 : index
    %c0_6 = arith.constant 0 : index
    %c0_7 = arith.constant 0 : index
    %3 = vector.load %arg2[%c1, %c1_5, %c0_6, %c0_7] : memref<3x3x16x16xf32, #tpu.memory_space<vmem>>, vector<1x1x16x16xf32>
    %4 = vector.shape_cast %3 : vector<1x1x16x16xf32> to vector<16x16xf32>
    %cst = arith.constant dense<0.000000e+00> : vector<1x16xf32>
    %5 = tpu.matmul %2, %4, %cst {dimension_numbers = #tpu.dot_dimension_numbers<[1], [0], [0], [1], [0, 0, 1, 1], [], []>} : vector<1x16xf32>, vector<16x16xf32>, vector<1x16xf32> -> vector<1x16xf32>
    %6 = arith.addf %0, %5 : vector<1x16xf32>
    %c0_8 = arith.constant 0 : index
    %c0_9 = arith.constant 0 : index
    %c1_10 = arith.constant 1 : index
    %c0_11 = arith.constant 0 : index
    %7 = vector.load %arg1[%c0_8, %c0_9, %c1_10, %c0_11] : memref<1x4x4x16xf32, #tpu.memory_space<vmem>>, vector<1x1x1x16xf32>
    %8 = vector.shape_cast %7 : vector<1x1x1x16xf32> to vector<1x16xf32>
    %c1_12 = arith.constant 1 : index
    %c2 = arith.constant 2 : index
    %c0_13 = arith.constant 0 : index
    %c0_14 = arith.constant 0 : index
    %9 = vector.load %arg2[%c1_12, %c2, %c0_13, %c0_14] : memref<3x3x16x16xf32, #tpu.memory_space<vmem>>, vector<1x1x16x16xf32>
    %10 = vector.shape_cast %9 : vector<1x1x16x16xf32> to vector<16x16xf32>
    %cst_15 = arith.constant dense<0.000000e+00> : vector<1x16xf32>
    %11 = tpu.matmul %8, %10, %cst_15 {dimension_numbers = #tpu.dot_dimension_numbers<[1], [0], [0], [1], [0, 0, 1, 1], [], []>} : vector<1x16xf32>, vector<16x16xf32>, vector<1x16xf32> -> vector<1x16xf32>
    %12 = arith.addf %6, %11 : vector<1x16xf32>
    %c0_16 = arith.constant 0 : index
    %c1_17 = arith.constant 1 : index
    %c0_18 = arith.constant 0 : index
    %c0_19 = arith.constant 0 : index
    %13 = vector.load %arg1[%c0_16, %c1_17, %c0_18, %c0_19] : memref<1x4x4x16xf32, #tpu.memory_space<vmem>>, vector<1x1x1x16xf32>
    %14 = vector.shape_cast %13 : vector<1x1x1x16xf32> to vector<1x16xf32>
    %c2_20 = arith.constant 2 : index
    %c1_21 = arith.constant 1 : index
    %c0_22 = arith.constant 0 : index
    %c0_23 = arith.constant 0 : index
    %15 = vector.load %arg2[%c2_20, %c1_21, %c0_22, %c0_23] : memref<3x3x16x16xf32, #tpu.memory_space<vmem>>, vector<1x1x16x16xf32>
    %16 = vector.shape_cast %15 : vector<1x1x16x16xf32> to vector<16x16xf32>
    %cst_24 = arith.constant dense<0.000000e+00> : vector<1x16xf32>
    %17 = tpu.matmul %14, %16, %cst_24 {dimension_numbers = #tpu.dot_dimension_numbers<[1], [0], [0], [1], [0, 0, 1, 1], [], []>} : vector<1x16xf32>, vector<16x16xf32>, vector<1x16xf32> -> vector<1x16xf32>
    %18 = arith.addf %12, %17 : vector<1x16xf32>
    %c0_25 = arith.constant 0 : index
    %c1_26 = arith.constant 1 : index
    %c1_27 = arith.constant 1 : index
    %c0_28 = arith.constant 0 : index
    %19 = vector.load %arg1[%c0_25, %c1_26, %c1_27, %c0_28] : memref<1x4x4x16xf32, #tpu.memory_space<vmem>>, vector<1x1x1x16xf32>
    %20 = vector.shape_cast %19 : vector<1x1x1x16xf32> to vector<1x16xf32>
    %c2_29 = arith.constant 2 : index
    %c2_30 = arith.constant 2 : index
    %c0_31 = arith.constant 0 : index
    %c0_32 = arith.constant 0 : index
    %21 = vector.load %arg2[%c2_29, %c2_30, %c0_31, %c0_32] : memref<3x3x16x16xf32, #tpu.memory_space<vmem>>, vector<1x1x16x16xf32>
    %22 = vector.shape_cast %21 : vector<1x1x16x16xf32> to vector<16x16xf32>
    %cst_33 = arith.constant dense<0.000000e+00> : vector<1x16xf32>
    %23 = tpu.matmul %20, %22, %cst_33 {dimension_numbers = #tpu.dot_dimension_numbers<[1], [0], [0], [1], [0, 0, 1, 1], [], []>} : vector<1x16xf32>, vector<16x16xf32>, vector<1x16xf32> -> vector<1x16xf32>
    %24 = arith.addf %18, %23 : vector<1x16xf32>
    %c0_34 = arith.constant 0 : index
    %c0_35 = arith.constant 0 : index
    %c0_36 = arith.constant 0 : index
    %25 = vector.load %arg4[%c0_34, %c0_35, %c0_36] : memref<1x4x16xf32, #tpu.memory_space<vmem>>, vector<1x1x16xf32>
    %26 = vector.shape_cast %25 : vector<1x1x16xf32> to vector<1x16xf32>
    %27 = vector.shape_cast %24 : vector<1x16xf32> to vector<1x1x16xf32>
    tpu.vector_store %arg4[%c0_34, %c0_35, %c0_36], %27 {strides = array<i32>} : memref<1x4x16xf32, #tpu.memory_space<vmem>>, vector<1x1x16xf32>,
    %c0_37 = arith.constant 0 : index
    %c0_38 = arith.constant 0 : index
    %28 = vector.load %arg3[%c0_37, %c0_38] : memref<1x16xf32, #tpu.memory_space<vmem>>, vector<1x16xf32>
    %c0_39 = arith.constant 0 : index
    %c0_40 = arith.constant 0 : index
    %c1_41 = arith.constant 1 : index
    %c0_42 = arith.constant 0 : index
    %29 = vector.load %arg1[%c0_39, %c0_40, %c1_41, %c0_42] : memref<1x4x4x16xf32, #tpu.memory_space<vmem>>, vector<1x1x1x16xf32>
    %30 = vector.shape_cast %29 : vector<1x1x1x16xf32> to vector<1x16xf32>
    %c1_43 = arith.constant 1 : index
    %c0_44 = arith.constant 0 : index
    %c0_45 = arith.constant 0 : index
    %c0_46 = arith.constant 0 : index
    %31 = vector.load %arg2[%c1_43, %c0_44, %c0_45, %c0_46] : memref<3x3x16x16xf32, #tpu.memory_space<vmem>>, vector<1x1x16x16xf32>
    %32 = vector.shape_cast %31 : vector<1x1x16x16xf32> to vector<16x16xf32>
    %cst_47 = arith.constant dense<0.000000e+00> : vector<1x16xf32>
    %33 = tpu.matmul %30, %32, %cst_47 {dimension_numbers = #tpu.dot_dimension_numbers<[1], [0], [0], [1], [0, 0, 1, 1], [], []>} : vector<1x16xf32>, vector<16x16xf32>, vector<1x16xf32> -> vector<1x16xf32>
    %34 = arith.addf %28, %33 : vector<1x16xf32>
    %c0_48 = arith.constant 0 : index
    %c0_49 = arith.constant 0 : index
    %c2_50 = arith.constant 2 : index
    %c0_51 = arith.constant 0 : index
    %35 = vector.load %arg1[%c0_48, %c0_49, %c2_50, %c0_51] : memref<1x4x4x16xf32, #tpu.memory_space<vmem>>, vector<1x1x1x16xf32>
    %36 = vector.shape_cast %35 : vector<1x1x1x16xf32> to vector<1x16xf32>
    %c1_52 = arith.constant 1 : index
    %c1_53 = arith.constant 1 : index
    %c0_54 = arith.constant 0 : index
    %c0_55 = arith.constant 0 : index
    %37 = vector.load %arg2[%c1_52, %c1_53, %c0_54, %c0_55] : memref<3x3x16x16xf32, #tpu.memory_space<vmem>>, vector<1x1x16x16xf32>
    %38 = vector.shape_cast %37 : vector<1x1x16x16xf32> to vector<16x16xf32>
    %cst_56 = arith.constant dense<0.000000e+00> : vector<1x16xf32>
    %39 = tpu.matmul %36, %38, %cst_56 {dimension_numbers = #tpu.dot_dimension_numbers<[1], [0], [0], [1], [0, 0, 1, 1], [], []>} : vector<1x16xf32>, vector<16x16xf32>, vector<1x16xf32> -> vector<1x16xf32>
    %40 = arith.addf %34, %39 : vector<1x16xf32>
    %c0_57 = arith.constant 0 : index
    %c0_58 = arith.constant 0 : index
    %c3 = arith.constant 3 : index
    %c0_59 = arith.constant 0 : index
    %41 = vector.load %arg1[%c0_57, %c0_58, %c3, %c0_59] : memref<1x4x4x16xf32, #tpu.memory_space<vmem>>, vector<1x1x1x16xf32>
    %42 = vector.shape_cast %41 : vector<1x1x1x16xf32> to vector<1x16xf32>
    %c1_60 = arith.constant 1 : index
    %c2_61 = arith.constant 2 : index
    %c0_62 = arith.constant 0 : index
    %c0_63 = arith.constant 0 : index
    %43 = vector.load %arg2[%c1_60, %c2_61, %c0_62, %c0_63] : memref<3x3x16x16xf32, #tpu.memory_space<vmem>>, vector<1x1x16x16xf32>
    %44 = vector.shape_cast %43 : vector<1x1x16x16xf32> to vector<16x16xf32>
    %cst_64 = arith.constant dense<0.000000e+00> : vector<1x16xf32>
    %45 = tpu.matmul %42, %44, %cst_64 {dimension_numbers = #tpu.dot_dimension_numbers<[1], [0], [0], [1], [0, 0, 1, 1], [], []>} : vector<1x16xf32>, vector<16x16xf32>, vector<1x16xf32> -> vector<1x16xf32>
    %46 = arith.addf %40, %45 : vector<1x16xf32>
    %c0_65 = arith.constant 0 : index
    %c1_66 = arith.constant 1 : index
    %c1_67 = arith.constant 1 : index
    %c0_68 = arith.constant 0 : index
    %47 = vector.load %arg1[%c0_65, %c1_66, %c1_67, %c0_68] : memref<1x4x4x16xf32, #tpu.memory_space<vmem>>, vector<1x1x1x16xf32>
    %48 = vector.shape_cast %47 : vector<1x1x1x16xf32> to vector<1x16xf32>
    %c2_69 = arith.constant 2 : index
    %c0_70 = arith.constant 0 : index
    %c0_71 = arith.constant 0 : index
    %c0_72 = arith.constant 0 : index
    %49 = vector.load %arg2[%c2_69, %c0_70, %c0_71, %c0_72] : memref<3x3x16x16xf32, #tpu.memory_space<vmem>>, vector<1x1x16x16xf32>
    %50 = vector.shape_cast %49 : vector<1x1x16x16xf32> to vector<16x16xf32>
    %cst_73 = arith.constant dense<0.000000e+00> : vector<1x16xf32>
    %51 = tpu.matmul %48, %50, %cst_73 {dimension_numbers = #tpu.dot_dimension_numbers<[1], [0], [0], [1], [0, 0, 1, 1], [], []>} : vector<1x16xf32>, vector<16x16xf32>, vector<1x16xf32> -> vector<1x16xf32>
    %52 = arith.addf %46, %51 : vector<1x16xf32>
    %c0_74 = arith.constant 0 : index
    %c1_75 = arith.constant 1 : index
    %c2_76 = arith.constant 2 : index
    %c0_77 = arith.constant 0 : index
    %53 = vector.load %arg1[%c0_74, %c1_75, %c2_76, %c0_77] : memref<1x4x4x16xf32, #tpu.memory_space<vmem>>, vector<1x1x1x16xf32>
    %54 = vector.shape_cast %53 : vector<1x1x1x16xf32> to vector<1x16xf32>
    %c2_78 = arith.constant 2 : index
    %c1_79 = arith.constant 1 : index
    %c0_80 = arith.constant 0 : index
    %c0_81 = arith.constant 0 : index
    %55 = vector.load %arg2[%c2_78, %c1_79, %c0_80, %c0_81] : memref<3x3x16x16xf32, #tpu.memory_space<vmem>>, vector<1x1x16x16xf32>
    %56 = vector.shape_cast %55 : vector<1x1x16x16xf32> to vector<16x16xf32>
    %cst_82 = arith.constant dense<0.000000e+00> : vector<1x16xf32>
    %57 = tpu.matmul %54, %56, %cst_82 {dimension_numbers = #tpu.dot_dimension_numbers<[1], [0], [0], [1], [0, 0, 1, 1], [], []>} : vector<1x16xf32>, vector<16x16xf32>, vector<1x16xf32> -> vector<1x16xf32>
    %58 = arith.addf %52, %57 : vector<1x16xf32>
    %c0_83 = arith.constant 0 : index
    %c1_84 = arith.constant 1 : index
    %c3_85 = arith.constant 3 : index
    %c0_86 = arith.constant 0 : index
    %59 = vector.load %arg1[%c0_83, %c1_84, %c3_85, %c0_86] : memref<1x4x4x16xf32, #tpu.memory_space<vmem>>, vector<1x1x1x16xf32>
    %60 = vector.shape_cast %59 : vector<1x1x1x16xf32> to vector<1x16xf32>
    %c2_87 = arith.constant 2 : index
    %c2_88 = arith.constant 2 : index
    %c0_89 = arith.constant 0 : index
    %c0_90 = arith.constant 0 : index
    %61 = vector.load %arg2[%c2_87, %c2_88, %c0_89, %c0_90] : memref<3x3x16x16xf32, #tpu.memory_space<vmem>>, vector<1x1x16x16xf32>
    %62 = vector.shape_cast %61 : vector<1x1x16x16xf32> to vector<16x16xf32>
    %cst_91 = arith.constant dense<0.000000e+00> : vector<1x16xf32>
    %63 = tpu.matmul %60, %62, %cst_91 {dimension_numbers = #tpu.dot_dimension_numbers<[1], [0], [0], [1], [0, 0, 1, 1], [], []>} : vector<1x16xf32>, vector<16x16xf32>, vector<1x16xf32> -> vector<1x16xf32>
    %64 = arith.addf %58, %63 : vector<1x16xf32>
    %c0_92 = arith.constant 0 : index
    %c1_93 = arith.constant 1 : index
    %c0_94 = arith.constant 0 : index
    %65 = vector.load %arg4[%c0_92, %c1_93, %c0_94] : memref<1x4x16xf32, #tpu.memory_space<vmem>>, vector<1x1x16xf32>
    %66 = vector.shape_cast %65 : vector<1x1x16xf32> to vector<1x16xf32>
    %67 = vector.shape_cast %64 : vector<1x16xf32> to vector<1x1x16xf32>
    tpu.vector_store %arg4[%c0_92, %c1_93, %c0_94], %67 {strides = array<i32>} : memref<1x4x16xf32, #tpu.memory_space<vmem>>, vector<1x1x16xf32>,
    %c0_95 = arith.constant 0 : index
    %c0_96 = arith.constant 0 : index
    %68 = vector.load %arg3[%c0_95, %c0_96] : memref<1x16xf32, #tpu.memory_space<vmem>>, vector<1x16xf32>
    %c0_97 = arith.constant 0 : index
    %c1_98 = arith.constant 1 : index
    %c0_99 = arith.constant 0 : index
    %c0_100 = arith.constant 0 : index
    %69 = vector.load %arg1[%c0_97, %c1_98, %c0_99, %c0_100] : memref<1x4x4x16xf32, #tpu.memory_space<vmem>>, vector<1x1x1x16xf32>
    %70 = vector.shape_cast %69 : vector<1x1x1x16xf32> to vector<1x16xf32>
    %c0_101 = arith.constant 0 : index
    %c1_102 = arith.constant 1 : index
    %c0_103 = arith.constant 0 : index
    %c0_104 = arith.constant 0 : index
    %71 = vector.load %arg2[%c0_101, %c1_102, %c0_103, %c0_104] : memref<3x3x16x16xf32, #tpu.memory_space<vmem>>, vector<1x1x16x16xf32>
    %72 = vector.shape_cast %71 : vector<1x1x16x16xf32> to vector<16x16xf32>
    %cst_105 = arith.constant dense<0.000000e+00> : vector<1x16xf32>
    %73 = tpu.matmul %70, %72, %cst_105 {dimension_numbers = #tpu.dot_dimension_numbers<[1], [0], [0], [1], [0, 0, 1, 1], [], []>} : vector<1x16xf32>, vector<16x16xf32>, vector<1x16xf32> -> vector<1x16xf32>
    %74 = arith.addf %68, %73 : vector<1x16xf32>
    %c0_106 = arith.constant 0 : index
    %c1_107 = arith.constant 1 : index
    %c1_108 = arith.constant 1 : index
    %c0_109 = arith.constant 0 : index
    %75 = vector.load %arg1[%c0_106, %c1_107, %c1_108, %c0_109] : memref<1x4x4x16xf32, #tpu.memory_space<vmem>>, vector<1x1x1x16xf32>
    %76 = vector.shape_cast %75 : vector<1x1x1x16xf32> to vector<1x16xf32>
    %c0_110 = arith.constant 0 : index
    %c2_111 = arith.constant 2 : index
    %c0_112 = arith.constant 0 : index
    %c0_113 = arith.constant 0 : index
    %77 = vector.load %arg2[%c0_110, %c2_111, %c0_112, %c0_113] : memref<3x3x16x16xf32, #tpu.memory_space<vmem>>, vector<1x1x16x16xf32>
    %78 = vector.shape_cast %77 : vector<1x1x16x16xf32> to vector<16x16xf32>
    %cst_114 = arith.constant dense<0.000000e+00> : vector<1x16xf32>
    %79 = tpu.matmul %76, %78, %cst_114 {dimension_numbers = #tpu.dot_dimension_numbers<[1], [0], [0], [1], [0, 0, 1, 1], [], []>} : vector<1x16xf32>, vector<16x16xf32>, vector<1x16xf32> -> vector<1x16xf32>
    %80 = arith.addf %74, %79 : vector<1x16xf32>
    %c0_115 = arith.constant 0 : index
    %c2_116 = arith.constant 2 : index
    %c0_117 = arith.constant 0 : index
    %c0_118 = arith.constant 0 : index
    %81 = vector.load %arg1[%c0_115, %c2_116, %c0_117, %c0_118] : memref<1x4x4x16xf32, #tpu.memory_space<vmem>>, vector<1x1x1x16xf32>
    %82 = vector.shape_cast %81 : vector<1x1x1x16xf32> to vector<1x16xf32>
    %c1_119 = arith.constant 1 : index
    %c1_120 = arith.constant 1 : index
    %c0_121 = arith.constant 0 : index
    %c0_122 = arith.constant 0 : index
    %83 = vector.load %arg2[%c1_119, %c1_120, %c0_121, %c0_122] : memref<3x3x16x16xf32, #tpu.memory_space<vmem>>, vector<1x1x16x16xf32>
    %84 = vector.shape_cast %83 : vector<1x1x16x16xf32> to vector<16x16xf32>
    %cst_123 = arith.constant dense<0.000000e+00> : vector<1x16xf32>
    %85 = tpu.matmul %82, %84, %cst_123 {dimension_numbers = #tpu.dot_dimension_numbers<[1], [0], [0], [1], [0, 0, 1, 1], [], []>} : vector<1x16xf32>, vector<16x16xf32>, vector<1x16xf32> -> vector<1x16xf32>
    %86 = arith.addf %80, %85 : vector<1x16xf32>
    %c0_124 = arith.constant 0 : index
    %c2_125 = arith.constant 2 : index
    %c1_126 = arith.constant 1 : index
    %c0_127 = arith.constant 0 : index
    %87 = vector.load %arg1[%c0_124, %c2_125, %c1_126, %c0_127] : memref<1x4x4x16xf32, #tpu.memory_space<vmem>>, vector<1x1x1x16xf32>
    %88 = vector.shape_cast %87 : vector<1x1x1x16xf32> to vector<1x16xf32>
    %c1_128 = arith.constant 1 : index
    %c2_129 = arith.constant 2 : index
    %c0_130 = arith.constant 0 : index
    %c0_131 = arith.constant 0 : index
    %89 = vector.load %arg2[%c1_128, %c2_129, %c0_130, %c0_131] : memref<3x3x16x16xf32, #tpu.memory_space<vmem>>, vector<1x1x16x16xf32>
    %90 = vector.shape_cast %89 : vector<1x1x16x16xf32> to vector<16x16xf32>
    %cst_132 = arith.constant dense<0.000000e+00> : vector<1x16xf32>
    %91 = tpu.matmul %88, %90, %cst_132 {dimension_numbers = #tpu.dot_dimension_numbers<[1], [0], [0], [1], [0, 0, 1, 1], [], []>} : vector<1x16xf32>, vector<16x16xf32>, vector<1x16xf32> -> vector<1x16xf32>
    %92 = arith.addf %86, %91 : vector<1x16xf32>
    %c0_133 = arith.constant 0 : index
    %c3_134 = arith.constant 3 : index
    %c0_135 = arith.constant 0 : index
    %c0_136 = arith.constant 0 : index
    %93 = vector.load %arg1[%c0_133, %c3_134, %c0_135, %c0_136] : memref<1x4x4x16xf32, #tpu.memory_space<vmem>>, vector<1x1x1x16xf32>
    %94 = vector.shape_cast %93 : vector<1x1x1x16xf32> to vector<1x16xf32>
    %c2_137 = arith.constant 2 : index
    %c1_138 = arith.constant 1 : index
    %c0_139 = arith.constant 0 : index
    %c0_140 = arith.constant 0 : index
    %95 = vector.load %arg2[%c2_137, %c1_138, %c0_139, %c0_140] : memref<3x3x16x16xf32, #tpu.memory_space<vmem>>, vector<1x1x16x16xf32>
    %96 = vector.shape_cast %95 : vector<1x1x16x16xf32> to vector<16x16xf32>
    %cst_141 = arith.constant dense<0.000000e+00> : vector<1x16xf32>
    %97 = tpu.matmul %94, %96, %cst_141 {dimension_numbers = #tpu.dot_dimension_numbers<[1], [0], [0], [1], [0, 0, 1, 1], [], []>} : vector<1x16xf32>, vector<16x16xf32>, vector<1x16xf32> -> vector<1x16xf32>
    %98 = arith.addf %92, %97 : vector<1x16xf32>
    %c0_142 = arith.constant 0 : index
    %c3_143 = arith.constant 3 : index
    %c1_144 = arith.constant 1 : index
    %c0_145 = arith.constant 0 : index
    %99 = vector.load %arg1[%c0_142, %c3_143, %c1_144, %c0_145] : memref<1x4x4x16xf32, #tpu.memory_space<vmem>>, vector<1x1x1x16xf32>
    %100 = vector.shape_cast %99 : vector<1x1x1x16xf32> to vector<1x16xf32>
    %c2_146 = arith.constant 2 : index
    %c2_147 = arith.constant 2 : index
    %c0_148 = arith.constant 0 : index
    %c0_149 = arith.constant 0 : index
    %101 = vector.load %arg2[%c2_146, %c2_147, %c0_148, %c0_149] : memref<3x3x16x16xf32, #tpu.memory_space<vmem>>, vector<1x1x16x16xf32>
    %102 = vector.shape_cast %101 : vector<1x1x16x16xf32> to vector<16x16xf32>
    %cst_150 = arith.constant dense<0.000000e+00> : vector<1x16xf32>
    %103 = tpu.matmul %100, %102, %cst_150 {dimension_numbers = #tpu.dot_dimension_numbers<[1], [0], [0], [1], [0, 0, 1, 1], [], []>} : vector<1x16xf32>, vector<16x16xf32>, vector<1x16xf32> -> vector<1x16xf32>
    %104 = arith.addf %98, %103 : vector<1x16xf32>
    %c0_151 = arith.constant 0 : index
    %c2_152 = arith.constant 2 : index
    %c0_153 = arith.constant 0 : index
    %105 = vector.load %arg4[%c0_151, %c2_152, %c0_153] : memref<1x4x16xf32, #tpu.memory_space<vmem>>, vector<1x1x16xf32>
    %106 = vector.shape_cast %105 : vector<1x1x16xf32> to vector<1x16xf32>
    %107 = vector.shape_cast %104 : vector<1x16xf32> to vector<1x1x16xf32>
    tpu.vector_store %arg4[%c0_151, %c2_152, %c0_153], %107 {strides = array<i32>} : memref<1x4x16xf32, #tpu.memory_space<vmem>>, vector<1x1x16xf32>,
    %c0_154 = arith.constant 0 : index
    %c0_155 = arith.constant 0 : index
    %108 = vector.load %arg3[%c0_154, %c0_155] : memref<1x16xf32, #tpu.memory_space<vmem>>, vector<1x16xf32>
    %c0_156 = arith.constant 0 : index
    %c1_157 = arith.constant 1 : index
    %c1_158 = arith.constant 1 : index
    %c0_159 = arith.constant 0 : index
    %109 = vector.load %arg1[%c0_156, %c1_157, %c1_158, %c0_159] : memref<1x4x4x16xf32, #tpu.memory_space<vmem>>, vector<1x1x1x16xf32>
    %110 = vector.shape_cast %109 : vector<1x1x1x16xf32> to vector<1x16xf32>
    %c0_160 = arith.constant 0 : index
    %c0_161 = arith.constant 0 : index
    %c0_162 = arith.constant 0 : index
    %c0_163 = arith.constant 0 : index
    %111 = vector.load %arg2[%c0_160, %c0_161, %c0_162, %c0_163] : memref<3x3x16x16xf32, #tpu.memory_space<vmem>>, vector<1x1x16x16xf32>
    %112 = vector.shape_cast %111 : vector<1x1x16x16xf32> to vector<16x16xf32>
    %cst_164 = arith.constant dense<0.000000e+00> : vector<1x16xf32>
    %113 = tpu.matmul %110, %112, %cst_164 {dimension_numbers = #tpu.dot_dimension_numbers<[1], [0], [0], [1], [0, 0, 1, 1], [], []>} : vector<1x16xf32>, vector<16x16xf32>, vector<1x16xf32> -> vector<1x16xf32>
    %114 = arith.addf %108, %113 : vector<1x16xf32>
    %c0_165 = arith.constant 0 : index
    %c1_166 = arith.constant 1 : index
    %c2_167 = arith.constant 2 : index
    %c0_168 = arith.constant 0 : index
    %115 = vector.load %arg1[%c0_165, %c1_166, %c2_167, %c0_168] : memref<1x4x4x16xf32, #tpu.memory_space<vmem>>, vector<1x1x1x16xf32>
    %116 = vector.shape_cast %115 : vector<1x1x1x16xf32> to vector<1x16xf32>
    %c0_169 = arith.constant 0 : index
    %c1_170 = arith.constant 1 : index
    %c0_171 = arith.constant 0 : index
    %c0_172 = arith.constant 0 : index
    %117 = vector.load %arg2[%c0_169, %c1_170, %c0_171, %c0_172] : memref<3x3x16x16xf32, #tpu.memory_space<vmem>>, vector<1x1x16x16xf32>
    %118 = vector.shape_cast %117 : vector<1x1x16x16xf32> to vector<16x16xf32>
    %cst_173 = arith.constant dense<0.000000e+00> : vector<1x16xf32>
    %119 = tpu.matmul %116, %118, %cst_173 {dimension_numbers = #tpu.dot_dimension_numbers<[1], [0], [0], [1], [0, 0, 1, 1], [], []>} : vector<1x16xf32>, vector<16x16xf32>, vector<1x16xf32> -> vector<1x16xf32>
    %120 = arith.addf %114, %119 : vector<1x16xf32>
    %c0_174 = arith.constant 0 : index
    %c1_175 = arith.constant 1 : index
    %c3_176 = arith.constant 3 : index
    %c0_177 = arith.constant 0 : index
    %121 = vector.load %arg1[%c0_174, %c1_175, %c3_176, %c0_177] : memref<1x4x4x16xf32, #tpu.memory_space<vmem>>, vector<1x1x1x16xf32>
    %122 = vector.shape_cast %121 : vector<1x1x1x16xf32> to vector<1x16xf32>
    %c0_178 = arith.constant 0 : index
    %c2_179 = arith.constant 2 : index
    %c0_180 = arith.constant 0 : index
    %c0_181 = arith.constant 0 : index
    %123 = vector.load %arg2[%c0_178, %c2_179, %c0_180, %c0_181] : memref<3x3x16x16xf32, #tpu.memory_space<vmem>>, vector<1x1x16x16xf32>
    %124 = vector.shape_cast %123 : vector<1x1x16x16xf32> to vector<16x16xf32>
    %cst_182 = arith.constant dense<0.000000e+00> : vector<1x16xf32>
    %125 = tpu.matmul %122, %124, %cst_182 {dimension_numbers = #tpu.dot_dimension_numbers<[1], [0], [0], [1], [0, 0, 1, 1], [], []>} : vector<1x16xf32>, vector<16x16xf32>, vector<1x16xf32> -> vector<1x16xf32>
    %126 = arith.addf %120, %125 : vector<1x16xf32>
    %c0_183 = arith.constant 0 : index
    %c2_184 = arith.constant 2 : index
    %c1_185 = arith.constant 1 : index
    %c0_186 = arith.constant 0 : index
    %127 = vector.load %arg1[%c0_183, %c2_184, %c1_185, %c0_186] : memref<1x4x4x16xf32, #tpu.memory_space<vmem>>, vector<1x1x1x16xf32>
    %128 = vector.shape_cast %127 : vector<1x1x1x16xf32> to vector<1x16xf32>
    %c1_187 = arith.constant 1 : index
    %c0_188 = arith.constant 0 : index
    %c0_189 = arith.constant 0 : index
    %c0_190 = arith.constant 0 : index
    %129 = vector.load %arg2[%c1_187, %c0_188, %c0_189, %c0_190] : memref<3x3x16x16xf32, #tpu.memory_space<vmem>>, vector<1x1x16x16xf32>
    %130 = vector.shape_cast %129 : vector<1x1x16x16xf32> to vector<16x16xf32>
    %cst_191 = arith.constant dense<0.000000e+00> : vector<1x16xf32>
    %131 = tpu.matmul %128, %130, %cst_191 {dimension_numbers = #tpu.dot_dimension_numbers<[1], [0], [0], [1], [0, 0, 1, 1], [], []>} : vector<1x16xf32>, vector<16x16xf32>, vector<1x16xf32> -> vector<1x16xf32>
    %132 = arith.addf %126, %131 : vector<1x16xf32>
    %c0_192 = arith.constant 0 : index
    %c2_193 = arith.constant 2 : index
    %c2_194 = arith.constant 2 : index
    %c0_195 = arith.constant 0 : index
    %133 = vector.load %arg1[%c0_192, %c2_193, %c2_194, %c0_195] : memref<1x4x4x16xf32, #tpu.memory_space<vmem>>, vector<1x1x1x16xf32>
    %134 = vector.shape_cast %133 : vector<1x1x1x16xf32> to vector<1x16xf32>
    %c1_196 = arith.constant 1 : index
    %c1_197 = arith.constant 1 : index
    %c0_198 = arith.constant 0 : index
    %c0_199 = arith.constant 0 : index
    %135 = vector.load %arg2[%c1_196, %c1_197, %c0_198, %c0_199] : memref<3x3x16x16xf32, #tpu.memory_space<vmem>>, vector<1x1x16x16xf32>
    %136 = vector.shape_cast %135 : vector<1x1x16x16xf32> to vector<16x16xf32>
    %cst_200 = arith.constant dense<0.000000e+00> : vector<1x16xf32>
    %137 = tpu.matmul %134, %136, %cst_200 {dimension_numbers = #tpu.dot_dimension_numbers<[1], [0], [0], [1], [0, 0, 1, 1], [], []>} : vector<1x16xf32>, vector<16x16xf32>, vector<1x16xf32> -> vector<1x16xf32>
    %138 = arith.addf %132, %137 : vector<1x16xf32>
    %c0_201 = arith.constant 0 : index
    %c2_202 = arith.constant 2 : index
    %c3_203 = arith.constant 3 : index
    %c0_204 = arith.constant 0 : index
    %139 = vector.load %arg1[%c0_201, %c2_202, %c3_203, %c0_204] : memref<1x4x4x16xf32, #tpu.memory_space<vmem>>, vector<1x1x1x16xf32>
    %140 = vector.shape_cast %139 : vector<1x1x1x16xf32> to vector<1x16xf32>
    %c1_205 = arith.constant 1 : index
    %c2_206 = arith.constant 2 : index
    %c0_207 = arith.constant 0 : index
    %c0_208 = arith.constant 0 : index
    %141 = vector.load %arg2[%c1_205, %c2_206, %c0_207, %c0_208] : memref<3x3x16x16xf32, #tpu.memory_space<vmem>>, vector<1x1x16x16xf32>
    %142 = vector.shape_cast %141 : vector<1x1x16x16xf32> to vector<16x16xf32>
    %cst_209 = arith.constant dense<0.000000e+00> : vector<1x16xf32>
    %143 = tpu.matmul %140, %142, %cst_209 {dimension_numbers = #tpu.dot_dimension_numbers<[1], [0], [0], [1], [0, 0, 1, 1], [], []>} : vector<1x16xf32>, vector<16x16xf32>, vector<1x16xf32> -> vector<1x16xf32>
    %144 = arith.addf %138, %143 : vector<1x16xf32>
    %c0_210 = arith.constant 0 : index
    %c3_211 = arith.constant 3 : index
    %c1_212 = arith.constant 1 : index
    %c0_213 = arith.constant 0 : index
    %145 = vector.load %arg1[%c0_210, %c3_211, %c1_212, %c0_213] : memref<1x4x4x16xf32, #tpu.memory_space<vmem>>, vector<1x1x1x16xf32>
    %146 = vector.shape_cast %145 : vector<1x1x1x16xf32> to vector<1x16xf32>
    %c2_214 = arith.constant 2 : index
    %c0_215 = arith.constant 0 : index
    %c0_216 = arith.constant 0 : index
    %c0_217 = arith.constant 0 : index
    %147 = vector.load %arg2[%c2_214, %c0_215, %c0_216, %c0_217] : memref<3x3x16x16xf32, #tpu.memory_space<vmem>>, vector<1x1x16x16xf32>
    %148 = vector.shape_cast %147 : vector<1x1x16x16xf32> to vector<16x16xf32>
    %cst_218 = arith.constant dense<0.000000e+00> : vector<1x16xf32>
    %149 = tpu.matmul %146, %148, %cst_218 {dimension_numbers = #tpu.dot_dimension_numbers<[1], [0], [0], [1], [0, 0, 1, 1], [], []>} : vector<1x16xf32>, vector<16x16xf32>, vector<1x16xf32> -> vector<1x16xf32>
    %150 = arith.addf %144, %149 : vector<1x16xf32>
    %c0_219 = arith.constant 0 : index
    %c3_220 = arith.constant 3 : index
    %c2_221 = arith.constant 2 : index
    %c0_222 = arith.constant 0 : index
    %151 = vector.load %arg1[%c0_219, %c3_220, %c2_221, %c0_222] : memref<1x4x4x16xf32, #tpu.memory_space<vmem>>, vector<1x1x1x16xf32>
    %152 = vector.shape_cast %151 : vector<1x1x1x16xf32> to vector<1x16xf32>
    %c2_223 = arith.constant 2 : index
    %c1_224 = arith.constant 1 : index
    %c0_225 = arith.constant 0 : index
    %c0_226 = arith.constant 0 : index
    %153 = vector.load %arg2[%c2_223, %c1_224, %c0_225, %c0_226] : memref<3x3x16x16xf32, #tpu.memory_space<vmem>>, vector<1x1x16x16xf32>
    %154 = vector.shape_cast %153 : vector<1x1x16x16xf32> to vector<16x16xf32>
    %cst_227 = arith.constant dense<0.000000e+00> : vector<1x16xf32>
    %155 = tpu.matmul %152, %154, %cst_227 {dimension_numbers = #tpu.dot_dimension_numbers<[1], [0], [0], [1], [0, 0, 1, 1], [], []>} : vector<1x16xf32>, vector<16x16xf32>, vector<1x16xf32> -> vector<1x16xf32>
    %156 = arith.addf %150, %155 : vector<1x16xf32>
    %c0_228 = arith.constant 0 : index
    %c3_229 = arith.constant 3 : index
    %c3_230 = arith.constant 3 : index
    %c0_231 = arith.constant 0 : index
    %157 = vector.load %arg1[%c0_228, %c3_229, %c3_230, %c0_231] : memref<1x4x4x16xf32, #tpu.memory_space<vmem>>, vector<1x1x1x16xf32>
    %158 = vector.shape_cast %157 : vector<1x1x1x16xf32> to vector<1x16xf32>
    %c2_232 = arith.constant 2 : index
    %c2_233 = arith.constant 2 : index
    %c0_234 = arith.constant 0 : index
    %c0_235 = arith.constant 0 : index
    %159 = vector.load %arg2[%c2_232, %c2_233, %c0_234, %c0_235] : memref<3x3x16x16xf32, #tpu.memory_space<vmem>>, vector<1x1x16x16xf32>
    %160 = vector.shape_cast %159 : vector<1x1x16x16xf32> to vector<16x16xf32>
    %cst_236 = arith.constant dense<0.000000e+00> : vector<1x16xf32>
    %161 = tpu.matmul %158, %160, %cst_236 {dimension_numbers = #tpu.dot_dimension_numbers<[1], [0], [0], [1], [0, 0, 1, 1], [], []>} : vector<1x16xf32>, vector<16x16xf32>, vector<1x16xf32> -> vector<1x16xf32>
    %162 = arith.addf %156, %161 : vector<1x16xf32>
    %c0_237 = arith.constant 0 : index
    %c3_238 = arith.constant 3 : index
    %c0_239 = arith.constant 0 : index
    %163 = vector.load %arg4[%c0_237, %c3_238, %c0_239] : memref<1x4x16xf32, #tpu.memory_space<vmem>>, vector<1x1x16xf32>
    %164 = vector.shape_cast %163 : vector<1x1x16xf32> to vector<1x16xf32>
    %165 = vector.shape_cast %162 : vector<1x16xf32> to vector<1x1x16xf32>
    tpu.vector_store %arg4[%c0_237, %c3_238, %c0_239], %165 {strides = array<i32>} : memref<1x4x16xf32, #tpu.memory_space<vmem>>, vector<1x1x16xf32>,
    return
  }
  func.func @transform_0(%arg0: i32) -> (i32, i32, i32, i32) {
    %c0_i32 = arith.constant 0 : i32
    %c0_i32_0 = arith.constant 0 : i32
    %c0_i32_1 = arith.constant 0 : i32
    %c0_i32_2 = arith.constant 0 : i32
    return %arg0, %c0_i32, %c0_i32_0, %c0_i32_1 : i32, i32, i32, i32
  }
  func.func @transform_1(%arg0: i32) -> (i32, i32, i32, i32) {
    %c0_i32 = arith.constant 0 : i32
    %c0_i32_0 = arith.constant 0 : i32
    %c0_i32_1 = arith.constant 0 : i32
    %c0_i32_2 = arith.constant 0 : i32
    %c0_i32_3 = arith.constant 0 : i32
    return %c0_i32, %c0_i32_0, %c0_i32_1, %c0_i32_2 : i32, i32, i32, i32
  }
  func.func @transform_2(%arg0: i32) -> (i32, i32) {
    %c0_i32 = arith.constant 0 : i32
    %c0_i32_0 = arith.constant 0 : i32
    %c0_i32_1 = arith.constant 0 : i32
    return %c0_i32, %c0_i32_0 : i32, i32
  }
  func.func @transform_3(%arg0: i32) -> (i32, i32, i32) {
    %c0_i32 = arith.constant 0 : i32
    %c0_i32_0 = arith.constant 0 : i32
    %c0_i32_1 = arith.constant 0 : i32
    return %arg0, %c0_i32, %c0_i32_0 : i32, i32, i32
  }
}

module attributes {stable_mosaic.version = 11 : i64} {
  func.func @_conv3x3_kernel(%arg0: i32, %arg1: memref<1x2x2x16xf32, #tpu.memory_space<vmem>>, %arg2: memref<3x3x16x4xf32, #tpu.memory_space<vmem>>, %arg3: memref<1x4xf32, #tpu.memory_space<vmem>>, %arg4: memref<1x4x4xf32, #tpu.memory_space<vmem>>) attributes {dimension_semantics = [#tpu.dimension_semantics<parallel>], iteration_bounds = array<i64: 2>, scalar_prefetch = 0 : i64, scratch_operands = 0 : i64, tpu.core_type = #tpu.core_type<tc>, window_params = [{transform_indices = @transform_0, window_bounds = array<i64: 1, 2, 2, 16>}, {pipeline_mode = #tpu.pipeline_mode<synchronous>, transform_indices = @transform_1, window_bounds = array<i64: 3, 3, 16, 4>}, {pipeline_mode = #tpu.pipeline_mode<synchronous>, transform_indices = @transform_2, window_bounds = array<i64: 1, 4>}, {transform_indices = @transform_3, window_bounds = array<i64: 1, 4, 4>}]} {
    %c0 = arith.constant 0 : index
    %c0_0 = arith.constant 0 : index
    %0 = vector.load %arg3[%c0, %c0_0] : memref<1x4xf32, #tpu.memory_space<vmem>>, vector<1x4xf32>
    %c0_1 = arith.constant 0 : index
    %c0_2 = arith.constant 0 : index
    %c0_3 = arith.constant 0 : index
    %c0_4 = arith.constant 0 : index
    %1 = vector.load %arg1[%c0_1, %c0_2, %c0_3, %c0_4] : memref<1x2x2x16xf32, #tpu.memory_space<vmem>>, vector<1x1x1x16xf32>
    %2 = vector.shape_cast %1 : vector<1x1x1x16xf32> to vector<1x16xf32>
    %c1 = arith.constant 1 : index
    %c1_5 = arith.constant 1 : index
    %c0_6 = arith.constant 0 : index
    %c0_7 = arith.constant 0 : index
    %3 = vector.load %arg2[%c1, %c1_5, %c0_6, %c0_7] : memref<3x3x16x4xf32, #tpu.memory_space<vmem>>, vector<1x1x16x4xf32>
    %4 = vector.shape_cast %3 : vector<1x1x16x4xf32> to vector<16x4xf32>
    %cst = arith.constant dense<0.000000e+00> : vector<1x4xf32>
    %5 = tpu.matmul %2, %4, %cst {dimension_numbers = #tpu.dot_dimension_numbers<[1], [0], [0], [1], [0, 0, 1, 1], [], []>} : vector<1x16xf32>, vector<16x4xf32>, vector<1x4xf32> -> vector<1x4xf32>
    %6 = arith.addf %0, %5 : vector<1x4xf32>
    %c0_8 = arith.constant 0 : index
    %c0_9 = arith.constant 0 : index
    %c1_10 = arith.constant 1 : index
    %c0_11 = arith.constant 0 : index
    %7 = vector.load %arg1[%c0_8, %c0_9, %c1_10, %c0_11] : memref<1x2x2x16xf32, #tpu.memory_space<vmem>>, vector<1x1x1x16xf32>
    %8 = vector.shape_cast %7 : vector<1x1x1x16xf32> to vector<1x16xf32>
    %c1_12 = arith.constant 1 : index
    %c2 = arith.constant 2 : index
    %c0_13 = arith.constant 0 : index
    %c0_14 = arith.constant 0 : index
    %9 = vector.load %arg2[%c1_12, %c2, %c0_13, %c0_14] : memref<3x3x16x4xf32, #tpu.memory_space<vmem>>, vector<1x1x16x4xf32>
    %10 = vector.shape_cast %9 : vector<1x1x16x4xf32> to vector<16x4xf32>
    %cst_15 = arith.constant dense<0.000000e+00> : vector<1x4xf32>
    %11 = tpu.matmul %8, %10, %cst_15 {dimension_numbers = #tpu.dot_dimension_numbers<[1], [0], [0], [1], [0, 0, 1, 1], [], []>} : vector<1x16xf32>, vector<16x4xf32>, vector<1x4xf32> -> vector<1x4xf32>
    %12 = arith.addf %6, %11 : vector<1x4xf32>
    %c0_16 = arith.constant 0 : index
    %c1_17 = arith.constant 1 : index
    %c0_18 = arith.constant 0 : index
    %c0_19 = arith.constant 0 : index
    %13 = vector.load %arg1[%c0_16, %c1_17, %c0_18, %c0_19] : memref<1x2x2x16xf32, #tpu.memory_space<vmem>>, vector<1x1x1x16xf32>
    %14 = vector.shape_cast %13 : vector<1x1x1x16xf32> to vector<1x16xf32>
    %c2_20 = arith.constant 2 : index
    %c1_21 = arith.constant 1 : index
    %c0_22 = arith.constant 0 : index
    %c0_23 = arith.constant 0 : index
    %15 = vector.load %arg2[%c2_20, %c1_21, %c0_22, %c0_23] : memref<3x3x16x4xf32, #tpu.memory_space<vmem>>, vector<1x1x16x4xf32>
    %16 = vector.shape_cast %15 : vector<1x1x16x4xf32> to vector<16x4xf32>
    %cst_24 = arith.constant dense<0.000000e+00> : vector<1x4xf32>
    %17 = tpu.matmul %14, %16, %cst_24 {dimension_numbers = #tpu.dot_dimension_numbers<[1], [0], [0], [1], [0, 0, 1, 1], [], []>} : vector<1x16xf32>, vector<16x4xf32>, vector<1x4xf32> -> vector<1x4xf32>
    %18 = arith.addf %12, %17 : vector<1x4xf32>
    %c0_25 = arith.constant 0 : index
    %c1_26 = arith.constant 1 : index
    %c1_27 = arith.constant 1 : index
    %c0_28 = arith.constant 0 : index
    %19 = vector.load %arg1[%c0_25, %c1_26, %c1_27, %c0_28] : memref<1x2x2x16xf32, #tpu.memory_space<vmem>>, vector<1x1x1x16xf32>
    %20 = vector.shape_cast %19 : vector<1x1x1x16xf32> to vector<1x16xf32>
    %c2_29 = arith.constant 2 : index
    %c2_30 = arith.constant 2 : index
    %c0_31 = arith.constant 0 : index
    %c0_32 = arith.constant 0 : index
    %21 = vector.load %arg2[%c2_29, %c2_30, %c0_31, %c0_32] : memref<3x3x16x4xf32, #tpu.memory_space<vmem>>, vector<1x1x16x4xf32>
    %22 = vector.shape_cast %21 : vector<1x1x16x4xf32> to vector<16x4xf32>
    %cst_33 = arith.constant dense<0.000000e+00> : vector<1x4xf32>
    %23 = tpu.matmul %20, %22, %cst_33 {dimension_numbers = #tpu.dot_dimension_numbers<[1], [0], [0], [1], [0, 0, 1, 1], [], []>} : vector<1x16xf32>, vector<16x4xf32>, vector<1x4xf32> -> vector<1x4xf32>
    %24 = arith.addf %18, %23 : vector<1x4xf32>
    %c0_34 = arith.constant 0 : index
    %c0_35 = arith.constant 0 : index
    %c0_36 = arith.constant 0 : index
    %25 = vector.load %arg4[%c0_34, %c0_35, %c0_36] : memref<1x4x4xf32, #tpu.memory_space<vmem>>, vector<1x1x4xf32>
    %26 = vector.shape_cast %25 : vector<1x1x4xf32> to vector<1x4xf32>
    %27 = vector.shape_cast %24 : vector<1x4xf32> to vector<1x1x4xf32>
    tpu.vector_store %arg4[%c0_34, %c0_35, %c0_36], %27 {strides = array<i32>} : memref<1x4x4xf32, #tpu.memory_space<vmem>>, vector<1x1x4xf32>,
    %c0_37 = arith.constant 0 : index
    %c0_38 = arith.constant 0 : index
    %28 = vector.load %arg3[%c0_37, %c0_38] : memref<1x4xf32, #tpu.memory_space<vmem>>, vector<1x4xf32>
    %c0_39 = arith.constant 0 : index
    %c0_40 = arith.constant 0 : index
    %c0_41 = arith.constant 0 : index
    %c0_42 = arith.constant 0 : index
    %29 = vector.load %arg1[%c0_39, %c0_40, %c0_41, %c0_42] : memref<1x2x2x16xf32, #tpu.memory_space<vmem>>, vector<1x1x1x16xf32>
    %30 = vector.shape_cast %29 : vector<1x1x1x16xf32> to vector<1x16xf32>
    %c1_43 = arith.constant 1 : index
    %c0_44 = arith.constant 0 : index
    %c0_45 = arith.constant 0 : index
    %c0_46 = arith.constant 0 : index
    %31 = vector.load %arg2[%c1_43, %c0_44, %c0_45, %c0_46] : memref<3x3x16x4xf32, #tpu.memory_space<vmem>>, vector<1x1x16x4xf32>
    %32 = vector.shape_cast %31 : vector<1x1x16x4xf32> to vector<16x4xf32>
    %cst_47 = arith.constant dense<0.000000e+00> : vector<1x4xf32>
    %33 = tpu.matmul %30, %32, %cst_47 {dimension_numbers = #tpu.dot_dimension_numbers<[1], [0], [0], [1], [0, 0, 1, 1], [], []>} : vector<1x16xf32>, vector<16x4xf32>, vector<1x4xf32> -> vector<1x4xf32>
    %34 = arith.addf %28, %33 : vector<1x4xf32>
    %c0_48 = arith.constant 0 : index
    %c0_49 = arith.constant 0 : index
    %c1_50 = arith.constant 1 : index
    %c0_51 = arith.constant 0 : index
    %35 = vector.load %arg1[%c0_48, %c0_49, %c1_50, %c0_51] : memref<1x2x2x16xf32, #tpu.memory_space<vmem>>, vector<1x1x1x16xf32>
    %36 = vector.shape_cast %35 : vector<1x1x1x16xf32> to vector<1x16xf32>
    %c1_52 = arith.constant 1 : index
    %c1_53 = arith.constant 1 : index
    %c0_54 = arith.constant 0 : index
    %c0_55 = arith.constant 0 : index
    %37 = vector.load %arg2[%c1_52, %c1_53, %c0_54, %c0_55] : memref<3x3x16x4xf32, #tpu.memory_space<vmem>>, vector<1x1x16x4xf32>
    %38 = vector.shape_cast %37 : vector<1x1x16x4xf32> to vector<16x4xf32>
    %cst_56 = arith.constant dense<0.000000e+00> : vector<1x4xf32>
    %39 = tpu.matmul %36, %38, %cst_56 {dimension_numbers = #tpu.dot_dimension_numbers<[1], [0], [0], [1], [0, 0, 1, 1], [], []>} : vector<1x16xf32>, vector<16x4xf32>, vector<1x4xf32> -> vector<1x4xf32>
    %40 = arith.addf %34, %39 : vector<1x4xf32>
    %c0_57 = arith.constant 0 : index
    %c1_58 = arith.constant 1 : index
    %c0_59 = arith.constant 0 : index
    %c0_60 = arith.constant 0 : index
    %41 = vector.load %arg1[%c0_57, %c1_58, %c0_59, %c0_60] : memref<1x2x2x16xf32, #tpu.memory_space<vmem>>, vector<1x1x1x16xf32>
    %42 = vector.shape_cast %41 : vector<1x1x1x16xf32> to vector<1x16xf32>
    %c2_61 = arith.constant 2 : index
    %c0_62 = arith.constant 0 : index
    %c0_63 = arith.constant 0 : index
    %c0_64 = arith.constant 0 : index
    %43 = vector.load %arg2[%c2_61, %c0_62, %c0_63, %c0_64] : memref<3x3x16x4xf32, #tpu.memory_space<vmem>>, vector<1x1x16x4xf32>
    %44 = vector.shape_cast %43 : vector<1x1x16x4xf32> to vector<16x4xf32>
    %cst_65 = arith.constant dense<0.000000e+00> : vector<1x4xf32>
    %45 = tpu.matmul %42, %44, %cst_65 {dimension_numbers = #tpu.dot_dimension_numbers<[1], [0], [0], [1], [0, 0, 1, 1], [], []>} : vector<1x16xf32>, vector<16x4xf32>, vector<1x4xf32> -> vector<1x4xf32>
    %46 = arith.addf %40, %45 : vector<1x4xf32>
    %c0_66 = arith.constant 0 : index
    %c1_67 = arith.constant 1 : index
    %c1_68 = arith.constant 1 : index
    %c0_69 = arith.constant 0 : index
    %47 = vector.load %arg1[%c0_66, %c1_67, %c1_68, %c0_69] : memref<1x2x2x16xf32, #tpu.memory_space<vmem>>, vector<1x1x1x16xf32>
    %48 = vector.shape_cast %47 : vector<1x1x1x16xf32> to vector<1x16xf32>
    %c2_70 = arith.constant 2 : index
    %c1_71 = arith.constant 1 : index
    %c0_72 = arith.constant 0 : index
    %c0_73 = arith.constant 0 : index
    %49 = vector.load %arg2[%c2_70, %c1_71, %c0_72, %c0_73] : memref<3x3x16x4xf32, #tpu.memory_space<vmem>>, vector<1x1x16x4xf32>
    %50 = vector.shape_cast %49 : vector<1x1x16x4xf32> to vector<16x4xf32>
    %cst_74 = arith.constant dense<0.000000e+00> : vector<1x4xf32>
    %51 = tpu.matmul %48, %50, %cst_74 {dimension_numbers = #tpu.dot_dimension_numbers<[1], [0], [0], [1], [0, 0, 1, 1], [], []>} : vector<1x16xf32>, vector<16x4xf32>, vector<1x4xf32> -> vector<1x4xf32>
    %52 = arith.addf %46, %51 : vector<1x4xf32>
    %c0_75 = arith.constant 0 : index
    %c1_76 = arith.constant 1 : index
    %c0_77 = arith.constant 0 : index
    %53 = vector.load %arg4[%c0_75, %c1_76, %c0_77] : memref<1x4x4xf32, #tpu.memory_space<vmem>>, vector<1x1x4xf32>
    %54 = vector.shape_cast %53 : vector<1x1x4xf32> to vector<1x4xf32>
    %55 = vector.shape_cast %52 : vector<1x4xf32> to vector<1x1x4xf32>
    tpu.vector_store %arg4[%c0_75, %c1_76, %c0_77], %55 {strides = array<i32>} : memref<1x4x4xf32, #tpu.memory_space<vmem>>, vector<1x1x4xf32>,
    %c0_78 = arith.constant 0 : index
    %c0_79 = arith.constant 0 : index
    %56 = vector.load %arg3[%c0_78, %c0_79] : memref<1x4xf32, #tpu.memory_space<vmem>>, vector<1x4xf32>
    %c0_80 = arith.constant 0 : index
    %c0_81 = arith.constant 0 : index
    %c0_82 = arith.constant 0 : index
    %c0_83 = arith.constant 0 : index
    %57 = vector.load %arg1[%c0_80, %c0_81, %c0_82, %c0_83] : memref<1x2x2x16xf32, #tpu.memory_space<vmem>>, vector<1x1x1x16xf32>
    %58 = vector.shape_cast %57 : vector<1x1x1x16xf32> to vector<1x16xf32>
    %c0_84 = arith.constant 0 : index
    %c1_85 = arith.constant 1 : index
    %c0_86 = arith.constant 0 : index
    %c0_87 = arith.constant 0 : index
    %59 = vector.load %arg2[%c0_84, %c1_85, %c0_86, %c0_87] : memref<3x3x16x4xf32, #tpu.memory_space<vmem>>, vector<1x1x16x4xf32>
    %60 = vector.shape_cast %59 : vector<1x1x16x4xf32> to vector<16x4xf32>
    %cst_88 = arith.constant dense<0.000000e+00> : vector<1x4xf32>
    %61 = tpu.matmul %58, %60, %cst_88 {dimension_numbers = #tpu.dot_dimension_numbers<[1], [0], [0], [1], [0, 0, 1, 1], [], []>} : vector<1x16xf32>, vector<16x4xf32>, vector<1x4xf32> -> vector<1x4xf32>
    %62 = arith.addf %56, %61 : vector<1x4xf32>
    %c0_89 = arith.constant 0 : index
    %c0_90 = arith.constant 0 : index
    %c1_91 = arith.constant 1 : index
    %c0_92 = arith.constant 0 : index
    %63 = vector.load %arg1[%c0_89, %c0_90, %c1_91, %c0_92] : memref<1x2x2x16xf32, #tpu.memory_space<vmem>>, vector<1x1x1x16xf32>
    %64 = vector.shape_cast %63 : vector<1x1x1x16xf32> to vector<1x16xf32>
    %c0_93 = arith.constant 0 : index
    %c2_94 = arith.constant 2 : index
    %c0_95 = arith.constant 0 : index
    %c0_96 = arith.constant 0 : index
    %65 = vector.load %arg2[%c0_93, %c2_94, %c0_95, %c0_96] : memref<3x3x16x4xf32, #tpu.memory_space<vmem>>, vector<1x1x16x4xf32>
    %66 = vector.shape_cast %65 : vector<1x1x16x4xf32> to vector<16x4xf32>
    %cst_97 = arith.constant dense<0.000000e+00> : vector<1x4xf32>
    %67 = tpu.matmul %64, %66, %cst_97 {dimension_numbers = #tpu.dot_dimension_numbers<[1], [0], [0], [1], [0, 0, 1, 1], [], []>} : vector<1x16xf32>, vector<16x4xf32>, vector<1x4xf32> -> vector<1x4xf32>
    %68 = arith.addf %62, %67 : vector<1x4xf32>
    %c0_98 = arith.constant 0 : index
    %c1_99 = arith.constant 1 : index
    %c0_100 = arith.constant 0 : index
    %c0_101 = arith.constant 0 : index
    %69 = vector.load %arg1[%c0_98, %c1_99, %c0_100, %c0_101] : memref<1x2x2x16xf32, #tpu.memory_space<vmem>>, vector<1x1x1x16xf32>
    %70 = vector.shape_cast %69 : vector<1x1x1x16xf32> to vector<1x16xf32>
    %c1_102 = arith.constant 1 : index
    %c1_103 = arith.constant 1 : index
    %c0_104 = arith.constant 0 : index
    %c0_105 = arith.constant 0 : index
    %71 = vector.load %arg2[%c1_102, %c1_103, %c0_104, %c0_105] : memref<3x3x16x4xf32, #tpu.memory_space<vmem>>, vector<1x1x16x4xf32>
    %72 = vector.shape_cast %71 : vector<1x1x16x4xf32> to vector<16x4xf32>
    %cst_106 = arith.constant dense<0.000000e+00> : vector<1x4xf32>
    %73 = tpu.matmul %70, %72, %cst_106 {dimension_numbers = #tpu.dot_dimension_numbers<[1], [0], [0], [1], [0, 0, 1, 1], [], []>} : vector<1x16xf32>, vector<16x4xf32>, vector<1x4xf32> -> vector<1x4xf32>
    %74 = arith.addf %68, %73 : vector<1x4xf32>
    %c0_107 = arith.constant 0 : index
    %c1_108 = arith.constant 1 : index
    %c1_109 = arith.constant 1 : index
    %c0_110 = arith.constant 0 : index
    %75 = vector.load %arg1[%c0_107, %c1_108, %c1_109, %c0_110] : memref<1x2x2x16xf32, #tpu.memory_space<vmem>>, vector<1x1x1x16xf32>
    %76 = vector.shape_cast %75 : vector<1x1x1x16xf32> to vector<1x16xf32>
    %c1_111 = arith.constant 1 : index
    %c2_112 = arith.constant 2 : index
    %c0_113 = arith.constant 0 : index
    %c0_114 = arith.constant 0 : index
    %77 = vector.load %arg2[%c1_111, %c2_112, %c0_113, %c0_114] : memref<3x3x16x4xf32, #tpu.memory_space<vmem>>, vector<1x1x16x4xf32>
    %78 = vector.shape_cast %77 : vector<1x1x16x4xf32> to vector<16x4xf32>
    %cst_115 = arith.constant dense<0.000000e+00> : vector<1x4xf32>
    %79 = tpu.matmul %76, %78, %cst_115 {dimension_numbers = #tpu.dot_dimension_numbers<[1], [0], [0], [1], [0, 0, 1, 1], [], []>} : vector<1x16xf32>, vector<16x4xf32>, vector<1x4xf32> -> vector<1x4xf32>
    %80 = arith.addf %74, %79 : vector<1x4xf32>
    %c0_116 = arith.constant 0 : index
    %c2_117 = arith.constant 2 : index
    %c0_118 = arith.constant 0 : index
    %81 = vector.load %arg4[%c0_116, %c2_117, %c0_118] : memref<1x4x4xf32, #tpu.memory_space<vmem>>, vector<1x1x4xf32>
    %82 = vector.shape_cast %81 : vector<1x1x4xf32> to vector<1x4xf32>
    %83 = vector.shape_cast %80 : vector<1x4xf32> to vector<1x1x4xf32>
    tpu.vector_store %arg4[%c0_116, %c2_117, %c0_118], %83 {strides = array<i32>} : memref<1x4x4xf32, #tpu.memory_space<vmem>>, vector<1x1x4xf32>,
    %c0_119 = arith.constant 0 : index
    %c0_120 = arith.constant 0 : index
    %84 = vector.load %arg3[%c0_119, %c0_120] : memref<1x4xf32, #tpu.memory_space<vmem>>, vector<1x4xf32>
    %c0_121 = arith.constant 0 : index
    %c0_122 = arith.constant 0 : index
    %c0_123 = arith.constant 0 : index
    %c0_124 = arith.constant 0 : index
    %85 = vector.load %arg1[%c0_121, %c0_122, %c0_123, %c0_124] : memref<1x2x2x16xf32, #tpu.memory_space<vmem>>, vector<1x1x1x16xf32>
    %86 = vector.shape_cast %85 : vector<1x1x1x16xf32> to vector<1x16xf32>
    %c0_125 = arith.constant 0 : index
    %c0_126 = arith.constant 0 : index
    %c0_127 = arith.constant 0 : index
    %c0_128 = arith.constant 0 : index
    %87 = vector.load %arg2[%c0_125, %c0_126, %c0_127, %c0_128] : memref<3x3x16x4xf32, #tpu.memory_space<vmem>>, vector<1x1x16x4xf32>
    %88 = vector.shape_cast %87 : vector<1x1x16x4xf32> to vector<16x4xf32>
    %cst_129 = arith.constant dense<0.000000e+00> : vector<1x4xf32>
    %89 = tpu.matmul %86, %88, %cst_129 {dimension_numbers = #tpu.dot_dimension_numbers<[1], [0], [0], [1], [0, 0, 1, 1], [], []>} : vector<1x16xf32>, vector<16x4xf32>, vector<1x4xf32> -> vector<1x4xf32>
    %90 = arith.addf %84, %89 : vector<1x4xf32>
    %c0_130 = arith.constant 0 : index
    %c0_131 = arith.constant 0 : index
    %c1_132 = arith.constant 1 : index
    %c0_133 = arith.constant 0 : index
    %91 = vector.load %arg1[%c0_130, %c0_131, %c1_132, %c0_133] : memref<1x2x2x16xf32, #tpu.memory_space<vmem>>, vector<1x1x1x16xf32>
    %92 = vector.shape_cast %91 : vector<1x1x1x16xf32> to vector<1x16xf32>
    %c0_134 = arith.constant 0 : index
    %c1_135 = arith.constant 1 : index
    %c0_136 = arith.constant 0 : index
    %c0_137 = arith.constant 0 : index
    %93 = vector.load %arg2[%c0_134, %c1_135, %c0_136, %c0_137] : memref<3x3x16x4xf32, #tpu.memory_space<vmem>>, vector<1x1x16x4xf32>
    %94 = vector.shape_cast %93 : vector<1x1x16x4xf32> to vector<16x4xf32>
    %cst_138 = arith.constant dense<0.000000e+00> : vector<1x4xf32>
    %95 = tpu.matmul %92, %94, %cst_138 {dimension_numbers = #tpu.dot_dimension_numbers<[1], [0], [0], [1], [0, 0, 1, 1], [], []>} : vector<1x16xf32>, vector<16x4xf32>, vector<1x4xf32> -> vector<1x4xf32>
    %96 = arith.addf %90, %95 : vector<1x4xf32>
    %c0_139 = arith.constant 0 : index
    %c1_140 = arith.constant 1 : index
    %c0_141 = arith.constant 0 : index
    %c0_142 = arith.constant 0 : index
    %97 = vector.load %arg1[%c0_139, %c1_140, %c0_141, %c0_142] : memref<1x2x2x16xf32, #tpu.memory_space<vmem>>, vector<1x1x1x16xf32>
    %98 = vector.shape_cast %97 : vector<1x1x1x16xf32> to vector<1x16xf32>
    %c1_143 = arith.constant 1 : index
    %c0_144 = arith.constant 0 : index
    %c0_145 = arith.constant 0 : index
    %c0_146 = arith.constant 0 : index
    %99 = vector.load %arg2[%c1_143, %c0_144, %c0_145, %c0_146] : memref<3x3x16x4xf32, #tpu.memory_space<vmem>>, vector<1x1x16x4xf32>
    %100 = vector.shape_cast %99 : vector<1x1x16x4xf32> to vector<16x4xf32>
    %cst_147 = arith.constant dense<0.000000e+00> : vector<1x4xf32>
    %101 = tpu.matmul %98, %100, %cst_147 {dimension_numbers = #tpu.dot_dimension_numbers<[1], [0], [0], [1], [0, 0, 1, 1], [], []>} : vector<1x16xf32>, vector<16x4xf32>, vector<1x4xf32> -> vector<1x4xf32>
    %102 = arith.addf %96, %101 : vector<1x4xf32>
    %c0_148 = arith.constant 0 : index
    %c1_149 = arith.constant 1 : index
    %c1_150 = arith.constant 1 : index
    %c0_151 = arith.constant 0 : index
    %103 = vector.load %arg1[%c0_148, %c1_149, %c1_150, %c0_151] : memref<1x2x2x16xf32, #tpu.memory_space<vmem>>, vector<1x1x1x16xf32>
    %104 = vector.shape_cast %103 : vector<1x1x1x16xf32> to vector<1x16xf32>
    %c1_152 = arith.constant 1 : index
    %c1_153 = arith.constant 1 : index
    %c0_154 = arith.constant 0 : index
    %c0_155 = arith.constant 0 : index
    %105 = vector.load %arg2[%c1_152, %c1_153, %c0_154, %c0_155] : memref<3x3x16x4xf32, #tpu.memory_space<vmem>>, vector<1x1x16x4xf32>
    %106 = vector.shape_cast %105 : vector<1x1x16x4xf32> to vector<16x4xf32>
    %cst_156 = arith.constant dense<0.000000e+00> : vector<1x4xf32>
    %107 = tpu.matmul %104, %106, %cst_156 {dimension_numbers = #tpu.dot_dimension_numbers<[1], [0], [0], [1], [0, 0, 1, 1], [], []>} : vector<1x16xf32>, vector<16x4xf32>, vector<1x4xf32> -> vector<1x4xf32>
    %108 = arith.addf %102, %107 : vector<1x4xf32>
    %c0_157 = arith.constant 0 : index
    %c3 = arith.constant 3 : index
    %c0_158 = arith.constant 0 : index
    %109 = vector.load %arg4[%c0_157, %c3, %c0_158] : memref<1x4x4xf32, #tpu.memory_space<vmem>>, vector<1x1x4xf32>
    %110 = vector.shape_cast %109 : vector<1x1x4xf32> to vector<1x4xf32>
    %111 = vector.shape_cast %108 : vector<1x4xf32> to vector<1x1x4xf32>
    tpu.vector_store %arg4[%c0_157, %c3, %c0_158], %111 {strides = array<i32>} : memref<1x4x4xf32, #tpu.memory_space<vmem>>, vector<1x1x4xf32>,
    return
  }
  func.func @transform_0(%arg0: i32) -> (i32, i32, i32, i32) {
    %c0_i32 = arith.constant 0 : i32
    %c0_i32_0 = arith.constant 0 : i32
    %c0_i32_1 = arith.constant 0 : i32
    %c0_i32_2 = arith.constant 0 : i32
    return %arg0, %c0_i32, %c0_i32_0, %c0_i32_1 : i32, i32, i32, i32
  }
  func.func @transform_1(%arg0: i32) -> (i32, i32, i32, i32) {
    %c0_i32 = arith.constant 0 : i32
    %c0_i32_0 = arith.constant 0 : i32
    %c0_i32_1 = arith.constant 0 : i32
    %c0_i32_2 = arith.constant 0 : i32
    %c0_i32_3 = arith.constant 0 : i32
    return %c0_i32, %c0_i32_0, %c0_i32_1, %c0_i32_2 : i32, i32, i32, i32
  }
  func.func @transform_2(%arg0: i32) -> (i32, i32) {
    %c0_i32 = arith.constant 0 : i32
    %c0_i32_0 = arith.constant 0 : i32
    %c0_i32_1 = arith.constant 0 : i32
    return %c0_i32, %c0_i32_0 : i32, i32
  }
  func.func @transform_3(%arg0: i32) -> (i32, i32, i32) {
    %c0_i32 = arith.constant 0 : i32
    %c0_i32_0 = arith.constant 0 : i32
    %c0_i32_1 = arith.constant 0 : i32
    return %arg0, %c0_i32, %c0_i32_0 : i32, i32, i32
  }
}

module attributes {stable_mosaic.version = 11 : i64} {
  func.func @_apply_kernel(%arg0: i32, %arg1: i32, %arg2: memref<1x4x256xf32, #tpu.memory_space<vmem>>, %arg3: memref<1x4x4xf32, #tpu.memory_space<vmem>>, %arg4: memref<4x256xf32, #tpu.memory_space<vmem>>, %arg5: memref<1x4x256xf32, #tpu.memory_space<vmem>>) attributes {dimension_semantics = [#tpu.dimension_semantics<parallel>, #tpu.dimension_semantics<parallel>], iteration_bounds = array<i64: 2, 1>, scalar_prefetch = 0 : i64, scratch_operands = 0 : i64, tpu.core_type = #tpu.core_type<tc>, window_params = [{transform_indices = @transform_0, window_bounds = array<i64: 1, 4, 256>}, {transform_indices = @transform_1, window_bounds = array<i64: 1, 4, 4>}, {transform_indices = @transform_2, window_bounds = array<i64: 4, 256>}, {transform_indices = @transform_3, window_bounds = array<i64: 1, 4, 256>}]} {
    %c0 = arith.constant 0 : index
    %c0_0 = arith.constant 0 : index
    %c0_1 = arith.constant 0 : index
    %0 = vector.load %arg2[%c0, %c0_0, %c0_1] : memref<1x4x256xf32, #tpu.memory_space<vmem>>, vector<1x4x256xf32>
    %1 = vector.shape_cast %0 : vector<1x4x256xf32> to vector<4x256xf32>
    %c0_2 = arith.constant 0 : index
    %c0_3 = arith.constant 0 : index
    %c0_4 = arith.constant 0 : index
    %2 = vector.load %arg3[%c0_2, %c0_3, %c0_4] : memref<1x4x4xf32, #tpu.memory_space<vmem>>, vector<1x4x4xf32>
    %3 = vector.shape_cast %2 : vector<1x4x4xf32> to vector<4x4xf32>
    %cst = arith.constant 0.000000e+00 : f32
    %4 = vector.broadcast %cst : f32 to vector<4x4xf32>
    %5 = arith.subf %4, %3 : vector<4x4xf32>
    %6 = math.exp %5 : vector<4x4xf32>
    %cst_5 = arith.constant 1.000000e+00 : f32
    %7 = vector.broadcast %cst_5 : f32 to vector<4x4xf32>
    %8 = arith.addf %7, %6 : vector<4x4xf32>
    %cst_6 = arith.constant 1.000000e+00 : f32
    %9 = vector.broadcast %cst_6 : f32 to vector<4x4xf32>
    %10 = arith.divf %9, %8 : vector<4x4xf32>
    %c0_7 = arith.constant 0 : index
    %c0_8 = arith.constant 0 : index
    %11 = vector.load %arg4[%c0_7, %c0_8] : memref<4x256xf32, #tpu.memory_space<vmem>>, vector<4x256xf32>
    %cst_9 = arith.constant dense<0.000000e+00> : vector<4x256xf32>
    %12 = tpu.matmul %10, %11, %cst_9 {dimension_numbers = #tpu.dot_dimension_numbers<[0], [0], [1], [1], [0, 1, 1, 1], [], []>} : vector<4x4xf32>, vector<4x256xf32>, vector<4x256xf32> -> vector<4x256xf32>
    %13 = vector.extract_strided_slice %1 {offsets = [0, 0], sizes = [1, 256], strides = [1, 1]} : vector<4x256xf32> to vector<1x256xf32>
    %cst_10 = arith.constant 0.000000e+00 : f32
    %14 = vector.broadcast %cst_10 : f32 to vector<1x256xf32>
    %15 = arith.subf %14, %13 : vector<1x256xf32>
    %16 = math.exp %15 : vector<1x256xf32>
    %cst_11 = arith.constant 1.000000e+00 : f32
    %17 = vector.broadcast %cst_11 : f32 to vector<1x256xf32>
    %18 = arith.addf %17, %16 : vector<1x256xf32>
    %cst_12 = arith.constant 1.000000e+00 : f32
    %19 = vector.broadcast %cst_12 : f32 to vector<1x256xf32>
    %20 = arith.divf %19, %18 : vector<1x256xf32>
    %21 = arith.mulf %1, %12 : vector<4x256xf32>
    %22 = vector.broadcast %20 : vector<1x256xf32> to vector<4x256xf32>
    %23 = arith.mulf %21, %22 : vector<4x256xf32>
    %c0_13 = arith.constant 0 : index
    %c0_14 = arith.constant 0 : index
    %c0_15 = arith.constant 0 : index
    %24 = vector.load %arg5[%c0_13, %c0_14, %c0_15] : memref<1x4x256xf32, #tpu.memory_space<vmem>>, vector<1x4x256xf32>
    %25 = vector.shape_cast %24 : vector<1x4x256xf32> to vector<4x256xf32>
    %26 = vector.shape_cast %23 : vector<4x256xf32> to vector<1x4x256xf32>
    tpu.vector_store %arg5[%c0_13, %c0_14, %c0_15], %26 {strides = array<i32>} : memref<1x4x256xf32, #tpu.memory_space<vmem>>, vector<1x4x256xf32>,
    return
  }
  func.func @transform_0(%arg0: i32, %arg1: i32) -> (i32, i32, i32) {
    %c0_i32 = arith.constant 0 : i32
    %c0_i32_0 = arith.constant 0 : i32
    return %arg0, %c0_i32, %arg1 : i32, i32, i32
  }
  func.func @transform_1(%arg0: i32, %arg1: i32) -> (i32, i32, i32) {
    %c0_i32 = arith.constant 0 : i32
    %c0_i32_0 = arith.constant 0 : i32
    %c0_i32_1 = arith.constant 0 : i32
    return %arg0, %c0_i32, %c0_i32_0 : i32, i32, i32
  }
  func.func @transform_2(%arg0: i32, %arg1: i32) -> (i32, i32) {
    %c0_i32 = arith.constant 0 : i32
    %c0_i32_0 = arith.constant 0 : i32
    return %c0_i32, %arg1 : i32, i32
  }
  func.func @transform_3(%arg0: i32, %arg1: i32) -> (i32, i32, i32) {
    %c0_i32 = arith.constant 0 : i32
    %c0_i32_0 = arith.constant 0 : i32
    return %arg0, %c0_i32, %arg1 : i32, i32, i32
  }
}

</mosaic_0001>

<bundles_post_ra>
// kernel: local_attention_forward.5
= control target key start
LH: loop header
LB: loop body
LE: loop exit
PB: predicated region body
PF: predicated region fallthrough
CT: control target
= control target key end

     0   :  { %s934_s12 = smov 0   ;;  %s936_s13 = smov 0   ;;  %s1109_s0 = inlined_call_operand.vmem [shape: f32[2,4,256], index: 0, kind: input, shape index: {}]   ;;  %s1110_s1 = inlined_call_operand.vmem [shape: f32[4,16], index: 1, kind: input, shape index: {}]   ;;  %s1111_s2 = inlined_call_operand.vmem [shape: f32[1,16], index: 2, kind: input, shape index: {}]   ;;  %s1112_s3 = inlined_call_operand.vmem [shape: f32[2,256,16], index: 3, kind: output, shape index: {}]  }
   0x1   :  { %s938_s14 = smov 0  }
   0x2 LB: > { %s25_s15 = sadd.s32 1, %s908_s13  ;;  %p736_p0 = scmp.ge.s32.totalorder %s912_s14, 1  ;;  %s912_s14 = sphi %s938_s14, %s13_s14   ;;  %s908_s13 = sphi %s936_s13, %s1114_s13   ;;  %s904_s12 = sphi %s934_s12, %s1113_s12  }
   0x3   : > { %p27_p1 = scmp.ge.s32.totalorder %s25_s15, 2  ;;  %p158_p2 = scmp.lt.s32.totalorder %s912_s14, 3 }
   0x5   : > { %s1116_s15 = smov (%p27_p1, %s25_s15), 0  ;;  %p159_p3 = pnand %p736_p0, %p158_p2 }
   0x6   : > { %p191_p4 = scmp.lt.s32.totalorder (!%p159_p3), %s904_s12, 1  ;;  %v211_v1 = vld [vmem:[%s1110_s1] sm:$0xf] (!%p159_p3)  ;;  %vm383_vm0 = vcmask (!%p159_p3), 1043456   ;;  %vm286_vm1 = vcmask (!%p159_p3), 31744   ;;  %vm612_vm2 = vcmask (!%p159_p3), 130048  }
   0x7   : > { %162 = sbr.rel (%p159_p3) target bundleno = 487 (0x1e7), region = 32  ;;  %812 = vmatprep.subr.msk.mxu0 (!%p159_p3), %vm383_vm0, %v211_v1  ;;  %862 = vmatprep.subr.msk.mxu1 (!%p159_p3), %vm383_vm0, %v211_v1  ;;  %v997_v35 = vld [vmem:[%s1111_s2] ss:$0 sm:$0xff] (!%p159_p3) }
   0x8   : > { %813 = vmatpush3.msk.msra.mxu0 (!%p159_p3), %vm383_vm0, %v211_v1  ;;  %863 = vmatpush3.msk.msra.mxu1 (!%p159_p3), %vm383_vm0, %v211_v1 }
   0xe   : > { %s1118_s12 = smov (!%p191_p4, %s904_s12), 1 }
   0xf   : > { %s777_s16 = sshll.u32 %s1118_s12, 3  ;;  %s778_s22 = sshll.u32 %s1118_s12, 8 }
  0x10   : > { %s198_s19 = scalar_lea.vmem %s1109_s0, %s777_s16  ;;  %s1002_s27 = scalar_lea.vmem %s1112_s3, %s778_s22 }
  0x11   : > { %v210_v0 = vld [vmem:[%s198_s19] sm:$0xff] }
  0x12   : > { %222 = vxpose.xlu0.b32.start.end [1/1] (short) %v210_v0, 128  ;;  %v220_v2 = vcombine.high %v210_v0, %v210_v0 }
  0x4f   : > { %254 = vxpose.xlu0.b32.start.end [1/1] (short) %v220_v2, 128 }
  0x92   : > { %v238_v3 = vpop.trf.xlu0 }
  0x93   : > { %814 = vmatprep.mubr.msk.f32.mxu0 %vm286_vm1, %v238_v3 }
  0x96   : > { %v239_v4 = vpop.trf.xlu0 }
  0x97   : > { %815 = vmatmul.mubr.msk.f32.vlgmr.msra.gmra.mrb[0].mxu0 %vm286_vm1, %v239_v4 }
  0x9a   : > { %v240_v5 = vpop.trf.xlu0 }
  0x9b   : > { %817 = vmatprep.mubr.msk.f32.mxu0 %vm286_vm1, %v240_v5 }
  0x9e   : > { %v241_v6 = vpop.trf.xlu0 }
  0x9f   : > { %818 = vmatmul.mubr.msk.f32.gmra.mrb[2].mxu0 %vm286_vm1, %v241_v6 }
  0xa2   : > { %v242_v7 = vpop.trf.xlu0 }
  0xa3   : > { %820 = vmatprep.mubr.msk.f32.mxu0 %vm286_vm1, %v242_v7 }
  0xa6   : > { %v243_v8 = vpop.trf.xlu0 }
  0xa7   : > { %821 = vmatmul.mubr.msk.f32.gmra.mrb[4].mxu0 %vm286_vm1, %v243_v8 }
  0xaa   : > { %v244_v9 = vpop.trf.xlu0 }
  0xab   : > { %823 = vmatprep.mubr.msk.f32.mxu0 %vm286_vm1, %v244_v9 }
  0xae   : > { %v245_v10 = vpop.trf.xlu0 }
  0xaf   : > { %824 = vmatmul.mubr.msk.f32.gmra.mrb[6].mxu0 %vm286_vm1, %v245_v10 }
  0xb2   : > { %v246_v11 = vpop.trf.xlu0 }
  0xb3   : > { %826 = vmatprep.mubr.msk.f32.mxu0 %vm286_vm1, %v246_v11 }
  0xb6   : > { %v247_v12 = vpop.trf.xlu0 }
  0xb7   : > { %827 = vmatmul.mubr.msk.f32.gmra.mrb[8].mxu0 %vm286_vm1, %v247_v12 }
  0xba   : > { %v248_v13 = vpop.trf.xlu0 }
  0xbb   : > { %829 = vmatprep.mubr.msk.f32.mxu0 %vm286_vm1, %v248_v13 }
  0xbe   : > { %v249_v14 = vpop.trf.xlu0 }
  0xbf   : > { %830 = vmatmul.mubr.msk.f32.gmra.mrb[10].mxu0 %vm286_vm1, %v249_v14 }
  0xc2   : > { %v250_v15 = vpop.trf.xlu0 }
  0xc3   : > { %832 = vmatprep.mubr.msk.f32.mxu0 %vm286_vm1, %v250_v15 }
  0xc6   : > { %v251_v16 = vpop.trf.xlu0 }
  0xc7   : > { %833 = vmatmul.mubr.msk.f32.gmra.mrb[12].mxu0 %vm286_vm1, %v251_v16 }
  0xca   : > { %v252_v17 = vpop.trf.xlu0 }
  0xcb   : > { %835 = vmatprep.mubr.msk.f32.mxu0 %vm286_vm1, %v252_v17 }
  0xce   : > { %v253_v18 = vpop.trf.xlu0 }
  0xcf   : > { %836 = vmatmul.mubr.msk.f32.gmra.mrb[14].mxu0 %vm286_vm1, %v253_v18 }
  0xd2   : > { %v270_v19 = vpop.trf.xlu0 }
  0xd3   : > { %838 = vmatprep.mubr.msk.f32.mxu1 %vm286_vm1, %v270_v19 }
  0xd6   : > { %v271_v20 = vpop.trf.xlu0 }
  0xd7   : > { %839 = vmatmul.mubr.msk.f32.vlgmr.msra.gmra.mrb[0].mxu1 %vm286_vm1, %v271_v20 }
  0xda   : > { %v272_v21 = vpop.trf.xlu0 }
  0xdb   : > { %841 = vmatprep.mubr.msk.f32.mxu1 %vm286_vm1, %v272_v21 }
  0xde   : > { %v273_v22 = vpop.trf.xlu0 }
  0xdf   : > { %842 = vmatmul.mubr.msk.f32.gmra.mrb[2].mxu1 %vm286_vm1, %v273_v22 }
  0xe2   : > { %v274_v23 = vpop.trf.xlu0 }
  0xe3   : > { %844 = vmatprep.mubr.msk.f32.mxu1 %vm286_vm1, %v274_v23 }
  0xe6   : > { %v275_v24 = vpop.trf.xlu0 }
  0xe7   : > { %845 = vmatmul.mubr.msk.f32.gmra.mrb[4].mxu1 %vm286_vm1, %v275_v24 }
  0xea   : > { %v276_v25 = vpop.trf.xlu0 }
  0xeb   : > { %847 = vmatprep.mubr.msk.f32.mxu1 %vm286_vm1, %v276_v25 }
  0xee   : > { %v277_v26 = vpop.trf.xlu0 }
  0xef   : > { %848 = vmatmul.mubr.msk.f32.gmra.mrb[6].mxu1 %vm286_vm1, %v277_v26 }
  0xf2   : > { %v278_v27 = vpop.trf.xlu0 }
  0xf3   : > { %850 = vmatprep.mubr.msk.f32.mxu1 %vm286_vm1, %v278_v27 }
  0xf6   : > { %v279_v28 = vpop.trf.xlu0 }
  0xf7   : > { %851 = vmatmul.mubr.msk.f32.gmra.mrb[8].mxu1 %vm286_vm1, %v279_v28 }
  0xfa   : > { %v280_v29 = vpop.trf.xlu0 }
  0xfb   : > { %853 = vmatprep.mubr.msk.f32.mxu1 %vm286_vm1, %v280_v29 }
  0xfe   : > { %v281_v30 = vpop.trf.xlu0 }
  0xff   : > { %854 = vmatmul.mubr.msk.f32.gmra.mrb[10].mxu1 %vm286_vm1, %v281_v30 }
 0x102   : > { %v282_v31 = vpop.trf.xlu0 }
 0x103   : > { %856 = vmatprep.mubr.msk.f32.mxu1 %vm286_vm1, %v282_v31 }
 0x106   : > { %v283_v32 = vpop.trf.xlu0 }
 0x107   : > { %857 = vmatmul.mubr.msk.f32.gmra.mrb[12].mxu1 %vm286_vm1, %v283_v32 }
 0x10a   : > { %v284_v33 = vpop.trf.xlu0 }
 0x10b   : > { %859 = vmatprep.mubr.msk.f32.mxu1 %vm286_vm1, %v284_v33 }
 0x10e   : > { %v285_v34 = vpop.trf.xlu0 }
 0x10f   : > { %860 = vmatmul.mubr.msk.f32.gmra.mrb[14].mxu1 %vm286_vm1, %v285_v34 }
 0x16a   : > { %v816_v36 = vpop.f32.mrb[0].mxu0 }
 0x16b   : > { %v459_v37 = vadd.f32 %v816_v36, %v997_v35  ;;  %v453_v38 = vpop.f32.mrb[1].mxu0 }
 0x16c   : > { %v454_v39 = vadd.f32 %v997_v35, %v453_v38 }
 0x16d   : > { %614 = vst.msk [vmem:[%s1002_s27 + $0x8] sm:$0xff] %vm612_vm2, %v459_v37 }
 0x16e   : > { %613 = vst.msk [vmem:[%s1002_s27] sm:$0xff] %vm612_vm2, %v454_v39 }
 0x172   : > { %v819_v40 = vpop.f32.mrb[2].mxu0 }
 0x173   : > { %v469_v41 = vadd.f32 %v819_v40, %v997_v35  ;;  %v463_v42 = vpop.f32.mrb[3].mxu0 }
 0x174   : > { %v464_v43 = vadd.f32 %v997_v35, %v463_v42 }
 0x175   : > { %616 = vst.msk [vmem:[%s1002_s27 + $0x18] sm:$0xff] %vm612_vm2, %v469_v41 }
 0x176   : > { %615 = vst.msk [vmem:[%s1002_s27 + $0x10] sm:$0xff] %vm612_vm2, %v464_v43 }
 0x17a   : > { %v822_v44 = vpop.f32.mrb[4].mxu0 }
 0x17b   : > { %v479_v45 = vadd.f32 %v822_v44, %v997_v35  ;;  %v473_v46 = vpop.f32.mrb[5].mxu0 }
 0x17c   : > { %v474_v47 = vadd.f32 %v997_v35, %v473_v46 }
 0x17d   : > { %618 = vst.msk [vmem:[%s1002_s27 + $0x28] sm:$0xff] %vm612_vm2, %v479_v45 }
 0x17e   : > { %617 = vst.msk [vmem:[%s1002_s27 + $0x20] sm:$0xff] %vm612_vm2, %v474_v47 }
 0x182   : > { %v825_v48 = vpop.f32.mrb[6].mxu0 }
 0x183   : > { %v489_v49 = vadd.f32 %v825_v48, %v997_v35  ;;  %v483_v50 = vpop.f32.mrb[7].mxu0 }
 0x184   : > { %v484_v51 = vadd.f32 %v997_v35, %v483_v50 }
 0x185   : > { %620 = vst.msk [vmem:[%s1002_s27 + $0x38] sm:$0xff] %vm612_vm2, %v489_v49 }
 0x186   : > { %619 = vst.msk [vmem:[%s1002_s27 + $0x30] sm:$0xff] %vm612_vm2, %v484_v51 }
 0x18a   : > { %v828_v52 = vpop.f32.mrb[8].mxu0 }
 0x18b   : > { %v499_v53 = vadd.f32 %v828_v52, %v997_v35  ;;  %v493_v54 = vpop.f32.mrb[9].mxu0 }
 0x18c   : > { %v494_v55 = vadd.f32 %v997_v35, %v493_v54 }
 0x18d   : > { %622 = vst.msk [vmem:[%s1002_s27 + $0x48] sm:$0xff] %vm612_vm2, %v499_v53 }
 0x18e   : > { %621 = vst.msk [vmem:[%s1002_s27 + $0x40] sm:$0xff] %vm612_vm2, %v494_v55 }
 0x192   : > { %v831_v56 = vpop.f32.mrb[10].mxu0 }
 0x193   : > { %v509_v57 = vadd.f32 %v831_v56, %v997_v35  ;;  %v503_v58 = vpop.f32.mrb[11].mxu0 }
 0x194   : > { %v504_v59 = vadd.f32 %v997_v35, %v503_v58 }
 0x195   : > { %624 = vst.msk [vmem:[%s1002_s27 + $0x58] sm:$0xff] %vm612_vm2, %v509_v57 }
 0x196   : > { %623 = vst.msk [vmem:[%s1002_s27 + $0x50] sm:$0xff] %vm612_vm2, %v504_v59 }
 0x19a   : > { %v834_v60 = vpop.f32.mrb[12].mxu0 }
 0x19b   : > { %v519_v61 = vadd.f32 %v834_v60, %v997_v35  ;;  %v513_v62 = vpop.f32.mrb[13].mxu0 }
 0x19c   : > { %v514_v63 = vadd.f32 %v997_v35, %v513_v62 }
 0x19d   : > { %626 = vst.msk [vmem:[%s1002_s27 + $0x68] sm:$0xff] %vm612_vm2, %v519_v61 }
 0x19e   : > { %625 = vst.msk [vmem:[%s1002_s27 + $0x60] sm:$0xff] %vm612_vm2, %v514_v63 }
 0x1a2   : > { %v837_v0 = vpop.f32.mrb[14].mxu0 }
 0x1a3   : > { %v529_v1 = vadd.f32 %v837_v0, %v997_v35  ;;  %v523_v2 = vpop.f32.mrb[15].mxu0 }
 0x1a4   : > { %v524_v3 = vadd.f32 %v997_v35, %v523_v2 }
 0x1a5   : > { %628 = vst.msk [vmem:[%s1002_s27 + $0x78] sm:$0xff] %vm612_vm2, %v529_v1 }
 0x1a6   : > { %627 = vst.msk [vmem:[%s1002_s27 + $0x70] sm:$0xff] %vm612_vm2, %v524_v3 }
 0x1aa   : > { %v840_v4 = vpop.f32.mrb[0].mxu1 }
 0x1ab   : > { %v539_v5 = vadd.f32 %v840_v4, %v997_v35  ;;  %v533_v6 = vpop.f32.mrb[1].mxu1 }
 0x1ac   : > { %v534_v7 = vadd.f32 %v997_v35, %v533_v6 }
 0x1ad   : > { %630 = vst.msk [vmem:[%s1002_s27 + $0x88] sm:$0xff] %vm612_vm2, %v539_v5 }
 0x1ae   : > { %629 = vst.msk [vmem:[%s1002_s27 + $0x80] sm:$0xff] %vm612_vm2, %v534_v7 }
 0x1b2   : > { %v843_v8 = vpop.f32.mrb[2].mxu1 }
 0x1b3   : > { %v549_v9 = vadd.f32 %v843_v8, %v997_v35  ;;  %v543_v10 = vpop.f32.mrb[3].mxu1 }
 0x1b4   : > { %v544_v11 = vadd.f32 %v997_v35, %v543_v10 }
 0x1b5   : > { %632 = vst.msk [vmem:[%s1002_s27 + $0x98] sm:$0xff] %vm612_vm2, %v549_v9 }
 0x1b6   : > { %631 = vst.msk [vmem:[%s1002_s27 + $0x90] sm:$0xff] %vm612_vm2, %v544_v11 }
 0x1ba   : > { %v846_v12 = vpop.f32.mrb[4].mxu1 }
 0x1bb   : > { %v559_v13 = vadd.f32 %v846_v12, %v997_v35  ;;  %v553_v14 = vpop.f32.mrb[5].mxu1 }
 0x1bc   : > { %v554_v15 = vadd.f32 %v997_v35, %v553_v14 }
 0x1bd   : > { %634 = vst.msk [vmem:[%s1002_s27 + $0xa8] sm:$0xff] %vm612_vm2, %v559_v13 }
 0x1be   : > { %633 = vst.msk [vmem:[%s1002_s27 + $0xa0] sm:$0xff] %vm612_vm2, %v554_v15 }
 0x1c2   : > { %v849_v16 = vpop.f32.mrb[6].mxu1 }
 0x1c3   : > { %v569_v17 = vadd.f32 %v849_v16, %v997_v35  ;;  %v563_v18 = vpop.f32.mrb[7].mxu1 }
 0x1c4   : > { %v564_v19 = vadd.f32 %v997_v35, %v563_v18 }
 0x1c5   : > { %636 = vst.msk [vmem:[%s1002_s27 + $0xb8] sm:$0xff] %vm612_vm2, %v569_v17 }
 0x1c6   : > { %635 = vst.msk [vmem:[%s1002_s27 + $0xb0] sm:$0xff] %vm612_vm2, %v564_v19 }
 0x1ca   : > { %v852_v20 = vpop.f32.mrb[8].mxu1 }
 0x1cb   : > { %v579_v21 = vadd.f32 %v852_v20, %v997_v35  ;;  %v573_v22 = vpop.f32.mrb[9].mxu1 }
 0x1cc   : > { %v574_v23 = vadd.f32 %v997_v35, %v573_v22 }
 0x1cd   : > { %638 = vst.msk [vmem:[%s1002_s27 + $0xc8] sm:$0xff] %vm612_vm2, %v579_v21 }
 0x1ce   : > { %637 = vst.msk [vmem:[%s1002_s27 + $0xc0] sm:$0xff] %vm612_vm2, %v574_v23 }
 0x1d2   : > { %v855_v24 = vpop.f32.mrb[10].mxu1 }
 0x1d3   : > { %v589_v25 = vadd.f32 %v855_v24, %v997_v35  ;;  %v583_v26 = vpop.f32.mrb[11].mxu1 }
 0x1d4   : > { %v584_v27 = vadd.f32 %v997_v35, %v583_v26 }
 0x1d5   : > { %640 = vst.msk [vmem:[%s1002_s27 + $0xd8] sm:$0xff] %vm612_vm2, %v589_v25 }
 0x1d6   : > { %639 = vst.msk [vmem:[%s1002_s27 + $0xd0] sm:$0xff] %vm612_vm2, %v584_v27 }
 0x1da   : > { %v858_v28 = vpop.f32.mrb[12].mxu1 }
 0x1db   : > { %v599_v29 = vadd.f32 %v858_v28, %v997_v35  ;;  %v593_v30 = vpop.f32.mrb[13].mxu1 }
 0x1dc   : > { %v594_v31 = vadd.f32 %v997_v35, %v593_v30 }
 0x1dd   : > { %642 = vst.msk [vmem:[%s1002_s27 + $0xe8] sm:$0xff] %vm612_vm2, %v599_v29 }
 0x1de   : > { %641 = vst.msk [vmem:[%s1002_s27 + $0xe0] sm:$0xff] %vm612_vm2, %v594_v31 }
 0x1e2   : > { %v861_v32 = vpop.f32.mrb[14].mxu1 }
 0x1e3   : > { %v609_v33 = vadd.f32 %v861_v32, %v997_v35  ;;  %v603_v34 = vpop.f32.mrb[15].mxu1 }
 0x1e4   : > { %v604_v36 = vadd.f32 %v997_v35, %v603_v34 }
 0x1e5   : > { %644 = vst.msk [vmem:[%s1002_s27 + $0xf8] sm:$0xff] %vm612_vm2, %v609_v33 }
 0x1e6   : > { %643 = vst.msk [vmem:[%s1002_s27 + $0xf0] sm:$0xff] %vm612_vm2, %v604_v36 }
 0x1e7 PF: > { %s13_s14 = sadd.s32 1, %s912_s14   ;;  %s1113_s12 = smov %s908_s13 }
 0x1e8   : > { %p10_p5 = scmp.ge.s32.totalorder %s13_s14, 4   ;;  %s1114_s13 = smov %s1116_s15 }
 0x1ea   :  { %12 = sbr.rel (!%p10_p5) target bundleno = 2 (0x2), region = 62 }

// kernel: local_attention_forward.6
= control target key start
LH: loop header
LB: loop body
LE: loop exit
PB: predicated region body
PF: predicated region fallthrough
CT: control target
= control target key end

     0   :  { %s1398_s6 = smov 0   ;;  %s2412_s0 = inlined_call_operand.vmem [shape: f32[2,16,16,16], index: 0, kind: input, shape index: {}]   ;;  %s2413_s1 = inlined_call_operand.vmem [shape: f32[2,4,4,16], index: 1, kind: output, shape index: {}]  }
   0x1 LB: > { %s1251_s7 = sadd.s32 4294967295, %s1386_s6   ;;  %p1255_p0 = scmp.ge.s32.totalorder %s1386_s6, 1  ;;  %s1386_s6 = sphi %s1398_s6, %s11_s6  }
   0x2   : > { %p87_p1 = scmp.lt.s32.totalorder %s1386_s6, 3 }
   0x4   : > { %p88_p2 = pnand %p1255_p0, %p87_p1 }
   0x6   : > { %91 = sbr.rel (%p88_p2) target bundleno = 265 (0x109), region = 24 }
   0xd   : > { %p107_p3 = scmp.lt.s32.totalorder %s1251_s7, 1  ;;  %vm245_vm0 = vcmask 129024   ;;  %vm302_vm1 = vcmask 1044480   ;;  %vm286_vm2 = vcmask 122880   ;;  %vm414_vm3 = vcmask 1041408  }
   0xf   : > { %s2458_s7 = smov (!%p107_p3, %s1251_s7), 1 }
  0x10   : > { %s1274_s8 = sshll.u32 %s2458_s7, 8  ;;  %s1275_s12 = sshll.u32 %s2458_s7, 4 }
  0x11   : > { %s1412_s11 = scalar_lea.vmem %s2412_s0, %s1274_s8  ;;  %s1721_s15 = scalar_lea.vmem %s2413_s1, %s1275_s12 }
  0x12   : > { %v117_v0 = vld [vmem:[%s1412_s11] sm:$0xff]  ;;  %v119_v1 = vld [vmem:[%s1412_s11 + $0x10] sm:$0xff]  ;;  %v1439_v14 = vld [vmem:[%s1412_s11 + $0x8] sm:$0xff] }
  0x13   : > { %v1417_v2 = vld [vmem:[%s1412_s11 + $0x20] sm:$0xff]  ;;  %v1420_v3 = vld [vmem:[%s1412_s11 + $0x30] sm:$0xff]  ;;  %v149_v6 = vmul.f32 1.442695, %v117_v0  ;;  %v153_v8 = vmul.f32 1.442695, %v119_v1 }
  0x14   : > { %v1423_v4 = vld [vmem:[%s1412_s11 + $0x40] sm:$0xff]  ;;  %v1426_v5 = vld [vmem:[%s1412_s11 + $0x50] sm:$0xff]  ;;  %v157_v9 = vmul.f32 1.442695, %v1417_v2  ;;  %v161_v11 = vmul.f32 1.442695, %v1420_v3 }
  0x15   : > { %v1429_v7 = vld [vmem:[%s1412_s11 + $0x60] sm:$0xff]  ;;  %v1433_v10 = vld [vmem:[%s1412_s11 + $0x70] sm:$0xff]  ;;  %1284 = vpow2.f32 %v149_v6  ;;  %v165_v12 = vmul.f32 1.442695, %v1423_v4  ;;  %v169_v13 = vmul.f32 1.442695, %v1426_v5 }
  0x16   : > { %1286 = vpow2.f32 %v153_v8  ;;  %v173_v15 = vmul.f32 1.442695, %v1429_v7  ;;  %v1443_v16 = vld [vmem:[%s1412_s11 + $0x18] sm:$0xff]  ;;  %v177_v17 = vmul.f32 1.442695, %v1433_v10  ;;  %v1447_v18 = vld [vmem:[%s1412_s11 + $0x28] sm:$0xff] }
  0x17   : > { %1288 = vpow2.f32 %v157_v9  ;;  %v1450_v19 = vld [vmem:[%s1412_s11 + $0x38] sm:$0xff]  ;;  %v1453_v20 = vld [vmem:[%s1412_s11 + $0x48] sm:$0xff]  ;;  %v151_v22 = vmul.f32 1.442695, %v1439_v14  ;;  %v155_v25 = vmul.f32 1.442695, %v1443_v16 }
  0x18   : > { %1290 = vpow2.f32 %v161_v11  ;;  %v1456_v21 = vld [vmem:[%s1412_s11 + $0x58] sm:$0xff]  ;;  %v1460_v23 = vld [vmem:[%s1412_s11 + $0x68] sm:$0xff]  ;;  %v159_v26 = vmul.f32 1.442695, %v1447_v18  ;;  %v163_v27 = vmul.f32 1.442695, %v1450_v19 }
  0x19   : > { %1292 = vpow2.f32 %v165_v12  ;;  %v1463_v24 = vld [vmem:[%s1412_s11 + $0x78] sm:$0xff]  ;;  %v1469_v28 = vld [vmem:[%s1412_s11 + $0x80] sm:$0xff]  ;;  %v1472_v29 = vld [vmem:[%s1412_s11 + $0x90] sm:$0xff]  ;;  %v167_v30 = vmul.f32 1.442695, %v1453_v20 }
  0x1a   : > { %1294 = vpow2.f32 %v169_v13  ;;  %2423 = vst [vmem:[#allocation2_spill] sm:$0xff] %v1469_v28  ;;  %2424 = vst [vmem:[#allocation3_spill] sm:$0xff] %v1472_v29  ;;  %v171_v31 = vmul.f32 1.442695, %v1456_v21  ;;  %v1477_v32 = vld [vmem:[%s1412_s11 + $0xa0] sm:$0xff]  ;;  %v1483_v34 = vld [vmem:[%s1412_s11 + $0x88] sm:$0xff] }
  0x1b   : > { %1296 = vpow2.f32 %v173_v15  ;;  %2425 = vst [vmem:[#allocation4_spill] sm:$0xff] %v1477_v32  ;;  %v1480_v33 = vmul.f32 1.442695, %v1460_v23  ;;  %2426 = vst [vmem:[#allocation5_spill] sm:$0xff] %v1483_v34  ;;  %v1486_v35 = vld [vmem:[%s1412_s11 + $0x98] sm:$0xff]  ;;  %v1489_v36 = vld [vmem:[%s1412_s11 + $0xa8] sm:$0xff] }
  0x1c   : > { %1298 = vpow2.f32 %v177_v17  ;;  %2427 = vst [vmem:[#allocation6_spill] sm:$0xff] %v1486_v35  ;;  %2428 = vst [vmem:[#allocation7_spill] sm:$0xff] %v1489_v36  ;;  %v1492_v37 = vmul.f32 1.442695, %v1463_v24  ;;  %v1495_v38 = vmul.f32 1.442695, %v1469_v28 }
  0x1d   : > { %1300 = vpow2.f32 %v151_v22  ;;  %v1498_v39 = vmul.f32 1.442695, %v1472_v29  ;;  %v1503_v41 = vmul.f32 1.442695, %v1477_v32  ;;  %v1506_v42 = vmul.f32 1.442695, %v1483_v34 }
  0x1e   : > { %1302 = vpow2.f32 %v155_v25  ;;  %v1509_v43 = vmul.f32 1.442695, %v1486_v35  ;;  %v1519_v47 = vmul.f32 1.442695, %v1489_v36 }
  0x1f   : > { %v1500_v40 = vpop.eup %1284  ;;  %1304 = vpow2.f32 %v159_v26  ;;  %2429 = vst [vmem:[#allocation8_spill] sm:$0xff] %v1506_v42 }
  0x20   : > { %2430 = vst [vmem:[#allocation9_spill] sm:$0xff] %v1509_v43  ;;  %v1511_v44 = vpop.eup %1286  ;;  %v1514_v45 = vmul.f32 %v1500_v40, %v117_v0  ;;  %v265_v46 = vsel %vm245_vm0, %v1500_v40, 0.0  ;;  %1306 = vpow2.f32 %v163_v27  ;;  %2431 = vst [vmem:[#allocation10_spill] sm:$0xff] %v1519_v47 }
  0x21   : > { %v1521_v48 = vpop.eup %1288  ;;  %v1524_v49 = vmul.f32 %v1511_v44, %v119_v1  ;;  %v266_v50 = vsel %vm245_vm0, %v1511_v44, 0.0  ;;  %1308 = vpow2.f32 %v167_v30 }
  0x22   : > { %v1529_v52 = vpop.eup %1290  ;;  %v1533_v53 = vmul.f32 %v1521_v48, %v1417_v2  ;;  %v246_v54 = vsel %vm245_vm0, %v1514_v45, 0.0  ;;  %v267_v55 = vadd.f32 %v266_v50, %v265_v46  ;;  %v268_v56 = vsel %vm245_vm0, %v1521_v48, 0.0 }
  0x23   : > { %v1539_v57 = vpop.eup %1292  ;;  %v1543_v58 = vmul.f32 %v1529_v52, %v1420_v3  ;;  %v247_v59 = vsel %vm245_vm0, %v1524_v49, 0.0  ;;  %v270_v60 = vsel %vm245_vm0, %v1529_v52, 0.0  ;;  %1310 = vpow2.f32 %v171_v31 }
  0x24   : > { %v1549_v61 = vpop.eup %1294  ;;  %v1553_v62 = vmul.f32 %v1539_v57, %v1423_v4  ;;  %v248_v63 = vadd.f32 %v247_v59, %v246_v54  ;;  %v249_v0 = vsel %vm245_vm0, %v1533_v53, 0.0  ;;  %v269_v1 = vadd.f32 %v268_v56, %v267_v55 }
  0x25   : > { %v1557_v2 = vpop.eup %1296  ;;  %v1561_v3 = vmul.f32 %v1549_v61, %v1426_v5  ;;  %v251_v6 = vsel %vm245_vm0, %v1543_v58, 0.0  ;;  %v272_v8 = vsel %vm245_vm0, %v1539_v57, 0.0  ;;  %v274_v4 = vsel %vm245_vm0, %v1549_v61, 0.0 }
  0x26   : > { %v1569_v9 = vpop.eup %1298  ;;  %v1573_v11 = vmul.f32 %v1557_v2, %v1429_v7  ;;  %v250_v12 = vadd.f32 %v249_v0, %v248_v63  ;;  %v253_v5 = vsel %vm245_vm0, %v1553_v62, 0.0  ;;  %v271_v13 = vadd.f32 %v270_v60, %v269_v1 }
  0x27   : > { %v1577_v15 = vpop.eup %1300  ;;  %v1581_v17 = vmul.f32 %v1569_v9, %v1433_v10  ;;  %v255_v22 = vsel %vm245_vm0, %v1561_v3, 0.0  ;;  %v276_v25 = vsel %vm245_vm0, %v1557_v2, 0.0  ;;  %v581_v26 = vadd.f32 %v253_v5, %v251_v6 }
  0x28   : > { %v1587_v7 = vpop.eup %1302  ;;  %v252_v27 = vadd.f32 %v251_v6, %v250_v12  ;;  %v257_v30 = vsel %vm245_vm0, %v1573_v11, 0.0  ;;  %v273_v31 = vadd.f32 %v272_v8, %v271_v13  ;;  %v596_v46 = vadd.f32 %v272_v8, %v270_v60 }
  0x29   : > { %v1591_v50 = vpop.eup %1304  ;;  %v582_v10 = vadd.f32 %v581_v26, %v255_v22  ;;  %v1595_v54 = vsel %vm245_vm0, %v1581_v17, 0.0  ;;  %v1599_v55 = vsel %vm245_vm0, %v1569_v9, 0.0  ;;  %1312 = vpow2.f32 %v1480_v33 }
  0x2a   : > { %2432 = vst [vmem:[#allocation11_spill] sm:$0xff] %v1595_v54  ;;  %2433 = vst [vmem:[#allocation12_spill] sm:$0xff] %v1599_v55  ;;  %v1602_v56 = vpop.eup %1306  ;;  %v254_v59 = vadd.f32 %v253_v5, %v252_v27  ;;  %v275_v63 = vadd.f32 %v274_v4, %v273_v31  ;;  %v597_v0 = vadd.f32 %v596_v46, %v274_v4  ;;  %1314 = vpow2.f32 %v1492_v37 }
  0x2b   : > { %v1605_v60 = vadd.f32 %v1595_v54, %v257_v30  ;;  %v1607_v1 = vpop.eup %1308  ;;  %v1609_v6 = vadd.f32 %v582_v10, %v257_v30  ;;  %v1612_v8 = vadd.f32 %v1599_v55, %v276_v25  ;;  %v1617_v33 = vmul.f32 %v1577_v15, %v1439_v14 }
  0x2c   : > { %v256_v12 = vadd.f32 %v255_v22, %v254_v59  ;;  %v277_v5 = vadd.f32 %v276_v25, %v275_v63  ;;  %v1619_v13 = vadd.f32 %v597_v0, %v276_v25  ;;  %v1623_v4 = vmul.f32 %v1587_v7, %v1443_v16 }
  0x2d   : > { %2434 = vst [vmem:[#allocation13_spill] sm:$0xff] %v1605_v60  ;;  %2435 = vst [vmem:[#allocation14_spill] sm:$0xff] %v1609_v6  ;;  %v1625_v26 = vpop.eup %1310  ;;  %v1629_v27 = vmul.f32 %v1591_v50, %v1447_v18  ;;  %v1633_v37 = vmul.f32 %v1602_v56, %v1450_v19  ;;  %v1637_v14 = vmul.f32 %v1607_v1, %v1453_v20  ;;  %v303_v22 = vrot.slane %v1514_v45, 3 }
  0x2e   : > { %2436 = vst [vmem:[#allocation15_spill] sm:$0xff] %v1612_v8  ;;  %2437 = vst [vmem:[#allocation16_spill] sm:$0xff] %v1619_v13  ;;  %v258_v25 = vadd.f32 %v257_v30, %v256_v12  ;;  %v278_v31 = vrot.slane %v277_v5, 4  ;;  %v1642_v16 = vmul.f32 %v1625_v26, %v1456_v21  ;;  %v304_v46 = vrot.slane %v1617_v33, 3 }
  0x2f   : > { %v306_v18 = vrot.slane %v1524_v49, 3  ;;  %v307_v10 = vrot.slane %v1623_v4, 3  ;;  %v309_v19 = vrot.slane %v1533_v53, 3  ;;  %v310_v59 = vrot.slane %v1629_v27, 3 }
  0x30   : > { %v259_v20 = vrot.slane %v258_v25, 4  ;;  %v279_v63 = vadd.f32 %v278_v31, %v277_v5  ;;  %v305_v0 = vsel %vm302_vm1, %v303_v22, %v304_v46  ;;  %v312_v30 = vrot.slane %v1543_v58, 3 }
  0x31   : > { %v308_v12 = vsel %vm302_vm1, %v306_v18, %v307_v10  ;;  %v311_v21 = vsel %vm302_vm1, %v309_v19, %v310_v59  ;;  %v313_v51 = vrot.slane %v1633_v37, 3  ;;  %v315_v36 = vrot.slane %v1553_v62, 3 }
  0x32   : > { %v260_v35 = vadd.f32 %v259_v20, %v258_v25  ;;  %v280_v34 = vrot.slane %v279_v63, 2  ;;  %v316_v32 = vrot.slane %v1637_v14, 3  ;;  %v318_v60 = vrot.slane %v1561_v3, 3 }
  0x33   : > { %v1657_v29 = vpop.eup %1312  ;;  %v314_v5 = vsel %vm302_vm1, %v312_v30, %v313_v51  ;;  %v319_v22 = vrot.slane %v1642_v16, 3  ;;  %v321_v31 = vrot.slane %v1573_v11, 3  ;;  %v331_v46 = vsel %vm245_vm0, %v305_v0, 0.0 }
  0x34   : > { %v261_v18 = vrot.slane %v260_v35, 2  ;;  %v281_v10 = vadd.f32 %v280_v34, %v279_v63  ;;  %v1665_v25 = vmul.f32 %v1657_v29, %v1460_v23  ;;  %v317_v19 = vsel %vm302_vm1, %v315_v36, %v316_v32  ;;  %v1668_v59 = vpop.eup %1314 }
  0x35   : > { %v320_v20 = vsel %vm302_vm1, %v318_v60, %v319_v22  ;;  %v332_v51 = vsel %vm245_vm0, %v308_v12, 0.0  ;;  %v334_v30 = vsel %vm245_vm0, %v311_v21, 0.0  ;;  %v367_v8 = vrot.slane %v1511_v44, 3 }
  0x36   : > { %v262_v28 = vadd.f32 %v261_v18, %v260_v35  ;;  %v282_v0 = vrot.slane %v281_v10, 1  ;;  %v322_v34 = vrot.slane %v1665_v25, 3  ;;  %v336_v63 = vsel %vm245_vm0, %v314_v5, 0.0 }
  0x37   : > { %v1678_v23 = vmul.f32 %v1668_v59, %v1463_v24  ;;  %v333_v32 = vadd.f32 %v332_v51, %v331_v46  ;;  %v338_v36 = vsel %vm245_vm0, %v317_v19, 0.0  ;;  %v365_v60 = vrot.slane %v1577_v15, 3 }
  0x38   : > { %v283_v12 = vadd.f32 %v282_v0, %v281_v10  ;;  %v323_v21 = vsel %vm302_vm1, %v321_v31, %v322_v34  ;;  %v340_v22 = vsel %vm245_vm0, %v320_v20, 0.0  ;;  %v368_v35 = vrot.slane %v1587_v7, 3 }
  0x39   : > { %v263_v18 = vrot.slane %v262_v28, 1  ;;  %v335_v47 = vadd.f32 %v334_v30, %v333_v32  ;;  %v342_v5 = vsel %vm245_vm0, %v323_v21, 0.0  ;;  %v370_v43 = vrot.slane %v1521_v48, 3 }
  0x3a   : > { %1316 = vrcp.f32 %v283_v12  ;;  %v2438_v24 = vrot.slane %v1500_v40, 3  ;;  %v369_v19 = vsel %vm302_vm1, %v367_v8, %v368_v35  ;;  %v371_v10 = vrot.slane %v1591_v50, 3 }
  0x3b   : > { %v337_v31 = vadd.f32 %v336_v63, %v335_v47  ;;  %v373_v20 = vrot.slane %v1529_v52, 3  ;;  %v374_v51 = vrot.slane %v1602_v56, 3  ;;  %v376_v30 = vrot.slane %v1539_v57, 3 }
  0x3c   : > { %v366_v46 = vsel %vm302_vm1, %v2438_v24, %v365_v60  ;;  %v372_v0 = vsel %vm302_vm1, %v370_v43, %v371_v10  ;;  %v377_v34 = vrot.slane %v1607_v1, 3  ;;  %v379_v32 = vrot.slane %v1549_v61, 3 }
  0x3d   : > { %v380_v60 = vrot.slane %v1625_v26, 3  ;;  %v339_v12 = vadd.f32 %v338_v36, %v337_v31  ;;  %v375_v8 = vsel %vm302_vm1, %v373_v20, %v374_v51  ;;  %v382_v47 = vrot.slane %v1557_v2, 3 }
  0x3e   : > { %v383_v21 = vrot.slane %v1657_v29, 3  ;;  %v378_v35 = vsel %vm302_vm1, %v376_v30, %v377_v34  ;;  %v392_v43 = vsel %vm245_vm0, %v366_v46, 0.0  ;;  %v393_v10 = vsel %vm245_vm0, %v369_v19, 0.0 }
  0x3f   : > { %v381_v24 = vsel %vm302_vm1, %v379_v32, %v380_v60  ;;  %v264_v42 = vadd.f32 %v263_v18, %v262_v28  ;;  %v341_v55 = vadd.f32 %v340_v22, %v339_v12  ;;  %v394_v13 = vadd.f32 %v393_v10, %v392_v43 }
  0x40   : > { %v395_v31 = vsel %vm245_vm0, %v372_v0, 0.0  ;;  %v384_v54 = vsel %vm302_vm1, %v382_v47, %v383_v21  ;;  %v397_v20 = vsel %vm245_vm0, %v375_v8, 0.0  ;;  %v399_v51 = vsel %vm245_vm0, %v378_v35, 0.0 }
  0x41   : > { %v401_v6 = vsel %vm245_vm0, %v381_v24, 0.0  ;;  %v343_v30 = vadd.f32 %v342_v5, %v341_v55  ;;  %v396_v34 = vadd.f32 %v395_v31, %v394_v13  ;;  %v621_v46 = vrot.slane %v1581_v17, 3 }
  0x42   : > { %v622_v19 = vrot.slane %v1678_v23, 3  ;;  %v633_v28 = vadd.f32 %v338_v36, %v336_v63  ;;  %v654_v18 = vrot.slane %v1569_v9, 3  ;;  %v655_v0 = vrot.slane %v1668_v59, 3 }
  0x43   : > { %v666_v32 = vadd.f32 %v399_v51, %v397_v20  ;;  %v344_v60 = vrot.slane %v343_v30, 4  ;;  %v398_v12 = vadd.f32 %v397_v20, %v396_v34  ;;  %v403_v8 = vsel %vm245_vm0, %v384_v54, 0.0 }
  0x44   : > { %v623_v47 = vsel %vm302_vm1, %v621_v46, %v622_v19  ;;  %v1317_v21 = vpop.eup %1316  ;;  %v634_v55 = vadd.f32 %v633_v28, %v340_v22  ;;  %v656_v63 = vsel %vm302_vm1, %v654_v18, %v655_v0  ;;  %v415_v22 = vrot.slane %v1514_v45, 6 }
  0x45   : > { %v1724_v13 = vsel %vm245_vm0, %v623_v47, 0.0  ;;  %v667_v36 = vadd.f32 %v666_v32, %v401_v6  ;;  %v285_v35 = vmul.f32 %v1317_v21, %v264_v42  ;;  %v345_v24 = vadd.f32 %v344_v60, %v343_v30 }
  0x46   : > { %v400_v43 = vadd.f32 %v399_v51, %v398_v12  ;;  %v1728_v54 = vsel %vm245_vm0, %v656_v63, 0.0  ;;  %v1730_v10 = vadd.f32 %v634_v55, %v342_v5  ;;  %v1733_v31 = vadd.f32 %v1724_v13, %v342_v5 }
  0x47   : > { %v1736_v20 = vadd.f32 %v1728_v54, %v403_v8  ;;  %287 = vst.msk [vmem:[%s1721_s15] sm:$0x1] %vm286_vm2, %v285_v35  ;;  %v346_v34 = vrot.slane %v345_v24, 2  ;;  %v416_v42 = vrot.slane %v1617_v33, 6  ;;  %v418_v51 = vrot.slane %v1524_v49, 6 }
  0x48   : > { %v402_v46 = vadd.f32 %v401_v6, %v400_v43  ;;  %v419_v30 = vrot.slane %v1623_v4, 6  ;;  %v421_v19 = vrot.slane %v1533_v53, 6  ;;  %v422_v5 = vrot.slane %v1629_v27, 6 }
  0x49   : > { %v424_v28 = vrot.slane %v1543_v58, 6  ;;  %v1747_v18 = vadd.f32 %v346_v34, %v345_v24  ;;  %v1749_v45 = vadd.f32 %v667_v36, %v403_v8  ;;  %v425_v32 = vrot.slane %v1633_v37, 6 }
  0x4a   : > { %v404_v0 = vadd.f32 %v403_v8, %v402_v46  ;;  %v417_v6 = vsel %vm414_vm3, %v415_v22, %v416_v42  ;;  %v420_v60 = vsel %vm414_vm3, %v418_v51, %v419_v30  ;;  %v427_v49 = vrot.slane %v1553_v62, 6 }
  0x4b   : > { %v428_v12 = vrot.slane %v1637_v14, 6  ;;  %v423_v47 = vsel %vm414_vm3, %v421_v19, %v422_v5  ;;  %v426_v58 = vsel %vm414_vm3, %v424_v28, %v425_v32  ;;  %v430_v21 = vrot.slane %v1561_v3, 6 }
  0x4c   : > { %v405_v53 = vrot.slane %v404_v0, 4  ;;  %v431_v55 = vrot.slane %v1642_v16, 6  ;;  %v433_v63 = vrot.slane %v1573_v11, 6  ;;  %v434_v36 = vrot.slane %v1665_v25, 6 }
  0x4d   : > { %v429_v8 = vsel %vm414_vm3, %v427_v49, %v428_v12  ;;  %v348_v35 = vrot.slane %v1747_v18, 1  ;;  %v443_v24 = vsel %vm245_vm0, %v417_v6, 0.0  ;;  %v444_v43 = vsel %vm245_vm0, %v420_v60, 0.0 }
  0x4e   : > { %v406_v62 = vadd.f32 %v405_v53, %v404_v0  ;;  %v432_v22 = vsel %vm414_vm3, %v430_v21, %v431_v55  ;;  %v435_v34 = vsel %vm414_vm3, %v433_v63, %v434_v36  ;;  %v445_v3 = vadd.f32 %v444_v43, %v443_v24 }
  0x4f   : > { %v446_v46 = vsel %vm245_vm0, %v423_v47, 0.0  ;;  %v448_v51 = vsel %vm245_vm0, %v426_v58, 0.0  ;;  %v450_v11 = vsel %vm245_vm0, %v429_v8, 0.0  ;;  %v452_v30 = vsel %vm245_vm0, %v432_v22, 0.0 }
  0x50   : > { %v407_v42 = vrot.slane %v406_v62, 2  ;;  %v447_v19 = vadd.f32 %v446_v46, %v445_v3  ;;  %v454_v5 = vsel %vm245_vm0, %v435_v34, 0.0  ;;  %v462_v28 = vrot.slane %v1500_v40, 6 }
  0x51   : > { %v463_v0 = vrot.slane %v1577_v15, 6  ;;  %v465_v6 = vrot.slane %v1511_v44, 6  ;;  %v466_v60 = vrot.slane %v1587_v7, 6  ;;  %v468_v49 = vrot.slane %v1521_v48, 6 }
  0x52   : > { %v408_v32 = vadd.f32 %v407_v42, %v406_v62  ;;  %v449_v12 = vadd.f32 %v448_v51, %v447_v19  ;;  %v469_v47 = vrot.slane %v1591_v50, 6  ;;  %v471_v58 = vrot.slane %v1529_v52, 6 }
  0x53   : > { %v464_v53 = vsel %vm414_vm3, %v462_v28, %v463_v0  ;;  %v467_v8 = vsel %vm414_vm3, %v465_v6, %v466_v60  ;;  %v472_v40 = vrot.slane %v1602_v56, 6  ;;  %v474_v55 = vrot.slane %v1539_v57, 6 }
  0x54   : > { %v409_v21 = vrot.slane %v408_v32, 1  ;;  %v451_v63 = vadd.f32 %v450_v11, %v449_v12  ;;  %v470_v44 = vsel %vm414_vm3, %v468_v49, %v469_v47  ;;  %v475_v36 = vrot.slane %v1607_v1, 6 }
  0x55   : > { %v477_v48 = vrot.slane %v1549_v61, 6  ;;  %v473_v24 = vsel %vm414_vm3, %v471_v58, %v472_v40  ;;  %v478_v43 = vrot.slane %v1625_v26, 6  ;;  %v480_v52 = vrot.slane %v1557_v2, 6 }
  0x56   : > { %v410_v62 = vadd.f32 %v409_v21, %v408_v32  ;;  %v453_v22 = vadd.f32 %v452_v30, %v451_v63  ;;  %v476_v34 = vsel %vm414_vm3, %v474_v55, %v475_v36  ;;  %v481_v3 = vrot.slane %v1657_v29, 6 }
  0x57   : > { %v490_v57 = vsel %vm245_vm0, %v464_v53, 0.0  ;;  %v479_v46 = vsel %vm414_vm3, %v477_v48, %v478_v43  ;;  %v491_v42 = vsel %vm245_vm0, %v467_v8, 0.0  ;;  %v493_v61 = vsel %vm245_vm0, %v470_v44, 0.0 }
  0x58   : > { %1318 = vrcp.f32 %v410_v62  ;;  %v455_v19 = vadd.f32 %v454_v5, %v453_v22  ;;  %v482_v28 = vsel %vm414_vm3, %v480_v52, %v481_v3  ;;  %v492_v0 = vadd.f32 %v491_v42, %v490_v57 }
  0x59   : > { %v495_v2 = vsel %vm245_vm0, %v473_v24, 0.0  ;;  %v349_v32 = vadd.f32 %v348_v35, %v1747_v18  ;;  %v497_v6 = vsel %vm245_vm0, %v476_v34, 0.0  ;;  %v499_v60 = vsel %vm245_vm0, %v479_v46, 0.0 }
  0x5a   : > { %v684_v49 = vrot.slane %v1581_v17, 6  ;;  %v456_v12 = vrot.slane %v455_v19, 4  ;;  %v494_v53 = vadd.f32 %v493_v61, %v492_v0  ;;  %v685_v47 = vrot.slane %v1678_v23, 6 }
  0x5b   : > { %v696_v58 = vadd.f32 %v450_v11, %v448_v51  ;;  %v501_v21 = vsel %vm245_vm0, %v482_v28, 0.0  ;;  %v711_v8 = vrot.slane %v1569_v9, 6  ;;  %v712_v40 = vrot.slane %v1668_v59, 6 }
  0x5c   : > { %v723_v55 = vadd.f32 %v497_v6, %v495_v2  ;;  %v457_v63 = vadd.f32 %v456_v12, %v455_v19  ;;  %v496_v18 = vadd.f32 %v495_v2, %v494_v53  ;;  %v686_v35 = vsel %vm414_vm3, %v684_v49, %v685_v47 }
  0x5d   : > { %v697_v44 = vadd.f32 %v696_v58, %v452_v30  ;;  %v1808_v36 = vsel %vm245_vm0, %v686_v35, 0.0  ;;  %v713_v17 = vsel %vm414_vm3, %v711_v8, %v712_v40  ;;  %v512_v48 = vrot.slane %v1617_v33, 1 }
  0x5e   : > { %v513_v51 = vrot.slane %v1623_v4, 1  ;;  %v458_v11 = vrot.slane %v457_v63, 2  ;;  %v498_v62 = vadd.f32 %v497_v6, %v496_v18  ;;  %v724_v9 = vadd.f32 %v723_v55, %v499_v60 }
  0x5f   : > { %v1814_v24 = vsel %vm245_vm0, %v713_v17, 0.0  ;;  %v1816_v43 = vadd.f32 %v697_v44, %v454_v5  ;;  %v1819_v52 = vadd.f32 %v1808_v36, %v454_v5  ;;  %v514_v22 = vrot.slane %v1629_v27, 1 }
  0x60   : > { %v1822_v30 = vadd.f32 %v1814_v24, %v501_v21  ;;  %v1825_v34 = vadd.f32 %v458_v11, %v457_v63  ;;  %v500_v33 = vadd.f32 %v499_v60, %v498_v62  ;;  %v515_v4 = vrot.slane %v1633_v37, 1 }
  0x61   : > { %v516_v3 = vrot.slane %v1637_v14, 1  ;;  %v517_v46 = vrot.slane %v1642_v16, 1  ;;  %v518_v42 = vrot.slane %v1665_v25, 1  ;;  %v526_v5 = vsel %vm245_vm0, %v512_v48, 0.0 }
  0x62   : > { %v1319_v57 = vpop.eup %1318  ;;  %v527_v61 = vsel %vm245_vm0, %v513_v51, 0.0  ;;  %v502_v28 = vadd.f32 %v501_v21, %v500_v33  ;;  %v1833_v27 = vadd.f32 %v724_v9, %v501_v21  ;;  %v460_v2 = vrot.slane %v1825_v34, 1 }
  0x63   : > { %v412_v19 = vmul.f32 %v1319_v57, %v349_v32  ;;  %v528_v0 = vadd.f32 %v527_v61, %v526_v5  ;;  %v529_v37 = vsel %vm245_vm0, %v514_v22, 0.0  ;;  %v531_v14 = vsel %vm245_vm0, %v515_v4, 0.0 }
  0x64   : > { %v533_v6 = vsel %vm245_vm0, %v516_v3, 0.0  ;;  %v503_v16 = vrot.slane %v502_v28, 4  ;;  %v535_v60 = vsel %vm245_vm0, %v517_v46, 0.0  ;;  %v537_v32 = vsel %vm245_vm0, %v518_v42, 0.0 }
  0x65   : > { %413 = vst.msk [vmem:[%s1721_s15 + $0x1] sm:$0x1] %vm286_vm2, %v412_v19  ;;  %v530_v25 = vadd.f32 %v529_v37, %v528_v0  ;;  %v545_v49 = vrot.slane %v1577_v15, 1  ;;  %v546_v12 = vrot.slane %v1587_v7, 1  ;;  %v547_v53 = vrot.slane %v1591_v50, 1  ;;  %v2440_v37 = vld [vmem:[#allocation11_spill] sm:$0xff] }
  0x66   : > { %v548_v47 = vrot.slane %v1602_v56, 1  ;;  %v504_v58 = vadd.f32 %v503_v16, %v502_v28  ;;  %v549_v8 = vrot.slane %v1607_v1, 1  ;;  %v550_v40 = vrot.slane %v1625_v26, 1 }
  0x67   : > { %v532_v21 = vadd.f32 %v531_v14, %v530_v25  ;;  %v551_v55 = vrot.slane %v1657_v29, 1  ;;  %v559_v63 = vsel %vm245_vm0, %v545_v49, 0.0  ;;  %v560_v18 = vsel %vm245_vm0, %v546_v12, 0.0  ;;  %v2441_v25 = vld [vmem:[#allocation16_spill] sm:$0xff] }
  0x68   : > { %v562_v15 = vsel %vm245_vm0, %v547_v53, 0.0  ;;  %v505_v35 = vrot.slane %v504_v58, 2  ;;  %v561_v44 = vadd.f32 %v560_v18, %v559_v63  ;;  %v564_v50 = vsel %vm245_vm0, %v548_v47, 0.0  ;;  %v1873_v49 = vld [vmem:[%s1412_s11 + $0xb0] sm:$0xff] }
  0x69   : > { %v534_v7 = vadd.f32 %v533_v6, %v532_v21  ;;  %v566_v56 = vsel %vm245_vm0, %v549_v8, 0.0  ;;  %v568_v17 = vsel %vm245_vm0, %v550_v40, 0.0  ;;  %v570_v1 = vsel %vm245_vm0, %v551_v55, 0.0  ;;  %v2443_v12 = vld [vmem:[#allocation8_spill] sm:$0xff]  ;;  %v1887_v8 = vld [vmem:[%s1412_s11 + $0xc0] sm:$0xff]  ;;  %v1890_v40 = vld [vmem:[%s1412_s11 + $0xb8] sm:$0xff] }
  0x6a   : > { %v741_v26 = vrot.slane %v1678_v23, 1  ;;  %v506_v29 = vadd.f32 %v505_v35, %v504_v58  ;;  %v563_v51 = vadd.f32 %v562_v15, %v561_v44  ;;  %v747_v11 = vadd.f32 %v533_v6, %v531_v14  ;;  %v2444_v58 = vld [vmem:[#allocation9_spill] sm:$0xff]  ;;  %v1893_v55 = vld [vmem:[%s1412_s11 + $0xc8] sm:$0xff] }
  0x6b   : > { %v536_v48 = vadd.f32 %v535_v60, %v534_v7  ;;  %v762_v9 = vrot.slane %v1668_v59, 1  ;;  %v768_v22 = vadd.f32 %v566_v56, %v564_v50  ;;  %1320 = vpow2.f32 %v1495_v38  ;;  %v2439_v38 = vld [vmem:[#allocation14_spill] sm:$0xff] }
  0x6c   : > { %v750_v62 = vsel %vm245_vm0, %v741_v26, 0.0  ;;  %v507_v33 = vrot.slane %v506_v29, 1  ;;  %v565_v3 = vadd.f32 %v564_v50, %v563_v51  ;;  %v748_v57 = vadd.f32 %v747_v11, %v535_v60  ;;  %v2447_v7 = vld [vmem:[#allocation2_spill] sm:$0xff] }
  0x6d   : > { %v538_v4 = vadd.f32 %v537_v32, %v536_v48  ;;  %v769_v46 = vadd.f32 %v768_v22, %v568_v17  ;;  %v771_v42 = vsel %vm245_vm0, %v762_v9, 0.0  ;;  %v1862_v23 = vadd.f32 %v750_v62, %v537_v32 }
  0x6e   : > { %1322 = vpow2.f32 %v1498_v39  ;;  %v508_v5 = vadd.f32 %v507_v33, %v506_v29  ;;  %v567_v19 = vadd.f32 %v566_v56, %v565_v3  ;;  %v749_v28 = vadd.f32 %v748_v57, %v537_v32  ;;  %v2442_v39 = vld [vmem:[#allocation12_spill] sm:$0xff]  ;;  %v2448_v29 = vld [vmem:[#allocation15_spill] sm:$0xff] }
  0x6f   : > { %v539_v61 = vrot.slane %v538_v4, 4  ;;  %v770_v59 = vadd.f32 %v769_v46, %v570_v1  ;;  %v1865_v0 = vadd.f32 %v771_v42, %v570_v1  ;;  %1324 = vpow2.f32 %v1503_v41  ;;  %v2450_v46 = vld [vmem:[#allocation13_spill] sm:$0xff] }
  0x70   : > { %v585_v14 = vadd.f32 %v2440_v37, %v2439_v38  ;;  %1326 = vrcp.f32 %v508_v5  ;;  %v569_v16 = vadd.f32 %v568_v17, %v567_v19  ;;  %v600_v60 = vadd.f32 %v2442_v39, %v2441_v25 }
  0x71   : > { %v540_v6 = vadd.f32 %v539_v61, %v538_v4  ;;  %v461_v32 = vadd.f32 %v460_v2, %v1825_v34  ;;  %1328 = vpow2.f32 %v2443_v12  ;;  %v1879_v41 = vadd.f32 %v1724_v13, %v1730_v10  ;;  %v2445_v34 = vld [vmem:[#allocation10_spill] sm:$0xff] }
  0x72   : > { %v571_v47 = vadd.f32 %v570_v1, %v569_v16  ;;  %1330 = vpow2.f32 %v2444_v58  ;;  %v1884_v21 = vadd.f32 %v1728_v54, %v1749_v45  ;;  %v1898_v13 = vadd.f32 %v1808_v36, %v1816_v43  ;;  %v1906_v54 = vld [vmem:[%s1412_s11 + $0xd0] sm:$0xff] }
  0x73   : > { %v541_v53 = vrot.slane %v540_v6, 2  ;;  %1332 = vpow2.f32 %v2445_v34  ;;  %v1902_v10 = vadd.f32 %v1814_v24, %v1833_v27  ;;  %v193_v2 = vmul.f32 1.442695, %v1873_v49  ;;  %2446 = vst [vmem:[#allocation14_spill] sm:$0xff] %v1906_v54 }
  0x74   : > { %v572_v63 = vrot.slane %v571_v47, 4  ;;  %v1910_v18 = vadd.f32 %v750_v62, %v749_v28  ;;  %v1912_v15 = vadd.f32 %v771_v42, %v770_v59  ;;  %v1917_v36 = vmul.f32 1.442695, %v1887_v8  ;;  %v2449_v62 = vld [vmem:[#allocation3_spill] sm:$0xff]  ;;  %v2451_v28 = vld [vmem:[#allocation4_spill] sm:$0xff] }
  0x75   : > { %v1908_v45 = vadd.f32 %v541_v53, %v540_v6  ;;  %v1914_v35 = vpop.eup %1320  ;;  %1334 = vpow2.f32 %v193_v2  ;;  %v1920_v24 = vmul.f32 1.442695, %v1890_v40  ;;  %v1923_v43 = vmul.f32 1.442695, %v1893_v55 }
  0x76   : > { %v573_v27 = vadd.f32 %v572_v63, %v571_v47  ;;  %v1927_v44 = vmul.f32 %v1914_v35, %v2447_v7  ;;  %v601_v50 = vsel %vm245_vm0, %v1914_v35, 0.0  ;;  %v1932_v56 = vmul.f32 1.442695, %v1906_v54 }
  0x77   : > { %v543_v1 = vrot.slane %v1908_v45, 1  ;;  %v602_v26 = vadd.f32 %v601_v50, %v600_v60  ;;  %v802_v48 = vadd.f32 %v2448_v29, %v601_v50  ;;  %v657_v51 = vrot.slane %v1914_v35, 3  ;;  %v2453_v29 = vld [vmem:[#allocation6_spill] sm:$0xff] }
  0x78   : > { %v1934_v17 = vpop.eup %1322  ;;  %v574_v11 = vrot.slane %v573_v27, 2  ;;  %v586_v22 = vsel %vm245_vm0, %v1927_v44, 0.0  ;;  %v624_v5 = vrot.slane %v1927_v44, 3 }
  0x79   : > { %v1941_v9 = vmul.f32 %v1934_v17, %v2449_v62  ;;  %v1946_v4 = vpop.eup %1324  ;;  %v587_v3 = vadd.f32 %v586_v22, %v585_v14  ;;  %v603_v57 = vsel %vm245_vm0, %v1934_v17, 0.0  ;;  %v787_v42 = vadd.f32 %v2450_v46, %v586_v22 }
  0x7a   : > { %v1327_v61 = vpop.eup %1326  ;;  %v575_v19 = vadd.f32 %v574_v11, %v573_v27  ;;  %v1954_v59 = vmul.f32 %v1946_v4, %v2451_v28  ;;  %v604_v37 = vadd.f32 %v603_v57, %v602_v26  ;;  %v1962_v39 = vadd.f32 %v802_v48, %v603_v57  ;;  %v2452_v27 = vld [vmem:[#allocation5_spill] sm:$0xff]  ;;  %v2454_v11 = vld [vmem:[#allocation7_spill] sm:$0xff] }
  0x7b   : > { %v588_v38 = vsel %vm245_vm0, %v1941_v9, 0.0  ;;  %v1958_v6 = vpop.eup %1328  ;;  %v510_v14 = vmul.f32 %v1327_v61, %v461_v32  ;;  %v1972_v58 = vsel %vm245_vm0, %v1946_v4, 0.0  ;;  %v627_v46 = vrot.slane %v1941_v9, 3 }
  0x7c   : > { %v589_v16 = vadd.f32 %v588_v38, %v587_v3  ;;  %v1960_v25 = vadd.f32 %v787_v42, %v588_v38  ;;  %v1964_v60 = vpop.eup %1330  ;;  %v576_v12 = vrot.slane %v575_v19, 1  ;;  %v605_v53 = vrot.slane %v604_v37, 4 }
  0x7d   : > { %v1968_v47 = vsel %vm245_vm0, %v1954_v59, 0.0  ;;  %v1974_v34 = vpop.eup %1332  ;;  %511 = vst.msk [vmem:[%s1721_s15 + $0x2] sm:$0x1] %vm286_vm2, %v510_v14  ;;  %v1982_v63 = vadd.f32 %v1972_v58, %v603_v57  ;;  %v1986_v7 = vmul.f32 %v1958_v6, %v2452_v27  ;;  %v1990_v48 = vmul.f32 %v1964_v60, %v2453_v29 }
  0x7e   : > { %v590_v32 = vrot.slane %v589_v16, 4  ;;  %v1979_v2 = vadd.f32 %v1968_v47, %v588_v38  ;;  %v577_v50 = vadd.f32 %v576_v12, %v575_v19  ;;  %v606_v26 = vadd.f32 %v605_v53, %v604_v37 }
  0x7f   : > { %v1994_v62 = vmul.f32 %v1974_v34, %v2454_v11  ;;  %v1996_v22 = vpop.eup %1334  ;;  %v625_v57 = vrot.slane %v1986_v7, 3  ;;  %v658_v42 = vrot.slane %v1958_v6, 3  ;;  %v628_v19 = vrot.slane %v1990_v48, 3 }
  0x80   : > { %v591_v3 = vadd.f32 %v590_v32, %v589_v16  ;;  %1336 = vrcp.f32 %v577_v50  ;;  %v607_v61 = vrot.slane %v606_v26, 2  ;;  %v660_v28 = vrot.slane %v1934_v17, 3 }
  0x81   : > { %v626_v37 = vsel %vm302_vm1, %v624_v5, %v625_v57  ;;  %v659_v14 = vsel %vm302_vm1, %v657_v51, %v658_v42  ;;  %v661_v12 = vrot.slane %v1964_v60, 3  ;;  %v544_v16 = vadd.f32 %v543_v1, %v1908_v45 }
  0x82   : > { %v592_v38 = vrot.slane %v591_v3, 2  ;;  %v608_v53 = vadd.f32 %v607_v61, %v606_v26  ;;  %v629_v32 = vsel %vm302_vm1, %v627_v46, %v628_v19  ;;  %v638_v27 = vsel %vm245_vm0, %v626_v37, 0.0 }
  0x83   : > { %v639_v29 = vadd.f32 %v638_v27, %v1879_v41  ;;  %v662_v11 = vsel %vm302_vm1, %v660_v28, %v661_v12  ;;  %v671_v33 = vsel %vm245_vm0, %v659_v14, 0.0  ;;  %v640_v5 = vsel %vm245_vm0, %v629_v32, 0.0 }
  0x84   : > { %v593_v50 = vadd.f32 %v592_v38, %v591_v3  ;;  %v609_v54 = vrot.slane %v608_v53, 1  ;;  %v672_v51 = vadd.f32 %v671_v33, %v1884_v21  ;;  %v826_v57 = vrot.slane %v1954_v59, 3 }
  0x85   : > { %v641_v45 = vadd.f32 %v640_v5, %v639_v29  ;;  %v673_v1 = vsel %vm245_vm0, %v662_v11, 0.0  ;;  %v827_v26 = vrot.slane %v1994_v62, 3  ;;  %v839_v3 = vadd.f32 %v1733_v31, %v638_v27 }
  0x86   : > { %v610_v46 = vadd.f32 %v609_v54, %v608_v53  ;;  %v674_v41 = vadd.f32 %v673_v1, %v672_v51  ;;  %v859_v42 = vrot.slane %v1946_v4, 3  ;;  %v860_v61 = vrot.slane %v1974_v34, 3 }
  0x87   : > { %v594_v19 = vrot.slane %v593_v50, 1  ;;  %v642_v28 = vrot.slane %v641_v45, 4  ;;  %v828_v38 = vsel %vm302_vm1, %v826_v57, %v827_v26  ;;  %v2021_v21 = vadd.f32 %v839_v3, %v640_v5 }
  0x88   : > { %1338 = vrcp.f32 %v610_v46  ;;  %v675_v37 = vrot.slane %v674_v41, 4  ;;  %v2024_v14 = vsel %vm245_vm0, %v828_v38, 0.0  ;;  %v861_v12 = vsel %vm302_vm1, %v859_v42, %v860_v61 }
  0x89   : > { %v643_v31 = vadd.f32 %v642_v28, %v641_v45  ;;  %v872_v54 = vadd.f32 %v1736_v20, %v671_v33  ;;  %v2029_v53 = vsel %vm245_vm0, %v861_v12, 0.0  ;;  %v2032_v32 = vadd.f32 %v2024_v14, %v640_v5 }
  0x8a   : > { %v1337_v27 = vpop.eup %1336  ;;  %v676_v29 = vadd.f32 %v675_v37, %v674_v41  ;;  %v2035_v11 = vadd.f32 %v2029_v53, %v673_v1  ;;  %v687_v51 = vrot.slane %v1927_v44, 6  ;;  %v688_v57 = vrot.slane %v1986_v7, 6 }
  0x8b   : > { %v579_v26 = vmul.f32 %v1337_v27, %v544_v16  ;;  %v644_v45 = vrot.slane %v643_v31, 2  ;;  %v2039_v3 = vadd.f32 %v872_v54, %v673_v1  ;;  %v690_v20 = vrot.slane %v1941_v9, 6 }
  0x8c   : > { %v677_v33 = vrot.slane %v676_v29, 2  ;;  %v689_v46 = vsel %vm414_vm3, %v687_v51, %v688_v57  ;;  %v691_v5 = vrot.slane %v1990_v48, 6  ;;  %v715_v41 = vrot.slane %v1958_v6, 6 }
  0x8d   : > { %580 = vst.msk [vmem:[%s1721_s15 + $0x3] sm:$0x1] %vm286_vm2, %v579_v26  ;;  %v645_v42 = vadd.f32 %v644_v45, %v643_v31  ;;  %v701_v44 = vsel %vm245_vm0, %v689_v46, 0.0  ;;  %v717_v61 = vrot.slane %v1934_v17, 6  ;;  %v718_v16 = vrot.slane %v1964_v60, 6 }
  0x8e   : > { %v678_v1 = vadd.f32 %v677_v33, %v676_v29  ;;  %v692_v28 = vsel %vm414_vm3, %v690_v20, %v691_v5  ;;  %v702_v9 = vadd.f32 %v701_v44, %v1898_v13  ;;  %v2455_v38 = vrot.slane %v1914_v35, 6 }
  0x8f   : > { %v595_v12 = vadd.f32 %v594_v19, %v593_v50  ;;  %v703_v54 = vsel %vm245_vm0, %v692_v28, 0.0  ;;  %v719_v31 = vsel %vm414_vm3, %v717_v61, %v718_v16  ;;  %v646_v51 = vrot.slane %v645_v42, 1 }
  0x90   : > { %v716_v37 = vsel %vm414_vm3, %v2455_v38, %v715_v41  ;;  %v679_v17 = vrot.slane %v678_v1, 1  ;;  %v704_v57 = vadd.f32 %v703_v54, %v702_v9  ;;  %v730_v26 = vsel %vm245_vm0, %v719_v31, 0.0 }
  0x91   : > { %v728_v27 = vsel %vm245_vm0, %v716_v37, 0.0  ;;  %v889_v13 = vrot.slane %v1954_v59, 6  ;;  %v890_v35 = vrot.slane %v1994_v62, 6  ;;  %v902_v50 = vadd.f32 %v1819_v52, %v701_v44 }
  0x92   : > { %v729_v29 = vadd.f32 %v728_v27, %v1902_v10  ;;  %v1339_v19 = vpop.eup %1338  ;;  %v680_v45 = vadd.f32 %v679_v17, %v678_v1  ;;  %v705_v20 = vrot.slane %v704_v57, 4  ;;  %v916_v46 = vrot.slane %v1946_v4, 6 }
  0x93   : > { %v612_v5 = vmul.f32 %v1339_v19, %v595_v12  ;;  %v891_v41 = vsel %vm414_vm3, %v889_v13, %v890_v35  ;;  %v2065_v61 = vadd.f32 %v902_v50, %v703_v54  ;;  %v917_v10 = vrot.slane %v1974_v34, 6 }
  0x94   : > { %v731_v33 = vadd.f32 %v730_v26, %v729_v29  ;;  %1340 = vrcp.f32 %v680_v45  ;;  %v706_v59 = vadd.f32 %v705_v20, %v704_v57  ;;  %v2069_v28 = vsel %vm245_vm0, %v891_v41, 0.0 }
  0x95   : > { %1260 = vst.msk [vmem:[%s1721_s15 + $0x4] sm:$0x1] %vm286_vm2, %v612_v5  ;;  %v918_v52 = vsel %vm414_vm3, %v916_v46, %v917_v10  ;;  %v929_v44 = vadd.f32 %v1822_v30, %v728_v27  ;;  %v2076_v4 = vadd.f32 %v2069_v28, %v703_v54  ;;  %v742_v1 = vrot.slane %v1986_v7, 1 }
  0x96   : > { %v732_v16 = vrot.slane %v731_v33, 4  ;;  %v707_v9 = vrot.slane %v706_v59, 2  ;;  %v2080_v37 = vsel %vm245_vm0, %v918_v52, 0.0  ;;  %v743_v12 = vrot.slane %v1990_v48, 1 }
  0x97   : > { %v2083_v31 = vadd.f32 %v929_v44, %v730_v26  ;;  %v2086_v17 = vadd.f32 %v2080_v37, %v730_v26  ;;  %v752_v57 = vsel %vm245_vm0, %v742_v1, 0.0  ;;  %v763_v30 = vrot.slane %v1958_v6, 1 }
  0x98   : > { %v733_v38 = vadd.f32 %v732_v16, %v731_v33  ;;  %v708_v54 = vadd.f32 %v707_v9, %v706_v59  ;;  %v753_v7 = vadd.f32 %v752_v57, %v1910_v18  ;;  %v754_v29 = vsel %vm245_vm0, %v743_v12, 0.0 }
  0x99   : > { %v764_v13 = vrot.slane %v1964_v60, 1  ;;  %v773_v35 = vsel %vm245_vm0, %v763_v30, 0.0  ;;  %v946_v48 = vrot.slane %v1994_v62, 1  ;;  %v953_v50 = vadd.f32 %v1862_v23, %v752_v57 }
  0x9a   : > { %v734_v27 = vrot.slane %v733_v38, 2  ;;  %v647_v26 = vadd.f32 %v646_v51, %v645_v42  ;;  %v755_v45 = vadd.f32 %v754_v29, %v753_v7  ;;  %v774_v20 = vadd.f32 %v773_v35, %v1912_v15 }
  0x9b   : > { %v775_v6 = vsel %vm245_vm0, %v764_v13, 0.0  ;;  %v954_v33 = vadd.f32 %v953_v50, %v754_v29  ;;  %v955_v18 = vsel %vm245_vm0, %v946_v48, 0.0  ;;  %v967_v46 = vrot.slane %v1974_v34, 1  ;;  %v2108_v34 = vld [vmem:[%s1412_s11 + $0xe0] sm:$0xff]  ;;  %v2136_v50 = vld [vmem:[%s1412_s11 + $0xf0] sm:$0xff] }
  0x9c   : > { %v735_v19 = vadd.f32 %v734_v27, %v733_v38  ;;  %v709_v60 = vrot.slane %v708_v54, 1  ;;  %v756_v41 = vrot.slane %v755_v45, 4  ;;  %v776_v10 = vadd.f32 %v775_v6, %v774_v20 }
  0x9d   : > { %v974_v62 = vadd.f32 %v1865_v0, %v773_v35  ;;  %v976_v23 = vsel %vm245_vm0, %v967_v46, 0.0  ;;  %v2102_v42 = vadd.f32 %v955_v18, %v754_v29  ;;  %1342 = vpow2.f32 %v1917_v36 }
  0x9e   : > { %v736_v5 = vrot.slane %v735_v19, 1  ;;  %v1341_v15 = vpop.eup %1340  ;;  %v757_v59 = vadd.f32 %v756_v41, %v755_v45  ;;  %v777_v16 = vrot.slane %v776_v10, 4  ;;  %v2105_v52 = vadd.f32 %v976_v23, %v775_v6 }
  0x9f   : > { %v682_v44 = vmul.f32 %v1341_v15, %v647_v26  ;;  %v975_v1 = vadd.f32 %v974_v62, %v775_v6  ;;  %v2112_v0 = vmul.f32 %v1996_v22, %v1873_v49  ;;  %v790_v9 = vadd.f32 %v1968_v47, %v1960_v25 }
  0xa0   : > { %v737_v51 = vadd.f32 %v736_v5, %v735_v19  ;;  %v758_v38 = vrot.slane %v757_v59, 2  ;;  %v778_v36 = vadd.f32 %v777_v16, %v776_v10  ;;  %v805_v12 = vadd.f32 %v1972_v58, %v1962_v39  ;;  %v2157_v19 = vld [vmem:[%s1412_s11 + $0xe8] sm:$0xff] }
  0xa1   : > { %1261 = vst.msk [vmem:[%s1721_s15 + $0x5] sm:$0x1] %vm286_vm2, %v682_v44  ;;  %v791_v57 = vsel %vm245_vm0, %v2112_v0, 0.0  ;;  %v806_v30 = vsel %vm245_vm0, %v1996_v22, 0.0  ;;  %v205_v49 = vmul.f32 1.442695, %v2108_v34  ;;  %v2131_v29 = vadd.f32 %v2024_v14, %v2021_v21 }
  0xa2   : > { %1344 = vrcp.f32 %v737_v51  ;;  %v759_v25 = vadd.f32 %v758_v38, %v757_v59  ;;  %v779_v47 = vrot.slane %v778_v36, 2  ;;  %v792_v27 = vadd.f32 %v791_v57, %v790_v9  ;;  %v2149_v21 = vld [vmem:[%s1412_s11 + $0xd8] sm:$0xff] }
  0xa3   : > { %1346 = vpow2.f32 %v1920_v24  ;;  %v807_v7 = vadd.f32 %v806_v30, %v805_v12  ;;  %v992_v39 = vadd.f32 %v1979_v2, %v791_v57  ;;  %v1007_v58 = vadd.f32 %v1982_v63, %v806_v30 }
  0xa4   : > { %1348 = vpow2.f32 %v1923_v43  ;;  %v710_v13 = vadd.f32 %v709_v60, %v708_v54  ;;  %v760_v24 = vrot.slane %v759_v25, 1  ;;  %v780_v35 = vadd.f32 %v779_v47, %v778_v36 }
  0xa5   : > { %v875_v48 = vadd.f32 %v2029_v53, %v2039_v3  ;;  %v829_v26 = vrot.slane %v2112_v0, 3  ;;  %v862_v2 = vrot.slane %v1996_v22, 3  ;;  %v2142_v43 = vadd.f32 %v2069_v28, %v2065_v61 }
  0xa6   : > { %v2146_v63 = vadd.f32 %v2080_v37, %v2083_v31  ;;  %v781_v14 = vrot.slane %v780_v35, 1  ;;  %v892_v54 = vrot.slane %v2112_v0, 6  ;;  %v2152_v53 = vadd.f32 %v955_v18, %v954_v33 }
  0xa7   : > { %v2154_v3 = vadd.f32 %v976_v23, %v975_v1  ;;  %v2159_v45 = vpop.eup %1342  ;;  %v2161_v20 = vadd.f32 %v760_v24, %v759_v25  ;;  %v919_v61 = vrot.slane %v1996_v22, 6  ;;  %1350 = vpow2.f32 %v1932_v56 }
  0xa8   : > { %v2166_v28 = vmul.f32 1.442695, %v2136_v50  ;;  %v782_v37 = vadd.f32 %v781_v14, %v780_v35  ;;  %v2170_v31 = vmul.f32 %v2159_v45, %v1887_v8  ;;  %v808_v6 = vsel %vm245_vm0, %v2159_v45, 0.0 }
  0xa9   : > { %v2175_v33 = vmul.f32 1.442695, %v2149_v21  ;;  %v809_v18 = vadd.f32 %v808_v6, %v807_v7  ;;  %v2177_v46 = vadd.f32 %v1007_v58, %v808_v6  ;;  %1352 = vpow2.f32 %v205_v49 }
  0xaa   : > { %v2180_v56 = vmul.f32 1.442695, %v2157_v19  ;;  %1354 = vrcp.f32 %v782_v37  ;;  %v793_v8 = vsel %vm245_vm0, %v2170_v31, 0.0  ;;  %v865_v5 = vrot.slane %v2159_v45, 3 }
  0xab   : > { %v922_v41 = vrot.slane %v2159_v45, 6  ;;  %v794_v23 = vadd.f32 %v793_v8, %v792_v27  ;;  %v810_v15 = vrot.slane %v809_v18, 4  ;;  %v2188_v51 = vadd.f32 %v992_v39, %v793_v8 }
  0xac   : > { %v1345_v60 = vpop.eup %1344  ;;  %v832_v16 = vrot.slane %v2170_v31, 3  ;;  %v895_v1 = vrot.slane %v2170_v31, 6  ;;  %1356 = vpow2.f32 %v2166_v28 }
  0xad   : > { %v2186_v10 = vpop.eup %1346  ;;  %v739_v62 = vmul.f32 %v1345_v60, %v710_v13  ;;  %v795_v38 = vrot.slane %v794_v23, 4  ;;  %v811_v36 = vadd.f32 %v810_v15, %v809_v18 }
  0xae   : > { %v2192_v59 = vmul.f32 %v2186_v10, %v1890_v40  ;;  %v863_v44 = vrot.slane %v2186_v10, 3  ;;  %v2197_v9 = vpop.eup %1348  ;;  %v920_v12 = vrot.slane %v2186_v10, 6  ;;  %v968_v57 = vrot.slane %v2186_v10, 1 }
  0xaf   : > { %1262 = vst.msk [vmem:[%s1721_s15 + $0x6] sm:$0x1] %vm286_vm2, %v739_v62  ;;  %v2205_v40 = vmul.f32 %v2197_v9, %v1893_v55  ;;  %v866_v25 = vrot.slane %v2197_v9, 3  ;;  %v796_v47 = vadd.f32 %v795_v38, %v794_v23  ;;  %v812_v27 = vrot.slane %v811_v36, 2 }
  0xb0   : > { %v830_v30 = vrot.slane %v2192_v59, 3  ;;  %v864_v49 = vsel %vm302_vm1, %v862_v2, %v863_v44  ;;  %v893_v39 = vrot.slane %v2192_v59, 6 }
  0xb1   : > { %v876_v7 = vsel %vm245_vm0, %v864_v49, 0.0  ;;  %v833_v13 = vrot.slane %v2205_v40, 3  ;;  %v867_v24 = vsel %vm302_vm1, %v865_v5, %v866_v25  ;;  %v2215_v35 = vpop.eup %1350  ;;  %v797_v14 = vrot.slane %v796_v47, 2 }
  0xb2   : > { %v831_v58 = vsel %vm302_vm1, %v829_v26, %v830_v30  ;;  %v877_v55 = vadd.f32 %v876_v7, %v875_v48  ;;  %v813_v37 = vadd.f32 %v812_v27, %v811_v36  ;;  %v878_v31 = vsel %vm245_vm0, %v867_v24, 0.0 }
  0xb3   : > { %v843_v2 = vsel %vm245_vm0, %v831_v58, 0.0  ;;  %v834_v6 = vsel %vm302_vm1, %v832_v16, %v833_v13  ;;  %v2222_v8 = vpop.eup %1352  ;;  %v798_v62 = vadd.f32 %v797_v14, %v796_v47  ;;  %v1077_v23 = vadd.f32 %v2035_v11, %v876_v7 }
  0xb4   : > { %v844_v18 = vadd.f32 %v843_v2, %v2131_v29  ;;  %v879_v60 = vadd.f32 %v878_v31, %v877_v55  ;;  %v1044_v26 = vadd.f32 %v2032_v32, %v843_v2  ;;  %v814_v5 = vrot.slane %v813_v37, 1  ;;  %v1355_v15 = vpop.eup %1354 }
  0xb5   : > { %v845_v48 = vsel %vm245_vm0, %v834_v6, 0.0  ;;  %v894_v29 = vsel %vm414_vm3, %v892_v54, %v893_v39  ;;  %v784_v32 = vmul.f32 %v1355_v15, %v2161_v20  ;;  %v2232_v30 = vadd.f32 %v1077_v23, %v878_v31 }
  0xb6   : > { %v846_v44 = vadd.f32 %v845_v48, %v844_v18  ;;  %v880_v38 = vrot.slane %v879_v60, 4  ;;  %v2226_v36 = vadd.f32 %v1044_v26, %v845_v48  ;;  %v815_v16 = vadd.f32 %v814_v5, %v813_v37  ;;  %v2259_v18 = vld [vmem:[%s1412_s11 + $0xf8] sm:$0xff] }
  0xb7   : > { %v896_v11 = vrot.slane %v2205_v40, 6  ;;  %v906_v47 = vsel %vm245_vm0, %v894_v29, 0.0  ;;  %1263 = vst.msk [vmem:[%s1721_s15 + $0x7] sm:$0x1] %vm286_vm2, %v784_v32  ;;  %v799_v27 = vrot.slane %v798_v62, 1  ;;  %v921_v54 = vsel %vm414_vm3, %v919_v61, %v920_v12 }
  0xb8   : > { %v847_v49 = vrot.slane %v846_v44, 4  ;;  %v881_v25 = vadd.f32 %v880_v38, %v879_v60  ;;  %1358 = vrcp.f32 %v815_v16  ;;  %v907_v0 = vadd.f32 %v906_v47, %v2142_v43 }
  0xb9   : > { %v897_v28 = vsel %vm414_vm3, %v895_v1, %v896_v11  ;;  %v923_v39 = vrot.slane %v2197_v9, 6  ;;  %v933_v13 = vsel %vm245_vm0, %v921_v54, 0.0  ;;  %v1107_v24 = vadd.f32 %v2076_v4, %v906_v47 }
  0xba   : > { %v848_v20 = vadd.f32 %v847_v49, %v846_v44  ;;  %v882_v7 = vrot.slane %v881_v25, 2  ;;  %v908_v58 = vsel %vm245_vm0, %v897_v28, 0.0  ;;  %v947_v55 = vrot.slane %v2192_v59, 1 }
  0xbb   : > { %v909_v22 = vadd.f32 %v908_v58, %v907_v0  ;;  %v924_v61 = vsel %vm414_vm3, %v922_v41, %v923_v39  ;;  %v934_v1 = vadd.f32 %v933_v13, %v2146_v63  ;;  %v2254_v37 = vadd.f32 %v1107_v24, %v908_v58 }
  0xbc   : > { %v849_v43 = vrot.slane %v848_v20, 2  ;;  %v883_v14 = vadd.f32 %v882_v7, %v881_v25  ;;  %v935_v12 = vsel %vm245_vm0, %v924_v61, 0.0  ;;  %v1134_v2 = vadd.f32 %v2086_v17, %v933_v13  ;;  %v2266_v17 = vpop.eup %1356 }
  0xbd   : > { %v910_v4 = vrot.slane %v909_v22, 4  ;;  %v948_v59 = vrot.slane %v2205_v40, 1  ;;  %v936_v60 = vadd.f32 %v935_v12, %v934_v1  ;;  %v957_v45 = vsel %vm245_vm0, %v947_v55, 0.0 }
  0xbe   : > { %v850_v31 = vadd.f32 %v849_v43, %v848_v20  ;;  %v884_v6 = vrot.slane %v883_v14, 1  ;;  %v2261_v26 = vadd.f32 %v1134_v2, %v935_v12  ;;  %v969_v63 = vrot.slane %v2197_v9, 1 }
  0xbf   : > { %v800_v41 = vadd.f32 %v799_v27, %v798_v62  ;;  %v911_v48 = vadd.f32 %v910_v4, %v909_v22  ;;  %v958_v23 = vadd.f32 %v957_v45, %v2152_v53  ;;  %v937_v15 = vrot.slane %v936_v60, 4 }
  0xc0   : > { %v885_v5 = vadd.f32 %v884_v6, %v883_v14  ;;  %v959_v44 = vsel %vm245_vm0, %v948_v59, 0.0  ;;  %v978_v40 = vsel %vm245_vm0, %v968_v57, 0.0  ;;  %v211_v38 = vmul.f32 1.442695, %v2259_v18  ;;  %v2456_v57 = vld [vmem:[#allocation14_spill] sm:$0xff] }
  0xc1   : > { %v851_v29 = vrot.slane %v850_v31, 1  ;;  %v960_v9 = vadd.f32 %v959_v44, %v958_v23  ;;  %v980_v62 = vsel %vm245_vm0, %v969_v63, 0.0  ;;  %v938_v16 = vadd.f32 %v937_v15, %v936_v60 }
  0xc2   : > { %1360 = vrcp.f32 %v885_v5  ;;  %v1359_v32 = vpop.eup %1358  ;;  %v979_v53 = vadd.f32 %v978_v40, %v2154_v3  ;;  %v1158_v49 = vadd.f32 %v2102_v42, %v957_v45  ;;  %v1179_v25 = vadd.f32 %v2105_v52, %v978_v40 }
  0xc3   : > { %v817_v11 = vmul.f32 %v1359_v32, %v800_v41  ;;  %v912_v10 = vrot.slane %v911_v48, 2  ;;  %v961_v47 = vrot.slane %v960_v9, 4  ;;  %v2279_v27 = vmul.f32 %v2215_v35, %v2456_v57 }
  0xc4   : > { %v939_v0 = vrot.slane %v938_v16, 2  ;;  %v981_v54 = vadd.f32 %v980_v62, %v979_v53  ;;  %v2281_v20 = vadd.f32 %v1158_v49, %v959_v44  ;;  %v2283_v7 = vadd.f32 %v1179_v25, %v980_v62 }
  0xc5   : > { %1264 = vst.msk [vmem:[%s1721_s15 + $0x8] sm:$0x1] %vm286_vm2, %v817_v11  ;;  %v852_v3 = vadd.f32 %v851_v29, %v850_v31  ;;  %v962_v28 = vadd.f32 %v961_v47, %v960_v9  ;;  %v2289_v42 = vmul.f32 %v2222_v8, %v2108_v34  ;;  %v2293_v52 = vmul.f32 %v2266_v17, %v2136_v50 }
  0xc6   : > { %v940_v39 = vadd.f32 %v939_v0, %v938_v16  ;;  %v982_v58 = vrot.slane %v981_v54, 4  ;;  %v994_v13 = vsel %vm245_vm0, %v2279_v27, 0.0  ;;  %v1009_v24 = vsel %vm245_vm0, %v2215_v35, 0.0 }
  0xc7   : > { %v913_v55 = vadd.f32 %v912_v10, %v911_v48  ;;  %v963_v43 = vrot.slane %v962_v28, 2  ;;  %v995_v14 = vadd.f32 %v994_v13, %v2188_v51  ;;  %v996_v34 = vsel %vm245_vm0, %v2289_v42, 0.0 }
  0xc8   : > { %v941_v22 = vrot.slane %v940_v39, 1  ;;  %v983_v61 = vadd.f32 %v982_v58, %v981_v54  ;;  %v998_v50 = vsel %vm245_vm0, %v2293_v52, 0.0  ;;  %v1010_v1 = vadd.f32 %v1009_v24, %v2177_v46 }
  0xc9   : > { %v964_v12 = vadd.f32 %v963_v43, %v962_v28  ;;  %v997_v2 = vadd.f32 %v996_v34, %v995_v14  ;;  %v1011_v31 = vsel %vm245_vm0, %v2222_v8, 0.0  ;;  %v1013_v6 = vsel %vm245_vm0, %v2266_v17, 0.0 }
  0xca   : > { %v942_v51 = vadd.f32 %v941_v22, %v940_v39  ;;  %v984_v4 = vrot.slane %v983_v61, 2  ;;  %v1012_v59 = vadd.f32 %v1011_v31, %v1010_v1  ;;  %1362 = vpow2.f32 %v2175_v33 }
  0xcb   : > { %v914_v45 = vrot.slane %v913_v55, 1  ;;  %v965_v63 = vrot.slane %v964_v12, 1  ;;  %v999_v41 = vadd.f32 %v998_v50, %v997_v2  ;;  %1364 = vpow2.f32 %v2180_v56 }
  0xcc   : > { %v1361_v60 = vpop.eup %1360  ;;  %1366 = vrcp.f32 %v942_v51  ;;  %v985_v5 = vadd.f32 %v984_v4, %v983_v61  ;;  %v1014_v48 = vadd.f32 %v1013_v6, %v1012_v59  ;;  %v1031_v32 = vrot.slane %v2279_v27, 3 }
  0xcd   : > { %v887_v46 = vmul.f32 %v1361_v60, %v852_v3  ;;  %v1000_v23 = vrot.slane %v999_v41, 4  ;;  %1368 = vpow2.f32 %v211_v38  ;;  %v915_v40 = vadd.f32 %v914_v45, %v913_v55 }
  0xce   : > { %v986_v15 = vrot.slane %v985_v5, 1  ;;  %v1015_v44 = vrot.slane %v1014_v48, 4  ;;  %v966_v9 = vadd.f32 %v965_v63, %v964_v12  ;;  %v1034_v56 = vrot.slane %v2289_v42, 3 }
  0xcf   : > { %1265 = vst.msk [vmem:[%s1721_s15 + $0x9] sm:$0x1] %vm286_vm2, %v887_v46  ;;  %v1001_v29 = vadd.f32 %v1000_v23, %v999_v41  ;;  %v1037_v53 = vrot.slane %v2293_v52, 3  ;;  %v1064_v49 = vrot.slane %v2215_v35, 3  ;;  %v1067_v25 = vrot.slane %v2222_v8, 3 }
  0xd0   : > { %v987_v33 = vadd.f32 %v986_v15, %v985_v5  ;;  %v1016_v62 = vadd.f32 %v1015_v44, %v1014_v48  ;;  %v1070_v11 = vrot.slane %v2266_v17, 3  ;;  %v1094_v47 = vrot.slane %v2279_v27, 6 }
  0xd1   : > { %v1002_v16 = vrot.slane %v1001_v29, 2  ;;  %v1097_v57 = vrot.slane %v2289_v42, 6  ;;  %v1100_v0 = vrot.slane %v2293_v52, 6  ;;  %v1121_v28 = vrot.slane %v2215_v35, 6 }
  0xd2   : > { %1370 = vrcp.f32 %v987_v33  ;;  %v1017_v38 = vrot.slane %v1016_v62, 2  ;;  %v1124_v39 = vrot.slane %v2222_v8, 6  ;;  %v1127_v58 = vrot.slane %v2266_v17, 6 }
  0xd3   : > { %v1003_v10 = vadd.f32 %v1002_v16, %v1001_v29 }
  0xd4   : > { %v2322_v54 = vpop.eup %1362  ;;  %v1018_v3 = vadd.f32 %v1017_v38, %v1016_v62 }
  0xd5   : > { %v2327_v13 = vpop.eup %1364  ;;  %v1004_v24 = vrot.slane %v1003_v10, 1  ;;  %v2331_v55 = vmul.f32 %v2322_v54, %v2149_v21  ;;  %v1065_v27 = vrot.slane %v2322_v54, 3  ;;  %v1122_v42 = vrot.slane %v2322_v54, 6 }
  0xd6   : > { %v1367_v52 = vpop.eup %1366  ;;  %v1019_v43 = vrot.slane %v1018_v3, 1  ;;  %v2337_v35 = vmul.f32 %v2327_v13, %v2157_v19  ;;  %v1068_v8 = vrot.slane %v2327_v13, 3  ;;  %v1125_v17 = vrot.slane %v2327_v13, 6 }
  0xd7   : > { %v2341_v14 = vpop.eup %1368  ;;  %v944_v34 = vmul.f32 %v1367_v52, %v915_v40  ;;  %v1005_v21 = vadd.f32 %v1004_v24, %v1003_v10  ;;  %v1032_v22 = vrot.slane %v2331_v55, 3  ;;  %v1066_v61 = vsel %vm302_vm1, %v1064_v49, %v1065_v27 }
  0xd8   : > { %v1020_v50 = vadd.f32 %v1019_v43, %v1018_v3  ;;  %v2347_v1 = vmul.f32 %v2341_v14, %v2259_v18  ;;  %v1035_v19 = vrot.slane %v2337_v35, 3  ;;  %v1069_v12 = vsel %vm302_vm1, %v1067_v25, %v1068_v8 }
  0xd9   : > { %1266 = vst.msk [vmem:[%s1721_s15 + $0xa] sm:$0x1] %vm286_vm2, %v944_v34  ;;  %v1033_v2 = vsel %vm302_vm1, %v1031_v32, %v1032_v22  ;;  %v1071_v31 = vrot.slane %v2341_v14, 3  ;;  %v1079_v6 = vsel %vm245_vm0, %v1066_v61, 0.0  ;;  %v1081_v51 = vsel %vm245_vm0, %v1069_v12, 0.0 }
  0xda   : > { %1372 = vrcp.f32 %v1020_v50  ;;  %v1036_v4 = vsel %vm302_vm1, %v1034_v56, %v1035_v19  ;;  %v1038_v18 = vrot.slane %v2347_v1, 3  ;;  %v1046_v59 = vsel %vm245_vm0, %v1033_v2, 0.0 }
  0xdb   : > { %v1047_v60 = vadd.f32 %v1046_v59, %v2226_v36  ;;  %v1048_v45 = vsel %vm245_vm0, %v1036_v4, 0.0  ;;  %v1072_v63 = vsel %vm302_vm1, %v1070_v11, %v1071_v31  ;;  %v1080_v41 = vadd.f32 %v1079_v6, %v2232_v30 }
  0xdc   : > { %v1371_v46 = vpop.eup %1370  ;;  %v1039_v5 = vsel %vm302_vm1, %v1037_v53, %v1038_v18  ;;  %v1083_v48 = vsel %vm245_vm0, %v1072_v63, 0.0  ;;  %v1095_v23 = vrot.slane %v2331_v55, 6  ;;  %v1098_v15 = vrot.slane %v2337_v35, 6 }
  0xdd   : > { %v989_v44 = vmul.f32 %v1371_v46, %v966_v9  ;;  %v1049_v40 = vadd.f32 %v1048_v45, %v1047_v60  ;;  %v1050_v36 = vsel %vm245_vm0, %v1039_v5, 0.0  ;;  %v1082_v29 = vadd.f32 %v1081_v51, %v1080_v41 }
  0xde   : > { %v1096_v33 = vsel %vm414_vm3, %v1094_v47, %v1095_v23  ;;  %v1099_v62 = vsel %vm414_vm3, %v1097_v57, %v1098_v15  ;;  %v1101_v30 = vrot.slane %v2347_v1, 6  ;;  %v1123_v32 = vsel %vm414_vm3, %v1121_v28, %v1122_v42 }
  0xdf   : > { %1267 = vst.msk [vmem:[%s1721_s15 + $0xb] sm:$0x1] %vm286_vm2, %v989_v44  ;;  %v1051_v16 = vadd.f32 %v1050_v36, %v1049_v40  ;;  %v1084_v56 = vadd.f32 %v1083_v48, %v1082_v29  ;;  %v1109_v53 = vsel %vm245_vm0, %v1096_v33, 0.0  ;;  %v1111_v9 = vsel %vm245_vm0, %v1099_v62, 0.0 }
  0xe0   : > { %v1102_v49 = vsel %vm414_vm3, %v1100_v0, %v1101_v30  ;;  %v1110_v38 = vadd.f32 %v1109_v53, %v2254_v37  ;;  %v1126_v25 = vsel %vm414_vm3, %v1124_v39, %v1125_v17  ;;  %v1128_v11 = vrot.slane %v2341_v14, 6 }
  0xe1   : > { %v1052_v10 = vrot.slane %v1051_v16, 4  ;;  %v1085_v47 = vrot.slane %v1084_v56, 4  ;;  %v1113_v57 = vsel %vm245_vm0, %v1102_v49, 0.0  ;;  %v1136_v3 = vsel %vm245_vm0, %v1123_v32, 0.0 }
  0xe2   : > { %v1112_v28 = vadd.f32 %v1111_v9, %v1110_v38  ;;  %v1129_v24 = vsel %vm414_vm3, %v1127_v58, %v1128_v11  ;;  %v1137_v27 = vadd.f32 %v1136_v3, %v2261_v26  ;;  %v1138_v42 = vsel %vm245_vm0, %v1126_v25, 0.0 }
  0xe3   : > { %v1053_v0 = vadd.f32 %v1052_v10, %v1051_v16  ;;  %v1086_v37 = vadd.f32 %v1085_v47, %v1084_v56  ;;  %v1140_v39 = vsel %vm245_vm0, %v1129_v24, 0.0  ;;  %v1151_v52 = vrot.slane %v2331_v55, 1 }
  0xe4   : > { %v1373_v43 = vpop.eup %1372  ;;  %v1114_v8 = vadd.f32 %v1113_v57, %v1112_v28  ;;  %v1139_v17 = vadd.f32 %v1138_v42, %v1137_v27  ;;  %v1152_v34 = vrot.slane %v2337_v35, 1  ;;  %v1153_v22 = vrot.slane %v2347_v1, 1 }
  0xe5   : > { %v1022_v61 = vmul.f32 %v1373_v43, %v1005_v21  ;;  %v1087_v58 = vrot.slane %v1086_v37, 2  ;;  %v1160_v26 = vsel %vm245_vm0, %v1151_v52, 0.0  ;;  %v1172_v6 = vrot.slane %v2322_v54, 1 }
  0xe6   : > { %v1141_v50 = vadd.f32 %v1140_v39, %v1139_v17  ;;  %v1161_v19 = vadd.f32 %v1160_v26, %v2281_v20  ;;  %v1162_v12 = vsel %vm245_vm0, %v1152_v34, 0.0  ;;  %v1115_v55 = vrot.slane %v1114_v8, 4 }
  0xe7   : > { %1268 = vst.msk [vmem:[%s1721_s15 + $0xc] sm:$0x1] %vm286_vm2, %v1022_v61  ;;  %v1088_v2 = vadd.f32 %v1087_v58, %v1086_v37  ;;  %v1164_v31 = vsel %vm245_vm0, %v1153_v22, 0.0  ;;  %v1054_v35 = vrot.slane %v1053_v0, 2  ;;  %v1173_v21 = vrot.slane %v2327_v13, 1 }
  0xe8   : > { %v1142_v51 = vrot.slane %v1141_v50, 4  ;;  %v1163_v1 = vadd.f32 %v1162_v12, %v1161_v19  ;;  %v1174_v18 = vrot.slane %v2341_v14, 1  ;;  %v1181_v20 = vsel %vm245_vm0, %v1172_v6, 0.0 }
  0xe9   : > { %v1089_v4 = vrot.slane %v1088_v2, 1  ;;  %v1182_v45 = vadd.f32 %v1181_v20, %v2283_v7  ;;  %v1116_v41 = vadd.f32 %v1115_v55, %v1114_v8  ;;  %v1183_v46 = vsel %vm245_vm0, %v1173_v21, 0.0 }
  0xea   : > { %v1143_v59 = vadd.f32 %v1142_v51, %v1141_v50  ;;  %v1165_v60 = vadd.f32 %v1164_v31, %v1163_v1  ;;  %v1185_v54 = vsel %vm245_vm0, %v1174_v18, 0.0  ;;  %v1055_v5 = vadd.f32 %v1054_v35, %v1053_v0 }
  0xeb   : > { %v1090_v63 = vadd.f32 %v1089_v4, %v1088_v2  ;;  %v1184_v23 = vadd.f32 %v1183_v46, %v1182_v45  ;;  %v1117_v44 = vrot.slane %v1116_v41, 2 }
  0xec   : > { %v1144_v48 = vrot.slane %v1143_v59, 2  ;;  %v1166_v14 = vrot.slane %v1165_v60, 4  ;;  %v1056_v40 = vrot.slane %v1055_v5, 1 }
  0xed   : > { %1374 = vrcp.f32 %v1090_v63  ;;  %v1186_v15 = vadd.f32 %v1185_v54, %v1184_v23  ;;  %v1118_v62 = vadd.f32 %v1117_v44, %v1116_v41 }
  0xee   : > { %v1145_v13 = vadd.f32 %v1144_v48, %v1143_v59  ;;  %v1167_v30 = vadd.f32 %v1166_v14, %v1165_v60  ;;  %v1057_v32 = vadd.f32 %v1056_v40, %v1055_v5 }
  0xef   : > { %v1187_v29 = vrot.slane %v1186_v15, 4  ;;  %v1119_v9 = vrot.slane %v1118_v62, 1 }
  0xf0   : > { %v1146_v36 = vrot.slane %v1145_v13, 1  ;;  %v1168_v49 = vrot.slane %v1167_v30, 2 }
  0xf1   : > { %v1188_v7 = vadd.f32 %v1187_v29, %v1186_v15  ;;  %v1120_v10 = vadd.f32 %v1119_v9, %v1118_v62 }
  0xf2   : > { %v1147_v33 = vadd.f32 %v1146_v36, %v1145_v13  ;;  %v1169_v47 = vadd.f32 %v1168_v49, %v1167_v30 }
  0xf3   : > { %v1189_v16 = vrot.slane %v1188_v7, 2 }
  0xf4   : > { %1376 = vrcp.f32 %v1147_v33  ;;  %v1170_v28 = vrot.slane %v1169_v47, 1 }
  0xf5   : > { %v1190_v56 = vadd.f32 %v1189_v16, %v1188_v7 }
  0xf6   : > { %v1171_v24 = vadd.f32 %v1170_v28, %v1169_v47 }
  0xf7   : > { %v1375_v53 = vpop.eup %1374  ;;  %v1191_v25 = vrot.slane %v1190_v56, 1 }
  0xf8   : > { %v1092_v38 = vmul.f32 %v1375_v53, %v1057_v32 }
  0xf9   : > { %v1192_v11 = vadd.f32 %v1191_v25, %v1190_v56 }
  0xfa   : > { %1269 = vst.msk [vmem:[%s1721_s15 + $0xd] sm:$0x1] %vm286_vm2, %v1092_v38 }
  0xfb   : > { %1378 = vrcp.f32 %v1192_v11 }
  0xfe   : > { %v1377_v57 = vpop.eup %1376 }
  0xff   : > { %v1149_v3 = vmul.f32 %v1377_v57, %v1120_v10 }
 0x101   : > { %1270 = vst.msk [vmem:[%s1721_s15 + $0xe] sm:$0x1] %vm286_vm2, %v1149_v3 }
 0x105   : > { %v1379_v27 = vpop.eup %1378 }
 0x106   : > { %v1194_v42 = vmul.f32 %v1379_v27, %v1171_v24 }
 0x108   : > { %1271 = vst.msk [vmem:[%s1721_s15 + $0xf] sm:$0x1] %vm286_vm2, %v1194_v42 }
 0x109 PF: > { %s11_s6 = sadd.s32 1, %s1386_s6  }
 0x10a   : > { %p8_p4 = scmp.ge.s32.totalorder %s11_s6, 4  }
 0x10c   :  { %10 = sbr.rel (!%p8_p4) target bundleno = 1 (0x1), region = 57 }

// kernel: local_attention_forward.8
= control target key start
LH: loop header
LB: loop body
LE: loop exit
PB: predicated region body
PF: predicated region fallthrough
CT: control target
= control target key end

     0   :  { %s1816_s12 = smov 0   ;;  %s2006_s0 = inlined_call_operand.vmem [shape: f32[2,2,2,16], index: 0, kind: input, shape index: {}]   ;;  %s2007_s1 = inlined_call_operand.vmem [shape: f32[3,3,16,4], index: 1, kind: input, shape index: {}]   ;;  %s2008_s2 = inlined_call_operand.vmem [shape: f32[1,4], index: 2, kind: input, shape index: {}]   ;;  %s2009_s3 = inlined_call_operand.vmem [shape: f32[2,4,4], index: 3, kind: output, shape index: {}]  }
   0x1 LB: > { %s1473_s13 = sadd.s32 4294967295, %s1791_s12   ;;  %p1477_p0 = scmp.ge.s32.totalorder %s1791_s12, 1  ;;  %s1791_s12 = sphi %s1816_s12, %s13_s12  }
   0x2   : > { %p137_p1 = scmp.lt.s32.totalorder %s1791_s12, 3 }
   0x4   : > { %p138_p2 = pnand %p1477_p0, %p137_p1 }
   0x5   : > { %v1481_v0 = vld [vmem:[%s2007_s1 + $0x40] sm:$0xff] (!%p138_p2)  ;;  %v1482_v1 = vld [vmem:[%s2007_s1 + $0x48] sm:$0xff] (!%p138_p2)  ;;  %v1495_v2 = vld [vmem:[%s2007_s1 + $0x30] sm:$0xff] (!%p138_p2)  ;;  %v1793_v3 = vmov (!%p138_p2), 0.0|0.0   ;;  %p160_p3 = scmp.lt.s32.totalorder (!%p138_p2), %s1473_s13, 1  ;;  %vm1794_vm0 = vmmov (!%p138_p2), 0  }
   0x6   : > { %141 = sbr.rel (%p138_p2) target bundleno = 285 (0x11d), region = 32  ;;  %1698 = vmatprep.subr.bf16.mxu0 (!%p138_p2), %v1793_v3  ;;  %1710 = vmatprep.subr.bf16.mxu1 (!%p138_p2), %v1793_v3  ;;  %v1835_v4 = vpack.c.bf16 (!%p138_p2), %v1482_v1, %v1481_v0  ;;  %v1496_v5 = vld [vmem:[%s2007_s1 + $0x38] sm:$0xff] (!%p138_p2)  ;;  %v1795_v7 = vmov (!%p138_p2), 0.0   ;;  %v1484_v8 = vld [vmem:[%s2007_s1 + $0x50] sm:$0xff] (!%p138_p2)  ;;  %vm174_vm1 = vcmask (!%p138_p2), 130048   ;;  %v1502_v15 = vld [vmem:[%s2007_s1 + $0x60] sm:$0xff] (!%p138_p2) }
   0x7   : > { %v1840_v6 = vpack.c.bf16 (!%p138_p2), %v1496_v5, %v1495_v2  ;;  %1590 = vmatprep.mubr.msk.f32.mxu0 (!%p138_p2), %vm1794_vm0, %v1795_v7  ;;  %1618 = vmatprep.mubr.msk.f32.mxu1 (!%p138_p2), %vm1794_vm0, %v1795_v7  ;;  %v1485_v9 = vld [vmem:[%s2007_s1 + $0x58] sm:$0xff] (!%p138_p2)  ;;  %v1488_v13 = vld [vmem:[%s2007_s1 + $0x70] sm:$0xff] (!%p138_p2)  ;;  %v1503_v16 = vld [vmem:[%s2007_s1 + $0x68] sm:$0xff] (!%p138_p2)  ;;  %vm484_vm2 = vcmask (!%p138_p2), 24576  }
   0x8   : > { %1700 = vmatpush3.bf16.msra.mxu0 (!%p138_p2), %v1835_v4  ;;  %v1859_v10 = vpack.c.bf16 (!%p138_p2), %v1485_v9, %v1484_v8  ;;  %v1489_v14 = vld [vmem:[%s2007_s1 + $0x78] sm:$0xff] (!%p138_p2)  ;;  %v1717_v20 = vpack.c.bf16 (!%p138_p2), %v1503_v16, %v1502_v15  ;;  %v1492_v21 = vld [vmem:[%s2007_s1 + $0x80] sm:$0xff] (!%p138_p2)  ;;  %v1493_v22 = vld [vmem:[%s2007_s1 + $0x88] sm:$0xff] (!%p138_p2) }
   0x9   : > { %1712 = vmatpush3.bf16.msra.mxu1 (!%p138_p2), %v1840_v6  ;;  %1701 = vmatprep.subr.bf16.mxu0 (!%p138_p2), %v1793_v3  ;;  %v1705_v18 = vpack.c.bf16 (!%p138_p2), %v1489_v14, %v1488_v13  ;;  %v1708_v24 = vpack.c.bf16 (!%p138_p2), %v1493_v22, %v1492_v21  ;;  %v1509_v26 = vld [vmem:[%s2007_s1 + $0x10] sm:$0xff] (!%p138_p2)  ;;  %v1510_v27 = vld [vmem:[%s2007_s1 + $0x18] sm:$0xff] (!%p138_p2)  ;;  %v1112_v28 = vld [vmem:[%s2007_s1] sm:$0xff] (!%p138_p2) }
   0xa   : > { %1713 = vmatprep.subr.bf16.mxu1 (!%p138_p2), %v1793_v3  ;;  %v1113_v29 = vld [vmem:[%s2007_s1 + $0x8] sm:$0xff] (!%p138_p2)  ;;  %v1723_v32 = vpack.c.bf16 (!%p138_p2), %v1510_v27, %v1509_v26  ;;  %v1512_v34 = vld [vmem:[%s2007_s1 + $0x20] sm:$0xff] (!%p138_p2) }
   0xb   : > { %v1735_v33 = vpack.c.bf16 (!%p138_p2), %v1113_v29, %v1112_v28  ;;  %v1513_v35 = vld [vmem:[%s2007_s1 + $0x28] sm:$0xff] (!%p138_p2)  ;;  %v169_v45 = vld [vmem:[%s2008_s2] sm:$0x1] (!%p138_p2) }
   0xc   : > { %v1726_v37 = vpack.c.bf16 (!%p138_p2), %v1513_v35, %v1512_v34  ;;  %v486_v46 = vld [vmem:[%s2008_s2] sm:$0x1] (!%p138_p2) }
   0xd   : > { %s2011_s13 = smov (!%p160_p3, %s1473_s13), 1  ;;  %v798_v53 = vld [vmem:[%s2008_s2] sm:$0x1] }
   0xe   : > { %s1537_s26 = sshll.u32 %s2011_s13, 2  ;;  %v1110_v54 = vld [vmem:[%s2008_s2] sm:$0x1] }
   0xf   : > { %s1866_s29 = scalar_lea.vmem %s2006_s0, %s1537_s26  ;;  %s168_s10 = scalar_lea.vmem %s2009_s3, %s1537_s26 }
  0x10   : > { %v170_v11 = vld [vmem:[%s1866_s29] sm:$0x1]  ;;  %v249_v17 = vld [vmem:[%s1866_s29 + $0x1] sm:$0x1]  ;;  %v1487_v23 = vld [vmem:[%s1866_s29 + $0x2] sm:$0x1] }
  0x11   : > { %v487_v12 = vld [vmem:[%s1866_s29] sm:$0x1]  ;;  %1591 = vmatmul.mubr.msk.f32.vlgmr.msra.gmra.mrb[0].mxu0 %vm174_vm1, %v170_v11  ;;  %v565_v19 = vld [vmem:[%s1866_s29 + $0x1] sm:$0x1]  ;;  %v1501_v25 = vld [vmem:[%s1866_s29 + $0x2] sm:$0x1] }
  0x12   : > { %1619 = vmatmul.mubr.msk.f32.vlgmr.msra.gmra.mrb[0].mxu1 %vm174_vm1, %v487_v12  ;;  %1703 = vmatpush3.bf16.msra.mxu0 %v1859_v10  ;;  %v1491_v30 = vld [vmem:[%s1866_s29 + $0x3] sm:$0x1]  ;;  %v799_v36 = vld [vmem:[%s1866_s29] sm:$0x1]  ;;  %v877_v39 = vld [vmem:[%s1866_s29 + $0x1] sm:$0x1] }
  0x13   : > { %1715 = vmatpush3.bf16.msra.mxu1 %v1835_v4  ;;  %1597 = vmatprep.mubr.msk.f32.mxu0 %vm1794_vm0, %v1795_v7  ;;  %v1505_v31 = vld [vmem:[%s1866_s29 + $0x3] sm:$0x1]  ;;  %v1111_v38 = vld [vmem:[%s1866_s29] sm:$0x1]  ;;  %v1188_v40 = vld [vmem:[%s1866_s29 + $0x1] sm:$0x1] }
  0x14   : > { %1704 = vmatprep.subr.bf16.mxu0 %v1793_v3  ;;  %1625 = vmatprep.mubr.msk.f32.mxu1 %vm1794_vm0, %v1795_v7  ;;  %v1515_v41 = vld [vmem:[%s1866_s29 + $0x2] sm:$0x1]  ;;  %v1519_v43 = vld [vmem:[%s1866_s29 + $0x3] sm:$0x1] }
  0x15   : > { %1716 = vmatprep.subr.bf16.mxu1 %v1793_v3  ;;  %v1527_v42 = vld [vmem:[%s1866_s29 + $0x2] sm:$0x1]  ;;  %v1531_v44 = vld [vmem:[%s1866_s29 + $0x3] sm:$0x1] }
  0x19   : > { %1598 = vmatmul.mubr.msk.f32.vlgmr.msra.gmra.mrb[0].mxu0 %vm174_vm1, %v249_v17 }
  0x1a   : > { %1626 = vmatmul.mubr.msk.f32.vlgmr.msra.gmra.mrb[0].mxu1 %vm174_vm1, %v565_v19  ;;  %1706 = vmatpush3.bf16.msra.mxu0 %v1705_v18 }
  0x1b   : > { %1718 = vmatpush3.bf16.msra.mxu1 %v1717_v20  ;;  %1604 = vmatprep.mubr.msk.f32.mxu0 %vm1794_vm0, %v1795_v7 }
  0x1c   : > { %1707 = vmatprep.subr.bf16.mxu0 %v1793_v3  ;;  %1632 = vmatprep.mubr.msk.f32.mxu1 %vm1794_vm0, %v1795_v7 }
  0x1d   : > { %1719 = vmatprep.subr.bf16.mxu1 %v1793_v3 }
  0x21   : > { %1605 = vmatmul.mubr.msk.f32.vlgmr.msra.gmra.mrb[0].mxu0 %vm174_vm1, %v1487_v23 }
  0x22   : > { %1633 = vmatmul.mubr.msk.f32.vlgmr.msra.gmra.mrb[0].mxu1 %vm174_vm1, %v1501_v25  ;;  %1709 = vmatpush3.bf16.msra.mxu0 %v1708_v24 }
  0x23   : > { %1721 = vmatpush3.bf16.msra.mxu1 %v1705_v18  ;;  %1611 = vmatprep.mubr.msk.f32.mxu0 %vm1794_vm0, %v1795_v7 }
  0x24   : > { %1639 = vmatprep.mubr.msk.f32.mxu1 %vm1794_vm0, %v1795_v7  ;;  %1722 = vmatprep.subr.bf16.mxu0 %v1793_v3 }
  0x25   : > { %1734 = vmatprep.subr.bf16.mxu1 %v1793_v3 }
  0x29   : > { %1612 = vmatmul.mubr.msk.f32.vlgmr.msra.gmra.mrb[0].mxu0 %vm174_vm1, %v1491_v30 }
  0x2a   : > { %1640 = vmatmul.mubr.msk.f32.vlgmr.msra.gmra.mrb[0].mxu1 %vm174_vm1, %v1505_v31  ;;  %1724 = vmatpush3.bf16.msra.mxu0 %v1723_v32 }
  0x2b   : > { %1736 = vmatpush3.bf16.msra.mxu1 %v1735_v33  ;;  %1646 = vmatprep.mubr.msk.f32.mxu0 %vm1794_vm0, %v1795_v7 }
  0x2c   : > { %1725 = vmatprep.subr.bf16.mxu0 %v1793_v3  ;;  %1674 = vmatprep.mubr.msk.f32.mxu1 %vm1794_vm0, %v1795_v7 }
  0x2d   : > { %1737 = vmatprep.subr.bf16.mxu1 %v1793_v3  ;;  %1647 = vmatmul.mubr.msk.f32.vlgmr.msra.gmra.mrb[2].mxu0 %vm174_vm1, %v799_v36 }
  0x2e   : > { %1675 = vmatmul.mubr.msk.f32.vlgmr.msra.gmra.mrb[2].mxu1 %vm174_vm1, %v1111_v38  ;;  %1727 = vmatpush3.bf16.msra.mxu0 %v1726_v37 }
  0x2f   : > { %1739 = vmatpush3.bf16.msra.mxu1 %v1723_v32  ;;  %1653 = vmatprep.mubr.msk.f32.mxu0 %vm1794_vm0, %v1795_v7 }
  0x30   : > { %1728 = vmatprep.subr.bf16.mxu0 %v1793_v3  ;;  %1681 = vmatprep.mubr.msk.f32.mxu1 %vm1794_vm0, %v1795_v7 }
  0x31   : > { %1740 = vmatprep.subr.bf16.mxu1 %v1793_v3 }
  0x35   : > { %1654 = vmatmul.mubr.msk.f32.vlgmr.msra.gmra.mrb[2].mxu0 %vm174_vm1, %v877_v39 }
  0x36   : > { %1682 = vmatmul.mubr.msk.f32.vlgmr.msra.gmra.mrb[2].mxu1 %vm174_vm1, %v1188_v40  ;;  %1730 = vmatpush3.bf16.msra.mxu0 %v1835_v4 }
  0x37   : > { %1742 = vmatpush3.bf16.msra.mxu1 %v1840_v6  ;;  %1660 = vmatprep.mubr.msk.f32.mxu0 %vm1794_vm0, %v1795_v7 }
  0x38   : > { %1731 = vmatprep.subr.bf16.mxu0 %v1793_v3  ;;  %1688 = vmatprep.mubr.msk.f32.mxu1 %vm1794_vm0, %v1795_v7 }
  0x39   : > { %1743 = vmatprep.subr.bf16.mxu1 %v1793_v3 }
  0x3d   : > { %1661 = vmatmul.mubr.msk.f32.vlgmr.msra.gmra.mrb[2].mxu0 %vm174_vm1, %v1515_v41 }
  0x3e   : > { %1689 = vmatmul.mubr.msk.f32.vlgmr.msra.gmra.mrb[2].mxu1 %vm174_vm1, %v1527_v42  ;;  %1733 = vmatpush3.bf16.msra.mxu0 %v1859_v10 }
  0x3f   : > { %1745 = vmatpush3.bf16.msra.mxu1 %v1835_v4  ;;  %1667 = vmatprep.mubr.msk.f32.mxu0 %vm1794_vm0, %v1795_v7 }
  0x40   : > { %1695 = vmatprep.mubr.msk.f32.mxu1 %vm1794_vm0, %v1795_v7 }
  0x45   : > { %1668 = vmatmul.mubr.msk.f32.vlgmr.msra.gmra.mrb[2].mxu0 %vm174_vm1, %v1519_v43 }
  0x46   : > { %1696 = vmatmul.mubr.msk.f32.vlgmr.msra.gmra.mrb[2].mxu1 %vm174_vm1, %v1531_v44 }
  0xfc   : > { %v479_v47 = vpop.f32.mrb[0].mxu0 }
  0xfd   : > { %v792_v48 = vpop.f32.mrb[0].mxu1  ;;  %v1746_v49 = vadd.f32 %v479_v47, %v169_v45  ;;  %v1613_v51 = vpop.f32.mrb[1].mxu0 }
  0xfe   : > { %v1747_v50 = vadd.f32 %v792_v48, %v486_v46  ;;  %v1641_v52 = vpop.f32.mrb[1].mxu1 }
  0xff   : > { %485 = vst.msk [vmem:[%s168_s10] sm:$0x1] %vm484_vm2, %v1746_v49 }
 0x100   : > { %797 = vst.msk [vmem:[%s168_s10 + $0x1] sm:$0x1] %vm484_vm2, %v1747_v50 }
 0x118   : > { %v1104_v55 = vpop.f32.mrb[2].mxu0 }
 0x119   : > { %v1414_v56 = vpop.f32.mrb[2].mxu1  ;;  %v1748_v57 = vadd.f32 %v1104_v55, %v798_v53  ;;  %v1669_v59 = vpop.f32.mrb[3].mxu0 }
 0x11a   : > { %v1749_v58 = vadd.f32 %v1414_v56, %v1110_v54  ;;  %v1697_v60 = vpop.f32.mrb[3].mxu1 }
 0x11b   : > { %1109 = vst.msk [vmem:[%s168_s10 + $0x2] sm:$0x1] %vm484_vm2, %v1748_v57 }
 0x11c   : > { %1419 = vst.msk [vmem:[%s168_s10 + $0x3] sm:$0x1] %vm484_vm2, %v1749_v58 }
 0x11d PF: > { %s13_s12 = sadd.s32 1, %s1791_s12  }
 0x11e   : > { %p10_p4 = scmp.ge.s32.totalorder %s13_s12, 4  }
 0x120   :  { %12 = sbr.rel (!%p10_p4) target bundleno = 1 (0x1), region = 71 }

// kernel: local_attention_forward.7
= control target key start
LH: loop header
LB: loop body
LE: loop exit
PB: predicated region body
PF: predicated region fallthrough
CT: control target
= control target key end

     0   :  { %s2684_s12 = smov 0   ;;  %s2930_s0 = inlined_call_operand.vmem [shape: f32[2,4,4,16], index: 0, kind: input, shape index: {}]   ;;  %s2931_s1 = inlined_call_operand.vmem [shape: f32[3,3,16,16], index: 1, kind: input, shape index: {}]   ;;  %s2932_s2 = inlined_call_operand.vmem [shape: f32[1,16], index: 2, kind: input, shape index: {}]   ;;  %s2933_s3 = inlined_call_operand.vmem [shape: f32[2,4,16], index: 3, kind: output, shape index: {}]  }
   0x1 LB: > { %s2168_s13 = sadd.s32 4294967295, %s2659_s12   ;;  %p2172_p0 = scmp.ge.s32.totalorder %s2659_s12, 1  ;;  %s2659_s12 = sphi %s2684_s12, %s13_s12  }
   0x2   : > { %p137_p1 = scmp.lt.s32.totalorder %s2659_s12, 3 }
   0x4   : > { %p138_p2 = pnand %p2172_p0, %p137_p1 }
   0x5   : > { %v2196_v0 = vld [vmem:[%s2931_s1 + $0x50] sm:$0xff] (!%p138_p2)  ;;  %v2197_v1 = vld [vmem:[%s2931_s1 + $0x58] sm:$0xff] (!%p138_p2)  ;;  %v2176_v2 = vld [vmem:[%s2931_s1 + $0x40] sm:$0xff] (!%p138_p2)  ;;  %v2661_v3 = vmov (!%p138_p2), 0.0|0.0   ;;  %p160_p3 = scmp.lt.s32.totalorder (!%p138_p2), %s2168_s13, 1  ;;  %vm2662_vm0 = vmmov (!%p138_p2), 0  }
   0x6   : > { %141 = sbr.rel (%p138_p2) target bundleno = 324 (0x144), region = 32  ;;  %2540 = vmatprep.subr.bf16.mxu1 (!%p138_p2), %v2661_v3  ;;  %2522 = vmatprep.subr.bf16.mxu0 (!%p138_p2), %v2661_v3  ;;  %v2703_v4 = vpack.c.bf16 (!%p138_p2), %v2197_v1, %v2196_v0  ;;  %v2177_v5 = vld [vmem:[%s2931_s1 + $0x48] sm:$0xff] (!%p138_p2)  ;;  %v2663_v7 = vmov (!%p138_p2), 0.0   ;;  %v2200_v8 = vld [vmem:[%s2931_s1 + $0x60] sm:$0xff] (!%p138_p2)  ;;  %vm174_vm1 = vcmask (!%p138_p2), 130048   ;;  %v2204_v13 = vld [vmem:[%s2931_s1 + $0x70] sm:$0xff] (!%p138_p2) }
   0x7   : > { %v2708_v6 = vpack.c.bf16 (!%p138_p2), %v2177_v5, %v2176_v2  ;;  %2351 = vmatprep.mubr.msk.f32.mxu0 (!%p138_p2), %vm2662_vm0, %v2663_v7  ;;  %2393 = vmatprep.mubr.msk.f32.mxu1 (!%p138_p2), %vm2662_vm0, %v2663_v7  ;;  %v2201_v9 = vld [vmem:[%s2931_s1 + $0x68] sm:$0xff] (!%p138_p2)  ;;  %v2205_v14 = vld [vmem:[%s2931_s1 + $0x78] sm:$0xff] (!%p138_p2)  ;;  %v2208_v18 = vld [vmem:[%s2931_s1 + $0x80] sm:$0xff] (!%p138_p2)  ;;  %vm484_vm2 = vcmask (!%p138_p2), 122880  }
   0x8   : > { %2542 = vmatpush3.bf16.msra.mxu1 (!%p138_p2), %v2703_v4  ;;  %v2726_v10 = vpack.c.bf16 (!%p138_p2), %v2201_v9, %v2200_v8  ;;  %v2754_v17 = vpack.c.bf16 (!%p138_p2), %v2205_v14, %v2204_v13  ;;  %v2209_v19 = vld [vmem:[%s2931_s1 + $0x88] sm:$0xff] (!%p138_p2)  ;;  %v1422_v23 = vld [vmem:[%s2931_s1] sm:$0xff] (!%p138_p2)  ;;  %v2190_v25 = vld [vmem:[%s2931_s1 + $0x30] sm:$0xff] (!%p138_p2) }
   0x9   : > { %2524 = vmatpush3.bf16.msra.mxu0 (!%p138_p2), %v2708_v6  ;;  %2543 = vmatprep.subr.bf16.mxu1 (!%p138_p2), %v2661_v3  ;;  %v2774_v22 = vpack.c.bf16 (!%p138_p2), %v2209_v19, %v2208_v18  ;;  %v1423_v24 = vld [vmem:[%s2931_s1 + $0x8] sm:$0xff] (!%p138_p2)  ;;  %v2191_v26 = vld [vmem:[%s2931_s1 + $0x38] sm:$0xff] (!%p138_p2)  ;;  %v2238_v31 = vld [vmem:[%s2931_s1 + $0x10] sm:$0xff] (!%p138_p2) }
   0xa   : > { %2525 = vmatprep.subr.bf16.mxu0 (!%p138_p2), %v2661_v3  ;;  %v2571_v29 = vpack.c.bf16 (!%p138_p2), %v1423_v24, %v1422_v23  ;;  %v2535_v30 = vpack.c.bf16 (!%p138_p2), %v2191_v26, %v2190_v25  ;;  %v2239_v32 = vld [vmem:[%s2931_s1 + $0x18] sm:$0xff] (!%p138_p2)  ;;  %v2242_v36 = vld [vmem:[%s2931_s1 + $0x20] sm:$0xff] (!%p138_p2)  ;;  %v2243_v37 = vld [vmem:[%s2931_s1 + $0x28] sm:$0xff] (!%p138_p2) }
   0xb   : > { %v2574_v35 = vpack.c.bf16 (!%p138_p2), %v2239_v32, %v2238_v31  ;;  %v2577_v40 = vpack.c.bf16 (!%p138_p2), %v2243_v37, %v2242_v36  ;;  %v169_v54 = vld [vmem:[%s2932_s2] sm:$0x1] (!%p138_p2) }
   0xc   : > { %v486_v60 = vld [vmem:[%s2932_s2] sm:$0x1] (!%p138_p2) }
   0xd   : > { %s2935_s13 = smov (!%p160_p3, %s2168_s13), 1  ;;  %v952_v1 = vld [vmem:[%s2932_s2] sm:$0x1] }
   0xe   : > { %s2271_s26 = sshll.u32 %s2935_s13, 4  ;;  %s2175_s30 = sshll.u32 %s2935_s13, 2  ;;  %v1420_v5 = vld [vmem:[%s2932_s2] sm:$0x1] }
   0xf   : > { %s2732_s29 = scalar_lea.vmem %s2930_s0, %s2271_s26  ;;  %s168_s8 = scalar_lea.vmem %s2933_s3, %s2175_s30 }
  0x10   : > { %v170_v11 = vld [vmem:[%s2732_s29] sm:$0x1]  ;;  %v642_v12 = vld [vmem:[%s2732_s29 + $0x3] sm:$0x1]  ;;  %v249_v15 = vld [vmem:[%s2732_s29 + $0x1] sm:$0x1] }
  0x11   : > { %2352 = vmatmul.mubr.msk.f32.vlgmr.msra.gmra.mrb[0].mxu0 %vm174_vm1, %v170_v11  ;;  %2394 = vmatmul.mubr.msk.f32.vlgmr.msra.gmra.mrb[0].mxu1 %vm174_vm1, %v642_v12  ;;  %v2199_v16 = vld [vmem:[%s2732_s29 + $0x5] sm:$0x1]  ;;  %v2182_v20 = vld [vmem:[%s2732_s29 + $0x4] sm:$0x1]  ;;  %v2203_v21 = vld [vmem:[%s2732_s29 + $0x6] sm:$0x1] }
  0x12   : > { %2545 = vmatpush3.bf16.msra.mxu1 %v2726_v10  ;;  %2527 = vmatpush3.bf16.msra.mxu0 %v2703_v4  ;;  %v2186_v27 = vld [vmem:[%s2732_s29 + $0x5] sm:$0x1]  ;;  %v2207_v28 = vld [vmem:[%s2732_s29 + $0x7] sm:$0x1]  ;;  %v487_v33 = vld [vmem:[%s2732_s29 + $0x1] sm:$0x1] }
  0x13   : > { %2358 = vmatprep.mubr.msk.f32.mxu0 %vm2662_vm0, %v2663_v7  ;;  %2400 = vmatprep.mubr.msk.f32.mxu1 %vm2662_vm0, %v2663_v7  ;;  %v2235_v34 = vld [vmem:[%s2732_s29 + $0x5] sm:$0x1]  ;;  %v565_v38 = vld [vmem:[%s2732_s29 + $0x2] sm:$0x1]  ;;  %v2237_v39 = vld [vmem:[%s2732_s29 + $0x6] sm:$0x1] }
  0x14   : > { %2546 = vmatprep.subr.bf16.mxu1 %v2661_v3  ;;  %2528 = vmatprep.subr.bf16.mxu0 %v2661_v3  ;;  %v2211_v41 = vld [vmem:[%s2732_s29 + $0x4] sm:$0x1]  ;;  %v2241_v42 = vld [vmem:[%s2732_s29 + $0x7] sm:$0x1]  ;;  %v2215_v43 = vld [vmem:[%s2732_s29 + $0x5] sm:$0x1] }
  0x15   : > { %v2245_v44 = vld [vmem:[%s2732_s29 + $0x9] sm:$0x1]  ;;  %v2219_v45 = vld [vmem:[%s2732_s29 + $0x8] sm:$0x1]  ;;  %v2249_v46 = vld [vmem:[%s2732_s29 + $0xa] sm:$0x1] }
  0x16   : > { %v2223_v47 = vld [vmem:[%s2732_s29 + $0x9] sm:$0x1]  ;;  %v2253_v48 = vld [vmem:[%s2732_s29 + $0xb] sm:$0x1]  ;;  %v2227_v49 = vld [vmem:[%s2732_s29 + $0xc] sm:$0x1] }
  0x17   : > { %v2257_v50 = vld [vmem:[%s2732_s29 + $0xd] sm:$0x1]  ;;  %v2261_v52 = vld [vmem:[%s2732_s29 + $0xe] sm:$0x1]  ;;  %v2265_v53 = vld [vmem:[%s2732_s29 + $0xf] sm:$0x1] }
  0x18   : > { %v2231_v51 = vld [vmem:[%s2732_s29 + $0xd] sm:$0x1] }
  0x19   : > { %2359 = vmatmul.mubr.msk.f32.vlgmr.msra.gmra.mrb[0].mxu0 %vm174_vm1, %v249_v15  ;;  %2401 = vmatmul.mubr.msk.f32.vlgmr.msra.gmra.mrb[0].mxu1 %vm174_vm1, %v2199_v16 }
  0x1a   : > { %2548 = vmatpush3.bf16.msra.mxu1 %v2754_v17  ;;  %2530 = vmatpush3.bf16.msra.mxu0 %v2754_v17 }
  0x1b   : > { %2365 = vmatprep.mubr.msk.f32.mxu0 %vm2662_vm0, %v2663_v7  ;;  %2407 = vmatprep.mubr.msk.f32.mxu1 %vm2662_vm0, %v2663_v7 }
  0x1c   : > { %2549 = vmatprep.subr.bf16.mxu1 %v2661_v3  ;;  %2531 = vmatprep.subr.bf16.mxu0 %v2661_v3 }
  0x21   : > { %2366 = vmatmul.mubr.msk.f32.vlgmr.msra.gmra.mrb[0].mxu0 %vm174_vm1, %v2182_v20  ;;  %2408 = vmatmul.mubr.msk.f32.vlgmr.msra.gmra.mrb[0].mxu1 %vm174_vm1, %v2203_v21 }
  0x22   : > { %2551 = vmatpush3.bf16.msra.mxu1 %v2774_v22  ;;  %2533 = vmatpush3.bf16.msra.mxu0 %v2774_v22 }
  0x23   : > { %2372 = vmatprep.mubr.msk.f32.mxu0 %vm2662_vm0, %v2663_v7  ;;  %2414 = vmatprep.mubr.msk.f32.mxu1 %vm2662_vm0, %v2663_v7 }
  0x24   : > { %2570 = vmatprep.subr.bf16.mxu1 %v2661_v3  ;;  %2534 = vmatprep.subr.bf16.mxu0 %v2661_v3 }
  0x29   : > { %2373 = vmatmul.mubr.msk.f32.vlgmr.msra.gmra.mrb[0].mxu0 %vm174_vm1, %v2186_v27  ;;  %2415 = vmatmul.mubr.msk.f32.vlgmr.msra.gmra.mrb[0].mxu1 %vm174_vm1, %v2207_v28 }
  0x2a   : > { %2572 = vmatpush3.bf16.msra.mxu1 %v2571_v29  ;;  %2536 = vmatpush3.bf16.msra.mxu0 %v2535_v30 }
  0x2b   : > { %2379 = vmatprep.mubr.msk.f32.mxu0 %vm2662_vm0, %v2663_v7  ;;  %2463 = vmatprep.mubr.msk.f32.mxu1 %vm2662_vm0, %v2663_v7 }
  0x2c   : > { %2573 = vmatprep.subr.bf16.mxu1 %v2661_v3  ;;  %2537 = vmatprep.subr.bf16.mxu0 %v2661_v3 }
  0x2d   : > { %2380 = vmatmul.mubr.msk.f32.vlgmr.msra.gmra.mrb[2].mxu0 %vm174_vm1, %v487_v33  ;;  %2464 = vmatmul.mubr.msk.f32.vlgmr.msra.gmra.mrb[2].mxu1 %vm174_vm1, %v2235_v34 }
  0x2e   : > { %2575 = vmatpush3.bf16.msra.mxu1 %v2574_v35  ;;  %2539 = vmatpush3.bf16.msra.mxu0 %v2708_v6 }
  0x2f   : > { %2386 = vmatprep.mubr.msk.f32.mxu0 %vm2662_vm0, %v2663_v7  ;;  %2470 = vmatprep.mubr.msk.f32.mxu1 %vm2662_vm0, %v2663_v7 }
  0x30   : > { %2576 = vmatprep.subr.bf16.mxu1 %v2661_v3  ;;  %2552 = vmatprep.subr.bf16.mxu0 %v2661_v3 }
  0x35   : > { %2387 = vmatmul.mubr.msk.f32.vlgmr.msra.gmra.mrb[2].mxu0 %vm174_vm1, %v565_v38  ;;  %2471 = vmatmul.mubr.msk.f32.vlgmr.msra.gmra.mrb[2].mxu1 %vm174_vm1, %v2237_v39 }
  0x36   : > { %2578 = vmatpush3.bf16.msra.mxu1 %v2577_v40  ;;  %2554 = vmatpush3.bf16.msra.mxu0 %v2574_v35 }
  0x37   : > { %2421 = vmatprep.mubr.msk.f32.mxu0 %vm2662_vm0, %v2663_v7  ;;  %2477 = vmatprep.mubr.msk.f32.mxu1 %vm2662_vm0, %v2663_v7 }
  0x38   : > { %2579 = vmatprep.subr.bf16.mxu1 %v2661_v3  ;;  %2555 = vmatprep.subr.bf16.mxu0 %v2661_v3 }
  0x39   : > { %2422 = vmatmul.mubr.msk.f32.vlgmr.msra.gmra.mrb[4].mxu0 %vm174_vm1, %v2211_v41 }
  0x3a   : > { %2557 = vmatpush3.bf16.msra.mxu0 %v2577_v40  ;;  %2428 = vmatprep.mubr.msk.f32.mxu0 %vm2662_vm0, %v2663_v7 }
  0x3b   : > { %2558 = vmatprep.subr.bf16.mxu0 %v2661_v3 }
  0x3d   : > { %2478 = vmatmul.mubr.msk.f32.vlgmr.msra.gmra.mrb[2].mxu1 %vm174_vm1, %v2241_v42 }
  0x3e   : > { %2581 = vmatpush3.bf16.msra.mxu1 %v2535_v30  ;;  %2484 = vmatprep.mubr.msk.f32.mxu1 %vm2662_vm0, %v2663_v7 }
  0x3f   : > { %2582 = vmatprep.subr.bf16.mxu1 %v2661_v3 }
  0x41   : > { %2429 = vmatmul.mubr.msk.f32.vlgmr.msra.gmra.mrb[4].mxu0 %vm174_vm1, %v2215_v43 }
  0x42   : > { %2560 = vmatpush3.bf16.msra.mxu0 %v2708_v6  ;;  %2435 = vmatprep.mubr.msk.f32.mxu0 %vm2662_vm0, %v2663_v7 }
  0x43   : > { %2561 = vmatprep.subr.bf16.mxu0 %v2661_v3 }
  0x45   : > { %2485 = vmatmul.mubr.msk.f32.vlgmr.msra.gmra.mrb[2].mxu1 %vm174_vm1, %v2245_v44 }
  0x46   : > { %2584 = vmatpush3.bf16.msra.mxu1 %v2708_v6  ;;  %2491 = vmatprep.mubr.msk.f32.mxu1 %vm2662_vm0, %v2663_v7 }
  0x47   : > { %2585 = vmatprep.subr.bf16.mxu1 %v2661_v3 }
  0x49   : > { %2436 = vmatmul.mubr.msk.f32.vlgmr.msra.gmra.mrb[4].mxu0 %vm174_vm1, %v2219_v45 }
  0x4a   : > { %2563 = vmatpush3.bf16.msra.mxu0 %v2703_v4  ;;  %2442 = vmatprep.mubr.msk.f32.mxu0 %vm2662_vm0, %v2663_v7 }
  0x4b   : > { %2564 = vmatprep.subr.bf16.mxu0 %v2661_v3 }
  0x4d   : > { %2492 = vmatmul.mubr.msk.f32.vlgmr.msra.gmra.mrb[2].mxu1 %vm174_vm1, %v2249_v46 }
  0x4e   : > { %2587 = vmatpush3.bf16.msra.mxu1 %v2703_v4  ;;  %2498 = vmatprep.mubr.msk.f32.mxu1 %vm2662_vm0, %v2663_v7 }
  0x4f   : > { %2588 = vmatprep.subr.bf16.mxu1 %v2661_v3 }
  0x51   : > { %2443 = vmatmul.mubr.msk.f32.vlgmr.msra.gmra.mrb[4].mxu0 %vm174_vm1, %v2223_v47 }
  0x52   : > { %2566 = vmatpush3.bf16.msra.mxu0 %v2754_v17  ;;  %2449 = vmatprep.mubr.msk.f32.mxu0 %vm2662_vm0, %v2663_v7 }
  0x53   : > { %2567 = vmatprep.subr.bf16.mxu0 %v2661_v3 }
  0x55   : > { %2499 = vmatmul.mubr.msk.f32.vlgmr.msra.gmra.mrb[2].mxu1 %vm174_vm1, %v2253_v48 }
  0x56   : > { %2590 = vmatpush3.bf16.msra.mxu1 %v2726_v10  ;;  %2505 = vmatprep.mubr.msk.f32.mxu1 %vm2662_vm0, %v2663_v7 }
  0x57   : > { %2591 = vmatprep.subr.bf16.mxu1 %v2661_v3 }
  0x59   : > { %2450 = vmatmul.mubr.msk.f32.vlgmr.msra.gmra.mrb[4].mxu0 %vm174_vm1, %v2227_v49 }
  0x5a   : > { %2569 = vmatpush3.bf16.msra.mxu0 %v2774_v22  ;;  %2456 = vmatprep.mubr.msk.f32.mxu0 %vm2662_vm0, %v2663_v7 }
  0x5d   : > { %2506 = vmatmul.mubr.msk.f32.vlgmr.msra.gmra.mrb[2].mxu1 %vm174_vm1, %v2257_v50 }
  0x5e   : > { %2593 = vmatpush3.bf16.msra.mxu1 %v2754_v17  ;;  %2512 = vmatprep.mubr.msk.f32.mxu1 %vm2662_vm0, %v2663_v7 }
  0x5f   : > { %2594 = vmatprep.subr.bf16.mxu1 %v2661_v3 }
  0x61   : > { %2457 = vmatmul.mubr.msk.f32.vlgmr.msra.gmra.mrb[4].mxu0 %vm174_vm1, %v2231_v51 }
  0x65   : > { %2513 = vmatmul.mubr.msk.f32.vlgmr.msra.gmra.mrb[2].mxu1 %vm174_vm1, %v2261_v52 }
  0x66   : > { %2596 = vmatpush3.bf16.msra.mxu1 %v2774_v22  ;;  %2519 = vmatprep.mubr.msk.f32.mxu1 %vm2662_vm0, %v2663_v7 }
  0x6d   : > { %2520 = vmatmul.mubr.msk.f32.vlgmr.msra.gmra.mrb[2].mxu1 %vm174_vm1, %v2265_v53 }
  0xfc   : > { %v479_v55 = vpop.f32.mrb[0].mxu0  ;;  %v946_v56 = vpop.f32.mrb[0].mxu1 }
  0xfd   : > { %v2597_v57 = vadd.f32 %v479_v55, %v169_v54  ;;  %v2374_v58 = vpop.f32.mrb[1].mxu0  ;;  %v2416_v59 = vpop.f32.mrb[1].mxu1 }
  0xff   : > { %485 = vst.msk [vmem:[%s168_s8] sm:$0x1] %vm484_vm2, %v2597_v57 }
 0x108   : > { %v637_v61 = vpop.f32.mrb[2].mxu0 }
 0x109   : > { %v2598_v62 = vadd.f32 %v637_v61, %v486_v60  ;;  %v2388_v63 = vpop.f32.mrb[3].mxu0 }
 0x10b   : > { %v2599_v0 = vadd.f32 %v2598_v62, %v946_v56 }
 0x10d   : > { %951 = vst.msk [vmem:[%s168_s8 + $0x1] sm:$0x1] %vm484_vm2, %v2599_v0 }
 0x134   : > { %v1414_v2 = vpop.f32.mrb[4].mxu0 }
 0x135   : > { %v2600_v3 = vadd.f32 %v1414_v2, %v952_v1  ;;  %v2458_v4 = vpop.f32.mrb[5].mxu0 }
 0x137   : > { %1419 = vst.msk [vmem:[%s168_s8 + $0x2] sm:$0x1] %vm484_vm2, %v2600_v3 }
 0x140   : > { %v2109_v6 = vpop.f32.mrb[2].mxu1 }
 0x141   : > { %v2601_v7 = vadd.f32 %v2109_v6, %v1420_v5  ;;  %v2521_v8 = vpop.f32.mrb[3].mxu1 }
 0x143   : > { %2114 = vst.msk [vmem:[%s168_s8 + $0x3] sm:$0x1] %vm484_vm2, %v2601_v7 }
 0x144 PF: > { %s13_s12 = sadd.s32 1, %s2659_s12  }
 0x145   : > { %p10_p4 = scmp.ge.s32.totalorder %s13_s12, 4  }
 0x147   :  { %12 = sbr.rel (!%p10_p4) target bundleno = 1 (0x1), region = 73 }

// kernel: local_attention_forward.9
= control target key start
LH: loop header
LB: loop body
LE: loop exit
PB: predicated region body
PF: predicated region fallthrough
CT: control target
= control target key end

     0   :  { %s619_s12 = smov 0   ;;  %s621_s13 = smov 0   ;;  %s662_s0 = inlined_call_operand.vmem [shape: f32[2,4,256], index: 0, kind: input, shape index: {}]   ;;  %s663_s1 = inlined_call_operand.vmem [shape: f32[2,4,4], index: 1, kind: input, shape index: {}]   ;;  %s664_s2 = inlined_call_operand.vmem [shape: f32[4,256], index: 2, kind: input, shape index: {}]   ;;  %s665_s3 = inlined_call_operand.vmem [shape: f32[2,4,256], index: 3, kind: output, shape index: {}]  }
   0x1   :  { %s623_s14 = smov 0  }
   0x2 LB: > { %s25_s15 = sadd.s32 1, %s592_s13  ;;  %p527_p0 = scmp.ge.s32.totalorder %s596_s14, 1  ;;  %s596_s14 = sphi %s623_s14, %s13_s14   ;;  %s592_s13 = sphi %s621_s13, %s667_s13   ;;  %s588_s12 = sphi %s619_s12, %s666_s12  }
   0x3   : > { %p27_p1 = scmp.ge.s32.totalorder %s25_s15, 2  ;;  %p178_p2 = scmp.lt.s32.totalorder %s596_s14, 3 }
   0x5   : > { %s669_s15 = smov (%p27_p1, %s25_s15), 0  ;;  %p179_p3 = pnand %p527_p0, %p178_p2 }
   0x6   : > { %p220_p4 = scmp.lt.s32.totalorder (!%p179_p3), %s588_s12, 1  ;;  %v257_v0 = vld [vmem:[%s664_s2] sm:$0xff] (!%p179_p3)  ;;  %vm296_vm0 = vcmask (!%p179_p3), 1043456   ;;  %v598_v2 = vmov (!%p179_p3), 0.0   ;;  %vm292_vm1 = vcmask (!%p179_p3), 31744   ;;  %v384_v15 = vlaneseq (!%p179_p3) }
   0x7   : > { %182 = sbr.rel (%p179_p3) target bundleno = 395 (0x18b), region = 32  ;;  %v291_v1 = vcombine.high (!%p179_p3), %v257_v0, %v257_v0  ;;  %365 = vmatprep.mubr.f32.mxu0 (!%p179_p3), %v598_v2 }
   0x8   : > { %v385_v16 = vshrl.u32 (!%p179_p3), %v384_v15, 7 }
   0x9   : > { %533 = vmatprep.subr.msk.mxu0 (!%p179_p3), %vm296_vm0, %v291_v1 }
   0xa   : > { %534 = vmatpush1.msk.msra.mxu0 (!%p179_p3), %vm296_vm0, %v257_v0  ;;  %v386_v17 = vsub.s32 (!%p179_p3), 0, %v385_v16  ;;  %v390_v18 = vsub.s32 (!%p179_p3), 4, %v385_v16 }
   0xe   : > { %s671_s12 = smov (!%p220_p4, %s588_s12), 1 }
   0xf   : > { %s530_s18 = sshll.u32 %s671_s12, 2  ;;  %s538_s22 = sshll.u32 %s671_s12, 3 }
  0x10   : > { %s232_s21 = scalar_lea.vmem %s663_s1, %s530_s18  ;;  %s227_s25 = scalar_lea.vmem %s662_s0, %s538_s22 }
  0x11   : > { %v250_v3 = vld [vmem:[%s232_s21] sm:$0xf]  ;;  %s247_s28 = scalar_lea.vmem %s665_s3, %s538_s22 }
  0x12   : > { %v251_v4 = vsub.f32 0.0, %v250_v3  ;;  %v249_v10 = vld [vmem:[%s227_s25] sm:$0xff] }
  0x13   : > { %v372_v11 = vsub.f32 0.0, %v249_v10 }
  0x14   : > { %v252_v5 = vmul.f32 1.442695, %v251_v4 }
  0x15   : > { %v373_v12 = vmul.f32 1.442695, %v372_v11 }
  0x16   : > { %566 = vpow2.f32 %v252_v5 }
  0x20   : > { %v567_v6 = vpop.eup %566 }
  0x21   : > { %v254_v7 = vadd.f32 1.0, %v567_v6 }
  0x23   : > { %568 = vrcp.f32 %v254_v7 }
  0x24   : > { %570 = vpow2.f32 %v373_v12 }
  0x2d   : > { %v569_v8 = vpop.eup %568 }
  0x2e   : > { %258 = vxpose.xlu0.b32.start.end [1/1] (short) (narrow) %v569_v8, 8  ;;  %v571_v13 = vpop.eup %570 }
  0x2f   : > { %v375_v14 = vadd.f32 1.0, %v571_v13 }
  0x31   : > { %572 = vrcp.f32 %v375_v14 }
  0x3b   : > { %v573_v19 = vpop.eup %572 }
  0x3c   : > { %v387_v20 = vrot.slane %v573_v19, %v386_v17  ;;  %v391_v21 = vrot.slane %v573_v19, %v390_v18 }
  0x3e   : > { %v397_v22 = vrot.slane %v387_v20, %v386_v17  ;;  %v401_v23 = vrot.slane %v391_v21, %v386_v17 }
  0x40   : > { %v404_v27 = vcombine.low %v397_v22, %v401_v23 }
  0xae   : > { %v274_v9 = vpop.trf.xlu0 }
  0xaf   : > { %535 = vmatmul.mubr.msk.f32.vlgmr.msra.gmra.mrb[0].mxu0 %vm292_vm1, %v274_v9 }
 0x182   : > { %v367_v24 = vpop.f32.mrb[0].mxu0 }
 0x183   : > { %v369_v25 = vpop.f32.mrb[1].mxu0 }
 0x184   : > { %v380_v26 = vcombine.low %v367_v24, %v369_v25 }
 0x186   : > { %v382_v28 = vmul.f32 %v380_v26, %v249_v10 }
 0x188   : > { %v406_v29 = vmul.f32 %v404_v27, %v382_v28 }
 0x18a   : > { %407 = vst [vmem:[%s247_s28] sm:$0xff] %v406_v29 }
 0x18b PF: > { %s13_s14 = sadd.s32 1, %s596_s14   ;;  %s666_s12 = smov %s592_s13 }
 0x18c   : > { %p10_p5 = scmp.ge.s32.totalorder %s13_s14, 4   ;;  %s667_s13 = smov %s669_s15 }
 0x18e   :  { %12 = sbr.rel (!%p10_p5) target bundleno = 2 (0x2), region = 68 }

</bundles_post_ra>
